<compile_context>
chip_gen: v7x
topology: tpu7x:2x2x1
jax: 0.10.0
libtpu: 0.0.40
codegen_flags: <defaults>
</compile_context>

<pallas_src>
import functools

import jax
import jax.numpy as jnp
from jax.experimental import pallas as pl
from jax.experimental.pallas import tpu as pltpu


def _spatial_attention_kernel(x_ref, w_ref, o_ref, sum_acc, max_acc, pad_sc,
                              *, K, PAD, H, W, C, C_BLK):
    # x_ref:   [1, C_BLK, H*W]   (VMEM block, lane-dense spatial)
    # w_ref:   [2*K*K]           (SMEM, flattened conv weight, layout [in_ch, ky, kx])
    # o_ref:   [1, 1, H*W]       (VMEM, resident across the C axis)
    # sum_acc: [1, H*W] f32      running channel sum
    # max_acc: [1, H*W] f32      running channel max
    # pad_sc:  [2, H+2p, W+2p] f32  zero-padded avg/max map for the conv
    HW = H * W
    c = pl.program_id(1)
    nc = pl.num_programs(1)

    # ---- init accumulators at the first C-block ----
    @pl.when(c == 0)
    def _init():
        sum_acc[...] = jnp.zeros_like(sum_acc)
        max_acc[...] = jnp.full_like(max_acc, -jnp.inf)  # NOT 0: inputs may be all-negative

    # ---- streaming channel reduction (spatial on lanes, C on sublanes) ----
    x = x_ref[0]                            # [C_BLK, HW], input dtype (f32 or bf16)
    xf = x.astype(jnp.float32)              # widen only this bounded slab
    if C % C_BLK != 0:
        # last block extends past C: mask out-of-range channel rows
        valid = jnp.minimum(C - c * C_BLK, C_BLK)
        rows = jax.lax.broadcasted_iota(jnp.int32, (C_BLK, HW), 0)
        inb = rows < valid
        blk_sum = jnp.sum(jnp.where(inb, xf, 0.0), axis=0, keepdims=True)
        blk_max = jnp.max(jnp.where(inb, xf, -jnp.inf), axis=0, keepdims=True)
    else:
        blk_sum = jnp.sum(xf, axis=0, keepdims=True)
        blk_max = jnp.max(xf, axis=0, keepdims=True)

    sum_acc[...] = sum_acc[...] + blk_sum
    max_acc[...] = jnp.maximum(max_acc[...], blk_max)

    # ---- last C-block: pad tiny 2-ch map, KxK conv, sigmoid, lane-dense store ----
    @pl.when(c == nc - 1)
    def _finalize():
        KK = K * K
        # Hoist all SMEM weight reads out of the tap loop (scalar reads, done once).
        w_avg = [w_ref[t] for t in range(KK)]
        w_max = [w_ref[KK + t] for t in range(KK)]

        avg_flat = sum_acc[...] * jnp.float32(1.0 / C)   # (1, HW) == torch.mean(x, 1)
        max_flat = max_acc[...]                          # (1, HW) == torch.max(x, 1)

        # Build the zero-padded [2, Hp, Wp] map in VMEM scratch (row-wise copies
        # from the lane-dense accumulators; tiny, runs once per batch element).
        pad_sc[...] = jnp.zeros_like(pad_sc)
        for y in range(H):
            pad_sc[0, PAD + y:PAD + y + 1, PAD:PAD + W] = avg_flat[:, y * W:(y + 1) * W]
            pad_sc[1, PAD + y:PAD + y + 1, PAD:PAD + W] = max_flat[:, y * W:(y + 1) * W]

        p_avg = pad_sc[0]                                # (Hp, Wp)
        p_max = pad_sc[1]

        # KxK depth-2 conv, statically unrolled, kept on VPU/XLU (1 out-channel).
        acc = jnp.zeros((H, W), jnp.float32)
        for ky in range(K):
            for kx in range(K):
                t = ky * K + kx
                acc = acc + p_avg[ky:ky + H, kx:kx + W] * w_avg[t]
                acc = acc + p_max[ky:ky + H, kx:kx + W] * w_max[t]

        sig = jax.nn.sigmoid(acc).astype(o_ref.dtype)    # (H, W)
        for y in range(H):
            o_ref[0, 0:1, y * W:(y + 1) * W] = sig[y:y + 1, :]


def spatial_attention(x, conv_weight, kernel_size=7, c_block=None):
    """x: [B, C, H, W] (f32 or bf16); conv_weight: [1, 2, K, K] (no bias)."""
    assert kernel_size in (3, 7), "kernel size must be 3 or 7"
    pad = 3 if kernel_size == 7 else 1
    B, C, H, W = x.shape
    HW = H * W
    Hp, Wp = H + 2 * pad, W + 2 * pad

    # Free layout plumbing: NCHW row-major -> [B, C, H*W] (lane-dense spatial).
    x_flat = x.reshape(B, C, HW)
    w_flat = conv_weight.reshape(-1).astype(jnp.float32)     # [2*K*K], [in, ky, kx]

    # C-block sizing: keep one slab <= ~4 MiB so double-buffering + the f32
    # widening stay far below the 32 MiB scoped-VMEM limit (safe on v5e/v6e/v7x).
    itemsize = jnp.dtype(x.dtype).itemsize
    if c_block is None:
        c_blk = max(1, (4 * 1024 * 1024) // (HW * itemsize))
    else:
        c_blk = max(1, int(c_block))
    if c_blk >= C:
        c_blk = C
    else:
        # second-to-last block dim must be a multiple of 8 (or the full dim)
        c_blk = min(max(8, (c_blk // 8) * 8), C)
    nc = pl.cdiv(C, c_blk)

    kernel = functools.partial(
        _spatial_attention_kernel,
        K=kernel_size, PAD=pad, H=H, W=W, C=C, C_BLK=c_blk)

    out_flat = pl.pallas_call(
        kernel,
        out_shape=jax.ShapeDtypeStruct((B, 1, HW), x.dtype),
        grid=(B, nc),
        in_specs=[
            pl.BlockSpec((1, c_blk, HW), lambda b, c: (b, c, 0)),       # x slabs
            pl.BlockSpec(memory_space=pltpu.MemorySpace.SMEM),          # conv weights
        ],
        out_specs=pl.BlockSpec((1, 1, HW), lambda b, c: (b, 0, 0)),     # resident over C
        scratch_shapes=[
            pltpu.VMEM((1, HW), jnp.float32),          # running sum
            pltpu.VMEM((1, HW), jnp.float32),          # running max
            pltpu.VMEM((2, Hp, Wp), jnp.float32),      # padded 2-channel map
        ],
        compiler_params=pltpu.CompilerParams(
            dimension_semantics=("parallel", "arbitrary"),
            vmem_limit_bytes=32 * 1024 * 1024,
        ),
    )(x_flat, w_flat)

    return out_flat.reshape(B, 1, H, W)


def _reference(x, conv_weight, kernel_size=7):
    # Pure-JAX reference reproducing the PyTorch forward.
    pad = 3 if kernel_size == 7 else 1
    avg_out = jnp.mean(x, axis=1, keepdims=True)
    max_out = jnp.max(x, axis=1, keepdims=True)
    cat = jnp.concatenate([avg_out, max_out], axis=1)  # [B, 2, H, W]
    y = jax.lax.conv_general_dilated(
        cat, conv_weight,
        window_strides=(1, 1),
        padding=[(pad, pad), (pad, pad)],
        dimension_numbers=("NCHW", "OIHW", "NCHW"),
    )
    return jax.nn.sigmoid(y)


if __name__ == "__main__":
    key = jax.random.PRNGKey(0)
    kx, kw, kx2 = jax.random.split(key, 3)

    B, C, H, W = 2, 4, 16, 16
    kernel_size = 7

    x = jax.random.normal(kx, (B, C, H, W), dtype=jnp.float32)
    # Deterministic synthetic weights for Conv2d(2, 1, 7, bias=False): [1, 2, 7, 7]
    conv_weight = 0.1 * jax.random.normal(
        kw, (1, 2, kernel_size, kernel_size), dtype=jnp.float32)

    out = jax.block_until_ready(spatial_attention(x, conv_weight, kernel_size))
    ref = _reference(x, conv_weight, kernel_size)
    assert out.shape == (B, 1, H, W), out.shape
    assert jnp.allclose(out, ref, atol=1e-5, rtol=1e-5), float(
        jnp.max(jnp.abs(out - ref)))

    # Exercise the C-blocked streaming/accumulation path (multiple grid steps).
    C2 = 24
    x2 = jax.random.normal(kx2, (B, C2, H, W), dtype=jnp.float32)
    out2 = jax.block_until_ready(
        spatial_attention(x2, conv_weight, kernel_size, c_block=8))
    ref2 = _reference(x2, conv_weight, kernel_size)
    assert jnp.allclose(out2, ref2, atol=1e-5, rtol=1e-5), float(
        jnp.max(jnp.abs(out2 - ref2)))

    print("KERNEL_OK")
</pallas_src>

<mosaic_0001>
module attributes {stable_mosaic.version = 11 : i64} {
  func.func @_spatial_attention_kernel(%arg0: i32, %arg1: i32, %arg2: memref<1x4x256xf32, #tpu.memory_space<vmem>>, %arg3: memref<98xf32, #tpu.memory_space<smem>>, %arg4: memref<1x1x256xf32, #tpu.memory_space<vmem>>, %arg5: memref<1x256xf32, #tpu.memory_space<vmem>>, %arg6: memref<1x256xf32, #tpu.memory_space<vmem>>, %arg7: memref<2x22x22xf32, #tpu.memory_space<vmem>>) attributes {dimension_semantics = [#tpu.dimension_semantics<parallel>, #tpu.dimension_semantics<arbitrary>], iteration_bounds = array<i64: 2, 1>, scalar_prefetch = 0 : i64, scratch_operands = 3 : i64, tpu.core_type = #tpu.core_type<tc>, window_params = [{transform_indices = @transform_0, window_bounds = array<i64: 1, 4, 256>}, {transform_indices = @transform_1, window_bounds = array<i64: 98>}, {transform_indices = @transform_2, window_bounds = array<i64: 1, 1, 256>}]} {
    %c0_i32 = arith.constant 0 : i32
    %0 = arith.cmpi eq, %arg1, %c0_i32 : i32
    %1 = arith.extui %0 : i1 to i32
    %c0_i32_0 = arith.constant 0 : i32
    %2 = arith.cmpi ne, %1, %c0_i32_0 : i32
    scf.if %2 {
      %cst_14 = arith.constant 0.000000e+00 : f32
      %18 = vector.broadcast %cst_14 : f32 to vector<1x256xf32>
      %c0_15 = arith.constant 0 : index
      %c0_16 = arith.constant 0 : index
      %19 = vector.load %arg5[%c0_15, %c0_16] : memref<1x256xf32, #tpu.memory_space<vmem>>, vector<1x256xf32>
      tpu.vector_store %arg5[%c0_15, %c0_16], %18 {strides = array<i32>} : memref<1x256xf32, #tpu.memory_space<vmem>>, vector<1x256xf32>,
      %cst_17 = arith.constant 0xFF800000 : f32
      %20 = vector.broadcast %cst_17 : f32 to vector<1x256xf32>
      %c0_18 = arith.constant 0 : index
      %c0_19 = arith.constant 0 : index
      %21 = vector.load %arg6[%c0_18, %c0_19] : memref<1x256xf32, #tpu.memory_space<vmem>>, vector<1x256xf32>
      tpu.vector_store %arg6[%c0_18, %c0_19], %20 {strides = array<i32>} : memref<1x256xf32, #tpu.memory_space<vmem>>, vector<1x256xf32>,
    } else {
    }
    %c0 = arith.constant 0 : index
    %c0_1 = arith.constant 0 : index
    %c0_2 = arith.constant 0 : index
    %3 = vector.load %arg2[%c0, %c0_1, %c0_2] : memref<1x4x256xf32, #tpu.memory_space<vmem>>, vector<1x4x256xf32>
    %4 = vector.shape_cast %3 : vector<1x4x256xf32> to vector<4x256xf32>
    %cst = arith.constant dense<0.000000e+00> : vector<256xf32>
    %5 = vector.multi_reduction <add>, %4, %cst [0] : vector<4x256xf32> to vector<256xf32>
    %6 = vector.shape_cast %5 : vector<256xf32> to vector<1x256xf32>
    %cst_3 = arith.constant dense<0xFF800000> : vector<256xf32>
    %7 = vector.multi_reduction <maximumf>, %4, %cst_3 [0] : vector<4x256xf32> to vector<256xf32>
    %8 = vector.shape_cast %7 : vector<256xf32> to vector<1x256xf32>
    %c0_4 = arith.constant 0 : index
    %c0_5 = arith.constant 0 : index
    %9 = vector.load %arg5[%c0_4, %c0_5] : memref<1x256xf32, #tpu.memory_space<vmem>>, vector<1x256xf32>
    %10 = arith.addf %9, %6 : vector<1x256xf32>
    %c0_6 = arith.constant 0 : index
    %c0_7 = arith.constant 0 : index
    %11 = vector.load %arg5[%c0_6, %c0_7] : memref<1x256xf32, #tpu.memory_space<vmem>>, vector<1x256xf32>
    tpu.vector_store %arg5[%c0_6, %c0_7], %10 {strides = array<i32>} : memref<1x256xf32, #tpu.memory_space<vmem>>, vector<1x256xf32>,
    %c0_8 = arith.constant 0 : index
    %c0_9 = arith.constant 0 : index
    %12 = vector.load %arg6[%c0_8, %c0_9] : memref<1x256xf32, #tpu.memory_space<vmem>>, vector<1x256xf32>
    %13 = arith.maximumf %12, %8 : vector<1x256xf32>
    %c0_10 = arith.constant 0 : index
    %c0_11 = arith.constant 0 : index
    %14 = vector.load %arg6[%c0_10, %c0_11] : memref<1x256xf32, #tpu.memory_space<vmem>>, vector<1x256xf32>
    tpu.vector_store %arg6[%c0_10, %c0_11], %13 {strides = array<i32>} : memref<1x256xf32, #tpu.memory_space<vmem>>, vector<1x256xf32>,
    %c0_i32_12 = arith.constant 0 : i32
    %15 = arith.cmpi eq, %arg1, %c0_i32_12 : i32
    %16 = arith.extui %15 : i1 to i32
    %c0_i32_13 = arith.constant 0 : i32
    %17 = arith.cmpi ne, %16, %c0_i32_13 : i32
    scf.if %17 {
      %c0_14 = arith.constant 0 : index
      %18 = memref.load %arg3[%c0_14] : memref<98xf32, #tpu.memory_space<smem>>
      %c1 = arith.constant 1 : index
      %19 = memref.load %arg3[%c1] : memref<98xf32, #tpu.memory_space<smem>>
      %c2 = arith.constant 2 : index
      %20 = memref.load %arg3[%c2] : memref<98xf32, #tpu.memory_space<smem>>
      %c3 = arith.constant 3 : index
      %21 = memref.load %arg3[%c3] : memref<98xf32, #tpu.memory_space<smem>>
      %c4 = arith.constant 4 : index
      %22 = memref.load %arg3[%c4] : memref<98xf32, #tpu.memory_space<smem>>
      %c5 = arith.constant 5 : index
      %23 = memref.load %arg3[%c5] : memref<98xf32, #tpu.memory_space<smem>>
      %c6 = arith.constant 6 : index
      %24 = memref.load %arg3[%c6] : memref<98xf32, #tpu.memory_space<smem>>
      %c7 = arith.constant 7 : index
      %25 = memref.load %arg3[%c7] : memref<98xf32, #tpu.memory_space<smem>>
      %c8 = arith.constant 8 : index
      %26 = memref.load %arg3[%c8] : memref<98xf32, #tpu.memory_space<smem>>
      %c9 = arith.constant 9 : index
      %27 = memref.load %arg3[%c9] : memref<98xf32, #tpu.memory_space<smem>>
      %c10 = arith.constant 10 : index
      %28 = memref.load %arg3[%c10] : memref<98xf32, #tpu.memory_space<smem>>
      %c11 = arith.constant 11 : index
      %29 = memref.load %arg3[%c11] : memref<98xf32, #tpu.memory_space<smem>>
      %c12 = arith.constant 12 : index
      %30 = memref.load %arg3[%c12] : memref<98xf32, #tpu.memory_space<smem>>
      %c13 = arith.constant 13 : index
      %31 = memref.load %arg3[%c13] : memref<98xf32, #tpu.memory_space<smem>>
      %c14 = arith.constant 14 : index
      %32 = memref.load %arg3[%c14] : memref<98xf32, #tpu.memory_space<smem>>
      %c15 = arith.constant 15 : index
      %33 = memref.load %arg3[%c15] : memref<98xf32, #tpu.memory_space<smem>>
      %c16 = arith.constant 16 : index
      %34 = memref.load %arg3[%c16] : memref<98xf32, #tpu.memory_space<smem>>
      %c17 = arith.constant 17 : index
      %35 = memref.load %arg3[%c17] : memref<98xf32, #tpu.memory_space<smem>>
      %c18 = arith.constant 18 : index
      %36 = memref.load %arg3[%c18] : memref<98xf32, #tpu.memory_space<smem>>
      %c19 = arith.constant 19 : index
      %37 = memref.load %arg3[%c19] : memref<98xf32, #tpu.memory_space<smem>>
      %c20 = arith.constant 20 : index
      %38 = memref.load %arg3[%c20] : memref<98xf32, #tpu.memory_space<smem>>
      %c21 = arith.constant 21 : index
      %39 = memref.load %arg3[%c21] : memref<98xf32, #tpu.memory_space<smem>>
      %c22 = arith.constant 22 : index
      %40 = memref.load %arg3[%c22] : memref<98xf32, #tpu.memory_space<smem>>
      %c23 = arith.constant 23 : index
      %41 = memref.load %arg3[%c23] : memref<98xf32, #tpu.memory_space<smem>>
      %c24 = arith.constant 24 : index
      %42 = memref.load %arg3[%c24] : memref<98xf32, #tpu.memory_space<smem>>
      %c25 = arith.constant 25 : index
      %43 = memref.load %arg3[%c25] : memref<98xf32, #tpu.memory_space<smem>>
      %c26 = arith.constant 26 : index
      %44 = memref.load %arg3[%c26] : memref<98xf32, #tpu.memory_space<smem>>
      %c27 = arith.constant 27 : index
      %45 = memref.load %arg3[%c27] : memref<98xf32, #tpu.memory_space<smem>>
      %c28 = arith.constant 28 : index
      %46 = memref.load %arg3[%c28] : memref<98xf32, #tpu.memory_space<smem>>
      %c29 = arith.constant 29 : index
      %47 = memref.load %arg3[%c29] : memref<98xf32, #tpu.memory_space<smem>>
      %c30 = arith.constant 30 : index
      %48 = memref.load %arg3[%c30] : memref<98xf32, #tpu.memory_space<smem>>
      %c31 = arith.constant 31 : index
      %49 = memref.load %arg3[%c31] : memref<98xf32, #tpu.memory_space<smem>>
      %c32 = arith.constant 32 : index
      %50 = memref.load %arg3[%c32] : memref<98xf32, #tpu.memory_space<smem>>
      %c33 = arith.constant 33 : index
      %51 = memref.load %arg3[%c33] : memref<98xf32, #tpu.memory_space<smem>>
      %c34 = arith.constant 34 : index
      %52 = memref.load %arg3[%c34] : memref<98xf32, #tpu.memory_space<smem>>
      %c35 = arith.constant 35 : index
      %53 = memref.load %arg3[%c35] : memref<98xf32, #tpu.memory_space<smem>>
      %c36 = arith.constant 36 : index
      %54 = memref.load %arg3[%c36] : memref<98xf32, #tpu.memory_space<smem>>
      %c37 = arith.constant 37 : index
      %55 = memref.load %arg3[%c37] : memref<98xf32, #tpu.memory_space<smem>>
      %c38 = arith.constant 38 : index
      %56 = memref.load %arg3[%c38] : memref<98xf32, #tpu.memory_space<smem>>
      %c39 = arith.constant 39 : index
      %57 = memref.load %arg3[%c39] : memref<98xf32, #tpu.memory_space<smem>>
      %c40 = arith.constant 40 : index
      %58 = memref.load %arg3[%c40] : memref<98xf32, #tpu.memory_space<smem>>
      %c41 = arith.constant 41 : index
      %59 = memref.load %arg3[%c41] : memref<98xf32, #tpu.memory_space<smem>>
      %c42 = arith.constant 42 : index
      %60 = memref.load %arg3[%c42] : memref<98xf32, #tpu.memory_space<smem>>
      %c43 = arith.constant 43 : index
      %61 = memref.load %arg3[%c43] : memref<98xf32, #tpu.memory_space<smem>>
      %c44 = arith.constant 44 : index
      %62 = memref.load %arg3[%c44] : memref<98xf32, #tpu.memory_space<smem>>
      %c45 = arith.constant 45 : index
      %63 = memref.load %arg3[%c45] : memref<98xf32, #tpu.memory_space<smem>>
      %c46 = arith.constant 46 : index
      %64 = memref.load %arg3[%c46] : memref<98xf32, #tpu.memory_space<smem>>
      %c47 = arith.constant 47 : index
      %65 = memref.load %arg3[%c47] : memref<98xf32, #tpu.memory_space<smem>>
      %c48 = arith.constant 48 : index
      %66 = memref.load %arg3[%c48] : memref<98xf32, #tpu.memory_space<smem>>
      %c49 = arith.constant 49 : index
      %67 = memref.load %arg3[%c49] : memref<98xf32, #tpu.memory_space<smem>>
      %c50 = arith.constant 50 : index
      %68 = memref.load %arg3[%c50] : memref<98xf32, #tpu.memory_space<smem>>
      %c51 = arith.constant 51 : index
      %69 = memref.load %arg3[%c51] : memref<98xf32, #tpu.memory_space<smem>>
      %c52 = arith.constant 52 : index
      %70 = memref.load %arg3[%c52] : memref<98xf32, #tpu.memory_space<smem>>
      %c53 = arith.constant 53 : index
      %71 = memref.load %arg3[%c53] : memref<98xf32, #tpu.memory_space<smem>>
      %c54 = arith.constant 54 : index
      %72 = memref.load %arg3[%c54] : memref<98xf32, #tpu.memory_space<smem>>
      %c55 = arith.constant 55 : index
      %73 = memref.load %arg3[%c55] : memref<98xf32, #tpu.memory_space<smem>>
      %c56 = arith.constant 56 : index
      %74 = memref.load %arg3[%c56] : memref<98xf32, #tpu.memory_space<smem>>
      %c57 = arith.constant 57 : index
      %75 = memref.load %arg3[%c57] : memref<98xf32, #tpu.memory_space<smem>>
      %c58 = arith.constant 58 : index
      %76 = memref.load %arg3[%c58] : memref<98xf32, #tpu.memory_space<smem>>
      %c59 = arith.constant 59 : index
      %77 = memref.load %arg3[%c59] : memref<98xf32, #tpu.memory_space<smem>>
      %c60 = arith.constant 60 : index
      %78 = memref.load %arg3[%c60] : memref<98xf32, #tpu.memory_space<smem>>
      %c61 = arith.constant 61 : index
      %79 = memref.load %arg3[%c61] : memref<98xf32, #tpu.memory_space<smem>>
      %c62 = arith.constant 62 : index
      %80 = memref.load %arg3[%c62] : memref<98xf32, #tpu.memory_space<smem>>
      %c63 = arith.constant 63 : index
      %81 = memref.load %arg3[%c63] : memref<98xf32, #tpu.memory_space<smem>>
      %c64 = arith.constant 64 : index
      %82 = memref.load %arg3[%c64] : memref<98xf32, #tpu.memory_space<smem>>
      %c65 = arith.constant 65 : index
      %83 = memref.load %arg3[%c65] : memref<98xf32, #tpu.memory_space<smem>>
      %c66 = arith.constant 66 : index
      %84 = memref.load %arg3[%c66] : memref<98xf32, #tpu.memory_space<smem>>
      %c67 = arith.constant 67 : index
      %85 = memref.load %arg3[%c67] : memref<98xf32, #tpu.memory_space<smem>>
      %c68 = arith.constant 68 : index
      %86 = memref.load %arg3[%c68] : memref<98xf32, #tpu.memory_space<smem>>
      %c69 = arith.constant 69 : index
      %87 = memref.load %arg3[%c69] : memref<98xf32, #tpu.memory_space<smem>>
      %c70 = arith.constant 70 : index
      %88 = memref.load %arg3[%c70] : memref<98xf32, #tpu.memory_space<smem>>
      %c71 = arith.constant 71 : index
      %89 = memref.load %arg3[%c71] : memref<98xf32, #tpu.memory_space<smem>>
      %c72 = arith.constant 72 : index
      %90 = memref.load %arg3[%c72] : memref<98xf32, #tpu.memory_space<smem>>
      %c73 = arith.constant 73 : index
      %91 = memref.load %arg3[%c73] : memref<98xf32, #tpu.memory_space<smem>>
      %c74 = arith.constant 74 : index
      %92 = memref.load %arg3[%c74] : memref<98xf32, #tpu.memory_space<smem>>
      %c75 = arith.constant 75 : index
      %93 = memref.load %arg3[%c75] : memref<98xf32, #tpu.memory_space<smem>>
      %c76 = arith.constant 76 : index
      %94 = memref.load %arg3[%c76] : memref<98xf32, #tpu.memory_space<smem>>
      %c77 = arith.constant 77 : index
      %95 = memref.load %arg3[%c77] : memref<98xf32, #tpu.memory_space<smem>>
      %c78 = arith.constant 78 : index
      %96 = memref.load %arg3[%c78] : memref<98xf32, #tpu.memory_space<smem>>
      %c79 = arith.constant 79 : index
      %97 = memref.load %arg3[%c79] : memref<98xf32, #tpu.memory_space<smem>>
      %c80 = arith.constant 80 : index
      %98 = memref.load %arg3[%c80] : memref<98xf32, #tpu.memory_space<smem>>
      %c81 = arith.constant 81 : index
      %99 = memref.load %arg3[%c81] : memref<98xf32, #tpu.memory_space<smem>>
      %c82 = arith.constant 82 : index
      %100 = memref.load %arg3[%c82] : memref<98xf32, #tpu.memory_space<smem>>
      %c83 = arith.constant 83 : index
      %101 = memref.load %arg3[%c83] : memref<98xf32, #tpu.memory_space<smem>>
      %c84 = arith.constant 84 : index
      %102 = memref.load %arg3[%c84] : memref<98xf32, #tpu.memory_space<smem>>
      %c85 = arith.constant 85 : index
      %103 = memref.load %arg3[%c85] : memref<98xf32, #tpu.memory_space<smem>>
      %c86 = arith.constant 86 : index
      %104 = memref.load %arg3[%c86] : memref<98xf32, #tpu.memory_space<smem>>
      %c87 = arith.constant 87 : index
      %105 = memref.load %arg3[%c87] : memref<98xf32, #tpu.memory_space<smem>>
      %c88 = arith.constant 88 : index
      %106 = memref.load %arg3[%c88] : memref<98xf32, #tpu.memory_space<smem>>
      %c89 = arith.constant 89 : index
      %107 = memref.load %arg3[%c89] : memref<98xf32, #tpu.memory_space<smem>>
      %c90 = arith.constant 90 : index
      %108 = memref.load %arg3[%c90] : memref<98xf32, #tpu.memory_space<smem>>
      %c91 = arith.constant 91 : index
      %109 = memref.load %arg3[%c91] : memref<98xf32, #tpu.memory_space<smem>>
      %c92 = arith.constant 92 : index
      %110 = memref.load %arg3[%c92] : memref<98xf32, #tpu.memory_space<smem>>
      %c93 = arith.constant 93 : index
      %111 = memref.load %arg3[%c93] : memref<98xf32, #tpu.memory_space<smem>>
      %c94 = arith.constant 94 : index
      %112 = memref.load %arg3[%c94] : memref<98xf32, #tpu.memory_space<smem>>
      %c95 = arith.constant 95 : index
      %113 = memref.load %arg3[%c95] : memref<98xf32, #tpu.memory_space<smem>>
      %c96 = arith.constant 96 : index
      %114 = memref.load %arg3[%c96] : memref<98xf32, #tpu.memory_space<smem>>
      %c97 = arith.constant 97 : index
      %115 = memref.load %arg3[%c97] : memref<98xf32, #tpu.memory_space<smem>>
      %c0_15 = arith.constant 0 : index
      %c0_16 = arith.constant 0 : index
      %116 = vector.load %arg5[%c0_15, %c0_16] : memref<1x256xf32, #tpu.memory_space<vmem>>, vector<1x256xf32>
      %cst_17 = arith.constant 2.500000e-01 : f32
      %117 = vector.broadcast %cst_17 : f32 to vector<1x256xf32>
      %118 = arith.mulf %116, %117 : vector<1x256xf32>
      %c0_18 = arith.constant 0 : index
      %c0_19 = arith.constant 0 : index
      %119 = vector.load %arg6[%c0_18, %c0_19] : memref<1x256xf32, #tpu.memory_space<vmem>>, vector<1x256xf32>
      %cst_20 = arith.constant 0.000000e+00 : f32
      %120 = vector.broadcast %cst_20 : f32 to vector<2x22x22xf32>
      %c0_21 = arith.constant 0 : index
      %c0_22 = arith.constant 0 : index
      %c0_23 = arith.constant 0 : index
      %121 = vector.load %arg7[%c0_21, %c0_22, %c0_23] : memref<2x22x22xf32, #tpu.memory_space<vmem>>, vector<2x22x22xf32>
      tpu.vector_store %arg7[%c0_21, %c0_22, %c0_23], %120 {strides = array<i32>} : memref<2x22x22xf32, #tpu.memory_space<vmem>>, vector<2x22x22xf32>,
      %122 = vector.extract_strided_slice %118 {offsets = [0, 0], sizes = [1, 16], strides = [1, 1]} : vector<1x256xf32> to vector<1x16xf32>
      %c0_24 = arith.constant 0 : index
      %c3_25 = arith.constant 3 : index
      %c3_26 = arith.constant 3 : index
      %123 = vector.load %arg7[%c0_24, %c3_25, %c3_26] : memref<2x22x22xf32, #tpu.memory_space<vmem>>, vector<1x1x16xf32>
      %124 = vector.shape_cast %123 : vector<1x1x16xf32> to vector<1x16xf32>
      %125 = vector.shape_cast %122 : vector<1x16xf32> to vector<1x1x16xf32>
      tpu.vector_store %arg7[%c0_24, %c3_25, %c3_26], %125 {strides = array<i32>} : memref<2x22x22xf32, #tpu.memory_space<vmem>>, vector<1x1x16xf32>,
      %126 = vector.extract_strided_slice %119 {offsets = [0, 0], sizes = [1, 16], strides = [1, 1]} : vector<1x256xf32> to vector<1x16xf32>
      %c1_27 = arith.constant 1 : index
      %c3_28 = arith.constant 3 : index
      %c3_29 = arith.constant 3 : index
      %127 = vector.load %arg7[%c1_27, %c3_28, %c3_29] : memref<2x22x22xf32, #tpu.memory_space<vmem>>, vector<1x1x16xf32>
      %128 = vector.shape_cast %127 : vector<1x1x16xf32> to vector<1x16xf32>
      %129 = vector.shape_cast %126 : vector<1x16xf32> to vector<1x1x16xf32>
      tpu.vector_store %arg7[%c1_27, %c3_28, %c3_29], %129 {strides = array<i32>} : memref<2x22x22xf32, #tpu.memory_space<vmem>>, vector<1x1x16xf32>,
      %130 = vector.extract_strided_slice %118 {offsets = [0, 16], sizes = [1, 16], strides = [1, 1]} : vector<1x256xf32> to vector<1x16xf32>
      %c0_30 = arith.constant 0 : index
      %c4_31 = arith.constant 4 : index
      %c3_32 = arith.constant 3 : index
      %131 = vector.load %arg7[%c0_30, %c4_31, %c3_32] : memref<2x22x22xf32, #tpu.memory_space<vmem>>, vector<1x1x16xf32>
      %132 = vector.shape_cast %131 : vector<1x1x16xf32> to vector<1x16xf32>
      %133 = vector.shape_cast %130 : vector<1x16xf32> to vector<1x1x16xf32>
      tpu.vector_store %arg7[%c0_30, %c4_31, %c3_32], %133 {strides = array<i32>} : memref<2x22x22xf32, #tpu.memory_space<vmem>>, vector<1x1x16xf32>,
      %134 = vector.extract_strided_slice %119 {offsets = [0, 16], sizes = [1, 16], strides = [1, 1]} : vector<1x256xf32> to vector<1x16xf32>
      %c1_33 = arith.constant 1 : index
      %c4_34 = arith.constant 4 : index
      %c3_35 = arith.constant 3 : index
      %135 = vector.load %arg7[%c1_33, %c4_34, %c3_35] : memref<2x22x22xf32, #tpu.memory_space<vmem>>, vector<1x1x16xf32>
      %136 = vector.shape_cast %135 : vector<1x1x16xf32> to vector<1x16xf32>
      %137 = vector.shape_cast %134 : vector<1x16xf32> to vector<1x1x16xf32>
      tpu.vector_store %arg7[%c1_33, %c4_34, %c3_35], %137 {strides = array<i32>} : memref<2x22x22xf32, #tpu.memory_space<vmem>>, vector<1x1x16xf32>,
      %138 = vector.extract_strided_slice %118 {offsets = [0, 32], sizes = [1, 16], strides = [1, 1]} : vector<1x256xf32> to vector<1x16xf32>
      %c0_36 = arith.constant 0 : index
      %c5_37 = arith.constant 5 : index
      %c3_38 = arith.constant 3 : index
      %139 = vector.load %arg7[%c0_36, %c5_37, %c3_38] : memref<2x22x22xf32, #tpu.memory_space<vmem>>, vector<1x1x16xf32>
      %140 = vector.shape_cast %139 : vector<1x1x16xf32> to vector<1x16xf32>
      %141 = vector.shape_cast %138 : vector<1x16xf32> to vector<1x1x16xf32>
      tpu.vector_store %arg7[%c0_36, %c5_37, %c3_38], %141 {strides = array<i32>} : memref<2x22x22xf32, #tpu.memory_space<vmem>>, vector<1x1x16xf32>,
      %142 = vector.extract_strided_slice %119 {offsets = [0, 32], sizes = [1, 16], strides = [1, 1]} : vector<1x256xf32> to vector<1x16xf32>
      %c1_39 = arith.constant 1 : index
      %c5_40 = arith.constant 5 : index
      %c3_41 = arith.constant 3 : index
      %143 = vector.load %arg7[%c1_39, %c5_40, %c3_41] : memref<2x22x22xf32, #tpu.memory_space<vmem>>, vector<1x1x16xf32>
      %144 = vector.shape_cast %143 : vector<1x1x16xf32> to vector<1x16xf32>
      %145 = vector.shape_cast %142 : vector<1x16xf32> to vector<1x1x16xf32>
      tpu.vector_store %arg7[%c1_39, %c5_40, %c3_41], %145 {strides = array<i32>} : memref<2x22x22xf32, #tpu.memory_space<vmem>>, vector<1x1x16xf32>,
      %146 = vector.extract_strided_slice %118 {offsets = [0, 48], sizes = [1, 16], strides = [1, 1]} : vector<1x256xf32> to vector<1x16xf32>
      %c0_42 = arith.constant 0 : index
      %c6_43 = arith.constant 6 : index
      %c3_44 = arith.constant 3 : index
      %147 = vector.load %arg7[%c0_42, %c6_43, %c3_44] : memref<2x22x22xf32, #tpu.memory_space<vmem>>, vector<1x1x16xf32>
      %148 = vector.shape_cast %147 : vector<1x1x16xf32> to vector<1x16xf32>
      %149 = vector.shape_cast %146 : vector<1x16xf32> to vector<1x1x16xf32>
      tpu.vector_store %arg7[%c0_42, %c6_43, %c3_44], %149 {strides = array<i32>} : memref<2x22x22xf32, #tpu.memory_space<vmem>>, vector<1x1x16xf32>,
      %150 = vector.extract_strided_slice %119 {offsets = [0, 48], sizes = [1, 16], strides = [1, 1]} : vector<1x256xf32> to vector<1x16xf32>
      %c1_45 = arith.constant 1 : index
      %c6_46 = arith.constant 6 : index
      %c3_47 = arith.constant 3 : index
      %151 = vector.load %arg7[%c1_45, %c6_46, %c3_47] : memref<2x22x22xf32, #tpu.memory_space<vmem>>, vector<1x1x16xf32>
      %152 = vector.shape_cast %151 : vector<1x1x16xf32> to vector<1x16xf32>
      %153 = vector.shape_cast %150 : vector<1x16xf32> to vector<1x1x16xf32>
      tpu.vector_store %arg7[%c1_45, %c6_46, %c3_47], %153 {strides = array<i32>} : memref<2x22x22xf32, #tpu.memory_space<vmem>>, vector<1x1x16xf32>,
      %154 = vector.extract_strided_slice %118 {offsets = [0, 64], sizes = [1, 16], strides = [1, 1]} : vector<1x256xf32> to vector<1x16xf32>
      %c0_48 = arith.constant 0 : index
      %c7_49 = arith.constant 7 : index
      %c3_50 = arith.constant 3 : index
      %155 = vector.load %arg7[%c0_48, %c7_49, %c3_50] : memref<2x22x22xf32, #tpu.memory_space<vmem>>, vector<1x1x16xf32>
      %156 = vector.shape_cast %155 : vector<1x1x16xf32> to vector<1x16xf32>
      %157 = vector.shape_cast %154 : vector<1x16xf32> to vector<1x1x16xf32>
      tpu.vector_store %arg7[%c0_48, %c7_49, %c3_50], %157 {strides = array<i32>} : memref<2x22x22xf32, #tpu.memory_space<vmem>>, vector<1x1x16xf32>,
      %158 = vector.extract_strided_slice %119 {offsets = [0, 64], sizes = [1, 16], strides = [1, 1]} : vector<1x256xf32> to vector<1x16xf32>
      %c1_51 = arith.constant 1 : index
      %c7_52 = arith.constant 7 : index
      %c3_53 = arith.constant 3 : index
      %159 = vector.load %arg7[%c1_51, %c7_52, %c3_53] : memref<2x22x22xf32, #tpu.memory_space<vmem>>, vector<1x1x16xf32>
      %160 = vector.shape_cast %159 : vector<1x1x16xf32> to vector<1x16xf32>
      %161 = vector.shape_cast %158 : vector<1x16xf32> to vector<1x1x16xf32>
      tpu.vector_store %arg7[%c1_51, %c7_52, %c3_53], %161 {strides = array<i32>} : memref<2x22x22xf32, #tpu.memory_space<vmem>>, vector<1x1x16xf32>,
      %162 = vector.extract_strided_slice %118 {offsets = [0, 80], sizes = [1, 16], strides = [1, 1]} : vector<1x256xf32> to vector<1x16xf32>
      %c0_54 = arith.constant 0 : index
      %c8_55 = arith.constant 8 : index
      %c3_56 = arith.constant 3 : index
      %163 = vector.load %arg7[%c0_54, %c8_55, %c3_56] : memref<2x22x22xf32, #tpu.memory_space<vmem>>, vector<1x1x16xf32>
      %164 = vector.shape_cast %163 : vector<1x1x16xf32> to vector<1x16xf32>
      %165 = vector.shape_cast %162 : vector<1x16xf32> to vector<1x1x16xf32>
      tpu.vector_store %arg7[%c0_54, %c8_55, %c3_56], %165 {strides = array<i32>} : memref<2x22x22xf32, #tpu.memory_space<vmem>>, vector<1x1x16xf32>,
      %166 = vector.extract_strided_slice %119 {offsets = [0, 80], sizes = [1, 16], strides = [1, 1]} : vector<1x256xf32> to vector<1x16xf32>
      %c1_57 = arith.constant 1 : index
      %c8_58 = arith.constant 8 : index
      %c3_59 = arith.constant 3 : index
      %167 = vector.load %arg7[%c1_57, %c8_58, %c3_59] : memref<2x22x22xf32, #tpu.memory_space<vmem>>, vector<1x1x16xf32>
      %168 = vector.shape_cast %167 : vector<1x1x16xf32> to vector<1x16xf32>
      %169 = vector.shape_cast %166 : vector<1x16xf32> to vector<1x1x16xf32>
      tpu.vector_store %arg7[%c1_57, %c8_58, %c3_59], %169 {strides = array<i32>} : memref<2x22x22xf32, #tpu.memory_space<vmem>>, vector<1x1x16xf32>,
      %170 = vector.extract_strided_slice %118 {offsets = [0, 96], sizes = [1, 16], strides = [1, 1]} : vector<1x256xf32> to vector<1x16xf32>
      %c0_60 = arith.constant 0 : index
      %c9_61 = arith.constant 9 : index
      %c3_62 = arith.constant 3 : index
      %171 = vector.load %arg7[%c0_60, %c9_61, %c3_62] : memref<2x22x22xf32, #tpu.memory_space<vmem>>, vector<1x1x16xf32>
      %172 = vector.shape_cast %171 : vector<1x1x16xf32> to vector<1x16xf32>
      %173 = vector.shape_cast %170 : vector<1x16xf32> to vector<1x1x16xf32>
      tpu.vector_store %arg7[%c0_60, %c9_61, %c3_62], %173 {strides = array<i32>} : memref<2x22x22xf32, #tpu.memory_space<vmem>>, vector<1x1x16xf32>,
      %174 = vector.extract_strided_slice %119 {offsets = [0, 96], sizes = [1, 16], strides = [1, 1]} : vector<1x256xf32> to vector<1x16xf32>
      %c1_63 = arith.constant 1 : index
      %c9_64 = arith.constant 9 : index
      %c3_65 = arith.constant 3 : index
      %175 = vector.load %arg7[%c1_63, %c9_64, %c3_65] : memref<2x22x22xf32, #tpu.memory_space<vmem>>, vector<1x1x16xf32>
      %176 = vector.shape_cast %175 : vector<1x1x16xf32> to vector<1x16xf32>
      %177 = vector.shape_cast %174 : vector<1x16xf32> to vector<1x1x16xf32>
      tpu.vector_store %arg7[%c1_63, %c9_64, %c3_65], %177 {strides = array<i32>} : memref<2x22x22xf32, #tpu.memory_space<vmem>>, vector<1x1x16xf32>,
      %178 = vector.extract_strided_slice %118 {offsets = [0, 112], sizes = [1, 16], strides = [1, 1]} : vector<1x256xf32> to vector<1x16xf32>
      %c0_66 = arith.constant 0 : index
      %c10_67 = arith.constant 10 : index
      %c3_68 = arith.constant 3 : index
      %179 = vector.load %arg7[%c0_66, %c10_67, %c3_68] : memref<2x22x22xf32, #tpu.memory_space<vmem>>, vector<1x1x16xf32>
      %180 = vector.shape_cast %179 : vector<1x1x16xf32> to vector<1x16xf32>
      %181 = vector.shape_cast %178 : vector<1x16xf32> to vector<1x1x16xf32>
      tpu.vector_store %arg7[%c0_66, %c10_67, %c3_68], %181 {strides = array<i32>} : memref<2x22x22xf32, #tpu.memory_space<vmem>>, vector<1x1x16xf32>,
      %182 = vector.extract_strided_slice %119 {offsets = [0, 112], sizes = [1, 16], strides = [1, 1]} : vector<1x256xf32> to vector<1x16xf32>
      %c1_69 = arith.constant 1 : index
      %c10_70 = arith.constant 10 : index
      %c3_71 = arith.constant 3 : index
      %183 = vector.load %arg7[%c1_69, %c10_70, %c3_71] : memref<2x22x22xf32, #tpu.memory_space<vmem>>, vector<1x1x16xf32>
      %184 = vector.shape_cast %183 : vector<1x1x16xf32> to vector<1x16xf32>
      %185 = vector.shape_cast %182 : vector<1x16xf32> to vector<1x1x16xf32>
      tpu.vector_store %arg7[%c1_69, %c10_70, %c3_71], %185 {strides = array<i32>} : memref<2x22x22xf32, #tpu.memory_space<vmem>>, vector<1x1x16xf32>,
      %186 = vector.extract_strided_slice %118 {offsets = [0, 128], sizes = [1, 16], strides = [1, 1]} : vector<1x256xf32> to vector<1x16xf32>
      %c0_72 = arith.constant 0 : index
      %c11_73 = arith.constant 11 : index
      %c3_74 = arith.constant 3 : index
      %187 = vector.load %arg7[%c0_72, %c11_73, %c3_74] : memref<2x22x22xf32, #tpu.memory_space<vmem>>, vector<1x1x16xf32>
      %188 = vector.shape_cast %187 : vector<1x1x16xf32> to vector<1x16xf32>
      %189 = vector.shape_cast %186 : vector<1x16xf32> to vector<1x1x16xf32>
      tpu.vector_store %arg7[%c0_72, %c11_73, %c3_74], %189 {strides = array<i32>} : memref<2x22x22xf32, #tpu.memory_space<vmem>>, vector<1x1x16xf32>,
      %190 = vector.extract_strided_slice %119 {offsets = [0, 128], sizes = [1, 16], strides = [1, 1]} : vector<1x256xf32> to vector<1x16xf32>
      %c1_75 = arith.constant 1 : index
      %c11_76 = arith.constant 11 : index
      %c3_77 = arith.constant 3 : index
      %191 = vector.load %arg7[%c1_75, %c11_76, %c3_77] : memref<2x22x22xf32, #tpu.memory_space<vmem>>, vector<1x1x16xf32>
      %192 = vector.shape_cast %191 : vector<1x1x16xf32> to vector<1x16xf32>
      %193 = vector.shape_cast %190 : vector<1x16xf32> to vector<1x1x16xf32>
      tpu.vector_store %arg7[%c1_75, %c11_76, %c3_77], %193 {strides = array<i32>} : memref<2x22x22xf32, #tpu.memory_space<vmem>>, vector<1x1x16xf32>,
      %194 = vector.extract_strided_slice %118 {offsets = [0, 144], sizes = [1, 16], strides = [1, 1]} : vector<1x256xf32> to vector<1x16xf32>
      %c0_78 = arith.constant 0 : index
      %c12_79 = arith.constant 12 : index
      %c3_80 = arith.constant 3 : index
      %195 = vector.load %arg7[%c0_78, %c12_79, %c3_80] : memref<2x22x22xf32, #tpu.memory_space<vmem>>, vector<1x1x16xf32>
      %196 = vector.shape_cast %195 : vector<1x1x16xf32> to vector<1x16xf32>
      %197 = vector.shape_cast %194 : vector<1x16xf32> to vector<1x1x16xf32>
      tpu.vector_store %arg7[%c0_78, %c12_79, %c3_80], %197 {strides = array<i32>} : memref<2x22x22xf32, #tpu.memory_space<vmem>>, vector<1x1x16xf32>,
      %198 = vector.extract_strided_slice %119 {offsets = [0, 144], sizes = [1, 16], strides = [1, 1]} : vector<1x256xf32> to vector<1x16xf32>
      %c1_81 = arith.constant 1 : index
      %c12_82 = arith.constant 12 : index
      %c3_83 = arith.constant 3 : index
      %199 = vector.load %arg7[%c1_81, %c12_82, %c3_83] : memref<2x22x22xf32, #tpu.memory_space<vmem>>, vector<1x1x16xf32>
      %200 = vector.shape_cast %199 : vector<1x1x16xf32> to vector<1x16xf32>
      %201 = vector.shape_cast %198 : vector<1x16xf32> to vector<1x1x16xf32>
      tpu.vector_store %arg7[%c1_81, %c12_82, %c3_83], %201 {strides = array<i32>} : memref<2x22x22xf32, #tpu.memory_space<vmem>>, vector<1x1x16xf32>,
      %202 = vector.extract_strided_slice %118 {offsets = [0, 160], sizes = [1, 16], strides = [1, 1]} : vector<1x256xf32> to vector<1x16xf32>
      %c0_84 = arith.constant 0 : index
      %c13_85 = arith.constant 13 : index
      %c3_86 = arith.constant 3 : index
      %203 = vector.load %arg7[%c0_84, %c13_85, %c3_86] : memref<2x22x22xf32, #tpu.memory_space<vmem>>, vector<1x1x16xf32>
      %204 = vector.shape_cast %203 : vector<1x1x16xf32> to vector<1x16xf32>
      %205 = vector.shape_cast %202 : vector<1x16xf32> to vector<1x1x16xf32>
      tpu.vector_store %arg7[%c0_84, %c13_85, %c3_86], %205 {strides = array<i32>} : memref<2x22x22xf32, #tpu.memory_space<vmem>>, vector<1x1x16xf32>,
      %206 = vector.extract_strided_slice %119 {offsets = [0, 160], sizes = [1, 16], strides = [1, 1]} : vector<1x256xf32> to vector<1x16xf32>
      %c1_87 = arith.constant 1 : index
      %c13_88 = arith.constant 13 : index
      %c3_89 = arith.constant 3 : index
      %207 = vector.load %arg7[%c1_87, %c13_88, %c3_89] : memref<2x22x22xf32, #tpu.memory_space<vmem>>, vector<1x1x16xf32>
      %208 = vector.shape_cast %207 : vector<1x1x16xf32> to vector<1x16xf32>
      %209 = vector.shape_cast %206 : vector<1x16xf32> to vector<1x1x16xf32>
      tpu.vector_store %arg7[%c1_87, %c13_88, %c3_89], %209 {strides = array<i32>} : memref<2x22x22xf32, #tpu.memory_space<vmem>>, vector<1x1x16xf32>,
      %210 = vector.extract_strided_slice %118 {offsets = [0, 176], sizes = [1, 16], strides = [1, 1]} : vector<1x256xf32> to vector<1x16xf32>
      %c0_90 = arith.constant 0 : index
      %c14_91 = arith.constant 14 : index
      %c3_92 = arith.constant 3 : index
      %211 = vector.load %arg7[%c0_90, %c14_91, %c3_92] : memref<2x22x22xf32, #tpu.memory_space<vmem>>, vector<1x1x16xf32>
      %212 = vector.shape_cast %211 : vector<1x1x16xf32> to vector<1x16xf32>
      %213 = vector.shape_cast %210 : vector<1x16xf32> to vector<1x1x16xf32>
      tpu.vector_store %arg7[%c0_90, %c14_91, %c3_92], %213 {strides = array<i32>} : memref<2x22x22xf32, #tpu.memory_space<vmem>>, vector<1x1x16xf32>,
      %214 = vector.extract_strided_slice %119 {offsets = [0, 176], sizes = [1, 16], strides = [1, 1]} : vector<1x256xf32> to vector<1x16xf32>
      %c1_93 = arith.constant 1 : index
      %c14_94 = arith.constant 14 : index
      %c3_95 = arith.constant 3 : index
      %215 = vector.load %arg7[%c1_93, %c14_94, %c3_95] : memref<2x22x22xf32, #tpu.memory_space<vmem>>, vector<1x1x16xf32>
      %216 = vector.shape_cast %215 : vector<1x1x16xf32> to vector<1x16xf32>
      %217 = vector.shape_cast %214 : vector<1x16xf32> to vector<1x1x16xf32>
      tpu.vector_store %arg7[%c1_93, %c14_94, %c3_95], %217 {strides = array<i32>} : memref<2x22x22xf32, #tpu.memory_space<vmem>>, vector<1x1x16xf32>,
      %218 = vector.extract_strided_slice %118 {offsets = [0, 192], sizes = [1, 16], strides = [1, 1]} : vector<1x256xf32> to vector<1x16xf32>
      %c0_96 = arith.constant 0 : index
      %c15_97 = arith.constant 15 : index
      %c3_98 = arith.constant 3 : index
      %219 = vector.load %arg7[%c0_96, %c15_97, %c3_98] : memref<2x22x22xf32, #tpu.memory_space<vmem>>, vector<1x1x16xf32>
      %220 = vector.shape_cast %219 : vector<1x1x16xf32> to vector<1x16xf32>
      %221 = vector.shape_cast %218 : vector<1x16xf32> to vector<1x1x16xf32>
      tpu.vector_store %arg7[%c0_96, %c15_97, %c3_98], %221 {strides = array<i32>} : memref<2x22x22xf32, #tpu.memory_space<vmem>>, vector<1x1x16xf32>,
      %222 = vector.extract_strided_slice %119 {offsets = [0, 192], sizes = [1, 16], strides = [1, 1]} : vector<1x256xf32> to vector<1x16xf32>
      %c1_99 = arith.constant 1 : index
      %c15_100 = arith.constant 15 : index
      %c3_101 = arith.constant 3 : index
      %223 = vector.load %arg7[%c1_99, %c15_100, %c3_101] : memref<2x22x22xf32, #tpu.memory_space<vmem>>, vector<1x1x16xf32>
      %224 = vector.shape_cast %223 : vector<1x1x16xf32> to vector<1x16xf32>
      %225 = vector.shape_cast %222 : vector<1x16xf32> to vector<1x1x16xf32>
      tpu.vector_store %arg7[%c1_99, %c15_100, %c3_101], %225 {strides = array<i32>} : memref<2x22x22xf32, #tpu.memory_space<vmem>>, vector<1x1x16xf32>,
      %226 = vector.extract_strided_slice %118 {offsets = [0, 208], sizes = [1, 16], strides = [1, 1]} : vector<1x256xf32> to vector<1x16xf32>
      %c0_102 = arith.constant 0 : index
      %c16_103 = arith.constant 16 : index
      %c3_104 = arith.constant 3 : index
      %227 = vector.load %arg7[%c0_102, %c16_103, %c3_104] : memref<2x22x22xf32, #tpu.memory_space<vmem>>, vector<1x1x16xf32>
      %228 = vector.shape_cast %227 : vector<1x1x16xf32> to vector<1x16xf32>
      %229 = vector.shape_cast %226 : vector<1x16xf32> to vector<1x1x16xf32>
      tpu.vector_store %arg7[%c0_102, %c16_103, %c3_104], %229 {strides = array<i32>} : memref<2x22x22xf32, #tpu.memory_space<vmem>>, vector<1x1x16xf32>,
      %230 = vector.extract_strided_slice %119 {offsets = [0, 208], sizes = [1, 16], strides = [1, 1]} : vector<1x256xf32> to vector<1x16xf32>
      %c1_105 = arith.constant 1 : index
      %c16_106 = arith.constant 16 : index
      %c3_107 = arith.constant 3 : index
      %231 = vector.load %arg7[%c1_105, %c16_106, %c3_107] : memref<2x22x22xf32, #tpu.memory_space<vmem>>, vector<1x1x16xf32>
      %232 = vector.shape_cast %231 : vector<1x1x16xf32> to vector<1x16xf32>
      %233 = vector.shape_cast %230 : vector<1x16xf32> to vector<1x1x16xf32>
      tpu.vector_store %arg7[%c1_105, %c16_106, %c3_107], %233 {strides = array<i32>} : memref<2x22x22xf32, #tpu.memory_space<vmem>>, vector<1x1x16xf32>,
      %234 = vector.extract_strided_slice %118 {offsets = [0, 224], sizes = [1, 16], strides = [1, 1]} : vector<1x256xf32> to vector<1x16xf32>
      %c0_108 = arith.constant 0 : index
      %c17_109 = arith.constant 17 : index
      %c3_110 = arith.constant 3 : index
      %235 = vector.load %arg7[%c0_108, %c17_109, %c3_110] : memref<2x22x22xf32, #tpu.memory_space<vmem>>, vector<1x1x16xf32>
      %236 = vector.shape_cast %235 : vector<1x1x16xf32> to vector<1x16xf32>
      %237 = vector.shape_cast %234 : vector<1x16xf32> to vector<1x1x16xf32>
      tpu.vector_store %arg7[%c0_108, %c17_109, %c3_110], %237 {strides = array<i32>} : memref<2x22x22xf32, #tpu.memory_space<vmem>>, vector<1x1x16xf32>,
      %238 = vector.extract_strided_slice %119 {offsets = [0, 224], sizes = [1, 16], strides = [1, 1]} : vector<1x256xf32> to vector<1x16xf32>
      %c1_111 = arith.constant 1 : index
      %c17_112 = arith.constant 17 : index
      %c3_113 = arith.constant 3 : index
      %239 = vector.load %arg7[%c1_111, %c17_112, %c3_113] : memref<2x22x22xf32, #tpu.memory_space<vmem>>, vector<1x1x16xf32>
      %240 = vector.shape_cast %239 : vector<1x1x16xf32> to vector<1x16xf32>
      %241 = vector.shape_cast %238 : vector<1x16xf32> to vector<1x1x16xf32>
      tpu.vector_store %arg7[%c1_111, %c17_112, %c3_113], %241 {strides = array<i32>} : memref<2x22x22xf32, #tpu.memory_space<vmem>>, vector<1x1x16xf32>,
      %242 = vector.extract_strided_slice %118 {offsets = [0, 240], sizes = [1, 16], strides = [1, 1]} : vector<1x256xf32> to vector<1x16xf32>
      %c0_114 = arith.constant 0 : index
      %c18_115 = arith.constant 18 : index
      %c3_116 = arith.constant 3 : index
      %243 = vector.load %arg7[%c0_114, %c18_115, %c3_116] : memref<2x22x22xf32, #tpu.memory_space<vmem>>, vector<1x1x16xf32>
      %244 = vector.shape_cast %243 : vector<1x1x16xf32> to vector<1x16xf32>
      %245 = vector.shape_cast %242 : vector<1x16xf32> to vector<1x1x16xf32>
      tpu.vector_store %arg7[%c0_114, %c18_115, %c3_116], %245 {strides = array<i32>} : memref<2x22x22xf32, #tpu.memory_space<vmem>>, vector<1x1x16xf32>,
      %246 = vector.extract_strided_slice %119 {offsets = [0, 240], sizes = [1, 16], strides = [1, 1]} : vector<1x256xf32> to vector<1x16xf32>
      %c1_117 = arith.constant 1 : index
      %c18_118 = arith.constant 18 : index
      %c3_119 = arith.constant 3 : index
      %247 = vector.load %arg7[%c1_117, %c18_118, %c3_119] : memref<2x22x22xf32, #tpu.memory_space<vmem>>, vector<1x1x16xf32>
      %248 = vector.shape_cast %247 : vector<1x1x16xf32> to vector<1x16xf32>
      %249 = vector.shape_cast %246 : vector<1x16xf32> to vector<1x1x16xf32>
      tpu.vector_store %arg7[%c1_117, %c18_118, %c3_119], %249 {strides = array<i32>} : memref<2x22x22xf32, #tpu.memory_space<vmem>>, vector<1x1x16xf32>,
      %c0_120 = arith.constant 0 : index
      %c0_121 = arith.constant 0 : index
      %c0_122 = arith.constant 0 : index
      %250 = vector.load %arg7[%c0_120, %c0_121, %c0_122] : memref<2x22x22xf32, #tpu.memory_space<vmem>>, vector<1x22x22xf32>
      %251 = vector.shape_cast %250 : vector<1x22x22xf32> to vector<22x22xf32>
      %c1_123 = arith.constant 1 : index
      %c0_124 = arith.constant 0 : index
      %c0_125 = arith.constant 0 : index
      %252 = vector.load %arg7[%c1_123, %c0_124, %c0_125] : memref<2x22x22xf32, #tpu.memory_space<vmem>>, vector<1x22x22xf32>
      %253 = vector.shape_cast %252 : vector<1x22x22xf32> to vector<22x22xf32>
      %cst_126 = arith.constant 0.000000e+00 : f32
      %254 = vector.broadcast %cst_126 : f32 to vector<16x16xf32>
      %255 = vector.extract_strided_slice %251 {offsets = [0, 0], sizes = [16, 16], strides = [1, 1]} : vector<22x22xf32> to vector<16x16xf32>
      %256 = vector.broadcast %18 : f32 to vector<16x16xf32>
      %257 = arith.mulf %255, %256 : vector<16x16xf32>
      %258 = arith.addf %254, %257 : vector<16x16xf32>
      %259 = vector.extract_strided_slice %253 {offsets = [0, 0], sizes = [16, 16], strides = [1, 1]} : vector<22x22xf32> to vector<16x16xf32>
      %260 = vector.broadcast %67 : f32 to vector<16x16xf32>
      %261 = arith.mulf %259, %260 : vector<16x16xf32>
      %262 = arith.addf %258, %261 : vector<16x16xf32>
      %263 = vector.extract_strided_slice %251 {offsets = [0, 1], sizes = [16, 16], strides = [1, 1]} : vector<22x22xf32> to vector<16x16xf32>
      %264 = vector.broadcast %19 : f32 to vector<16x16xf32>
      %265 = arith.mulf %263, %264 : vector<16x16xf32>
      %266 = arith.addf %262, %265 : vector<16x16xf32>
      %267 = vector.extract_strided_slice %253 {offsets = [0, 1], sizes = [16, 16], strides = [1, 1]} : vector<22x22xf32> to vector<16x16xf32>
      %268 = vector.broadcast %68 : f32 to vector<16x16xf32>
      %269 = arith.mulf %267, %268 : vector<16x16xf32>
      %270 = arith.addf %266, %269 : vector<16x16xf32>
      %271 = vector.extract_strided_slice %251 {offsets = [0, 2], sizes = [16, 16], strides = [1, 1]} : vector<22x22xf32> to vector<16x16xf32>
      %272 = vector.broadcast %20 : f32 to vector<16x16xf32>
      %273 = arith.mulf %271, %272 : vector<16x16xf32>
      %274 = arith.addf %270, %273 : vector<16x16xf32>
      %275 = vector.extract_strided_slice %253 {offsets = [0, 2], sizes = [16, 16], strides = [1, 1]} : vector<22x22xf32> to vector<16x16xf32>
      %276 = vector.broadcast %69 : f32 to vector<16x16xf32>
      %277 = arith.mulf %275, %276 : vector<16x16xf32>
      %278 = arith.addf %274, %277 : vector<16x16xf32>
      %279 = vector.extract_strided_slice %251 {offsets = [0, 3], sizes = [16, 16], strides = [1, 1]} : vector<22x22xf32> to vector<16x16xf32>
      %280 = vector.broadcast %21 : f32 to vector<16x16xf32>
      %281 = arith.mulf %279, %280 : vector<16x16xf32>
      %282 = arith.addf %278, %281 : vector<16x16xf32>
      %283 = vector.extract_strided_slice %253 {offsets = [0, 3], sizes = [16, 16], strides = [1, 1]} : vector<22x22xf32> to vector<16x16xf32>
      %284 = vector.broadcast %70 : f32 to vector<16x16xf32>
      %285 = arith.mulf %283, %284 : vector<16x16xf32>
      %286 = arith.addf %282, %285 : vector<16x16xf32>
      %287 = vector.extract_strided_slice %251 {offsets = [0, 4], sizes = [16, 16], strides = [1, 1]} : vector<22x22xf32> to vector<16x16xf32>
      %288 = vector.broadcast %22 : f32 to vector<16x16xf32>
      %289 = arith.mulf %287, %288 : vector<16x16xf32>
      %290 = arith.addf %286, %289 : vector<16x16xf32>
      %291 = vector.extract_strided_slice %253 {offsets = [0, 4], sizes = [16, 16], strides = [1, 1]} : vector<22x22xf32> to vector<16x16xf32>
      %292 = vector.broadcast %71 : f32 to vector<16x16xf32>
      %293 = arith.mulf %291, %292 : vector<16x16xf32>
      %294 = arith.addf %290, %293 : vector<16x16xf32>
      %295 = vector.extract_strided_slice %251 {offsets = [0, 5], sizes = [16, 16], strides = [1, 1]} : vector<22x22xf32> to vector<16x16xf32>
      %296 = vector.broadcast %23 : f32 to vector<16x16xf32>
      %297 = arith.mulf %295, %296 : vector<16x16xf32>
      %298 = arith.addf %294, %297 : vector<16x16xf32>
      %299 = vector.extract_strided_slice %253 {offsets = [0, 5], sizes = [16, 16], strides = [1, 1]} : vector<22x22xf32> to vector<16x16xf32>
      %300 = vector.broadcast %72 : f32 to vector<16x16xf32>
      %301 = arith.mulf %299, %300 : vector<16x16xf32>
      %302 = arith.addf %298, %301 : vector<16x16xf32>
      %303 = vector.extract_strided_slice %251 {offsets = [0, 6], sizes = [16, 16], strides = [1, 1]} : vector<22x22xf32> to vector<16x16xf32>
      %304 = vector.broadcast %24 : f32 to vector<16x16xf32>
      %305 = arith.mulf %303, %304 : vector<16x16xf32>
      %306 = arith.addf %302, %305 : vector<16x16xf32>
      %307 = vector.extract_strided_slice %253 {offsets = [0, 6], sizes = [16, 16], strides = [1, 1]} : vector<22x22xf32> to vector<16x16xf32>
      %308 = vector.broadcast %73 : f32 to vector<16x16xf32>
      %309 = arith.mulf %307, %308 : vector<16x16xf32>
      %310 = arith.addf %306, %309 : vector<16x16xf32>
      %311 = vector.extract_strided_slice %251 {offsets = [1, 0], sizes = [16, 16], strides = [1, 1]} : vector<22x22xf32> to vector<16x16xf32>
      %312 = vector.broadcast %25 : f32 to vector<16x16xf32>
      %313 = arith.mulf %311, %312 : vector<16x16xf32>
      %314 = arith.addf %310, %313 : vector<16x16xf32>
      %315 = vector.extract_strided_slice %253 {offsets = [1, 0], sizes = [16, 16], strides = [1, 1]} : vector<22x22xf32> to vector<16x16xf32>
      %316 = vector.broadcast %74 : f32 to vector<16x16xf32>
      %317 = arith.mulf %315, %316 : vector<16x16xf32>
      %318 = arith.addf %314, %317 : vector<16x16xf32>
      %319 = vector.extract_strided_slice %251 {offsets = [1, 1], sizes = [16, 16], strides = [1, 1]} : vector<22x22xf32> to vector<16x16xf32>
      %320 = vector.broadcast %26 : f32 to vector<16x16xf32>
      %321 = arith.mulf %319, %320 : vector<16x16xf32>
      %322 = arith.addf %318, %321 : vector<16x16xf32>
      %323 = vector.extract_strided_slice %253 {offsets = [1, 1], sizes = [16, 16], strides = [1, 1]} : vector<22x22xf32> to vector<16x16xf32>
      %324 = vector.broadcast %75 : f32 to vector<16x16xf32>
      %325 = arith.mulf %323, %324 : vector<16x16xf32>
      %326 = arith.addf %322, %325 : vector<16x16xf32>
      %327 = vector.extract_strided_slice %251 {offsets = [1, 2], sizes = [16, 16], strides = [1, 1]} : vector<22x22xf32> to vector<16x16xf32>
      %328 = vector.broadcast %27 : f32 to vector<16x16xf32>
      %329 = arith.mulf %327, %328 : vector<16x16xf32>
      %330 = arith.addf %326, %329 : vector<16x16xf32>
      %331 = vector.extract_strided_slice %253 {offsets = [1, 2], sizes = [16, 16], strides = [1, 1]} : vector<22x22xf32> to vector<16x16xf32>
      %332 = vector.broadcast %76 : f32 to vector<16x16xf32>
      %333 = arith.mulf %331, %332 : vector<16x16xf32>
      %334 = arith.addf %330, %333 : vector<16x16xf32>
      %335 = vector.extract_strided_slice %251 {offsets = [1, 3], sizes = [16, 16], strides = [1, 1]} : vector<22x22xf32> to vector<16x16xf32>
      %336 = vector.broadcast %28 : f32 to vector<16x16xf32>
      %337 = arith.mulf %335, %336 : vector<16x16xf32>
      %338 = arith.addf %334, %337 : vector<16x16xf32>
      %339 = vector.extract_strided_slice %253 {offsets = [1, 3], sizes = [16, 16], strides = [1, 1]} : vector<22x22xf32> to vector<16x16xf32>
      %340 = vector.broadcast %77 : f32 to vector<16x16xf32>
      %341 = arith.mulf %339, %340 : vector<16x16xf32>
      %342 = arith.addf %338, %341 : vector<16x16xf32>
      %343 = vector.extract_strided_slice %251 {offsets = [1, 4], sizes = [16, 16], strides = [1, 1]} : vector<22x22xf32> to vector<16x16xf32>
      %344 = vector.broadcast %29 : f32 to vector<16x16xf32>
      %345 = arith.mulf %343, %344 : vector<16x16xf32>
      %346 = arith.addf %342, %345 : vector<16x16xf32>
      %347 = vector.extract_strided_slice %253 {offsets = [1, 4], sizes = [16, 16], strides = [1, 1]} : vector<22x22xf32> to vector<16x16xf32>
      %348 = vector.broadcast %78 : f32 to vector<16x16xf32>
      %349 = arith.mulf %347, %348 : vector<16x16xf32>
      %350 = arith.addf %346, %349 : vector<16x16xf32>
      %351 = vector.extract_strided_slice %251 {offsets = [1, 5], sizes = [16, 16], strides = [1, 1]} : vector<22x22xf32> to vector<16x16xf32>
      %352 = vector.broadcast %30 : f32 to vector<16x16xf32>
      %353 = arith.mulf %351, %352 : vector<16x16xf32>
      %354 = arith.addf %350, %353 : vector<16x16xf32>
      %355 = vector.extract_strided_slice %253 {offsets = [1, 5], sizes = [16, 16], strides = [1, 1]} : vector<22x22xf32> to vector<16x16xf32>
      %356 = vector.broadcast %79 : f32 to vector<16x16xf32>
      %357 = arith.mulf %355, %356 : vector<16x16xf32>
      %358 = arith.addf %354, %357 : vector<16x16xf32>
      %359 = vector.extract_strided_slice %251 {offsets = [1, 6], sizes = [16, 16], strides = [1, 1]} : vector<22x22xf32> to vector<16x16xf32>
      %360 = vector.broadcast %31 : f32 to vector<16x16xf32>
      %361 = arith.mulf %359, %360 : vector<16x16xf32>
      %362 = arith.addf %358, %361 : vector<16x16xf32>
      %363 = vector.extract_strided_slice %253 {offsets = [1, 6], sizes = [16, 16], strides = [1, 1]} : vector<22x22xf32> to vector<16x16xf32>
      %364 = vector.broadcast %80 : f32 to vector<16x16xf32>
      %365 = arith.mulf %363, %364 : vector<16x16xf32>
      %366 = arith.addf %362, %365 : vector<16x16xf32>
      %367 = vector.extract_strided_slice %251 {offsets = [2, 0], sizes = [16, 16], strides = [1, 1]} : vector<22x22xf32> to vector<16x16xf32>
      %368 = vector.broadcast %32 : f32 to vector<16x16xf32>
      %369 = arith.mulf %367, %368 : vector<16x16xf32>
      %370 = arith.addf %366, %369 : vector<16x16xf32>
      %371 = vector.extract_strided_slice %253 {offsets = [2, 0], sizes = [16, 16], strides = [1, 1]} : vector<22x22xf32> to vector<16x16xf32>
      %372 = vector.broadcast %81 : f32 to vector<16x16xf32>
      %373 = arith.mulf %371, %372 : vector<16x16xf32>
      %374 = arith.addf %370, %373 : vector<16x16xf32>
      %375 = vector.extract_strided_slice %251 {offsets = [2, 1], sizes = [16, 16], strides = [1, 1]} : vector<22x22xf32> to vector<16x16xf32>
      %376 = vector.broadcast %33 : f32 to vector<16x16xf32>
      %377 = arith.mulf %375, %376 : vector<16x16xf32>
      %378 = arith.addf %374, %377 : vector<16x16xf32>
      %379 = vector.extract_strided_slice %253 {offsets = [2, 1], sizes = [16, 16], strides = [1, 1]} : vector<22x22xf32> to vector<16x16xf32>
      %380 = vector.broadcast %82 : f32 to vector<16x16xf32>
      %381 = arith.mulf %379, %380 : vector<16x16xf32>
      %382 = arith.addf %378, %381 : vector<16x16xf32>
      %383 = vector.extract_strided_slice %251 {offsets = [2, 2], sizes = [16, 16], strides = [1, 1]} : vector<22x22xf32> to vector<16x16xf32>
      %384 = vector.broadcast %34 : f32 to vector<16x16xf32>
      %385 = arith.mulf %383, %384 : vector<16x16xf32>
      %386 = arith.addf %382, %385 : vector<16x16xf32>
      %387 = vector.extract_strided_slice %253 {offsets = [2, 2], sizes = [16, 16], strides = [1, 1]} : vector<22x22xf32> to vector<16x16xf32>
      %388 = vector.broadcast %83 : f32 to vector<16x16xf32>
      %389 = arith.mulf %387, %388 : vector<16x16xf32>
      %390 = arith.addf %386, %389 : vector<16x16xf32>
      %391 = vector.extract_strided_slice %251 {offsets = [2, 3], sizes = [16, 16], strides = [1, 1]} : vector<22x22xf32> to vector<16x16xf32>
      %392 = vector.broadcast %35 : f32 to vector<16x16xf32>
      %393 = arith.mulf %391, %392 : vector<16x16xf32>
      %394 = arith.addf %390, %393 : vector<16x16xf32>
      %395 = vector.extract_strided_slice %253 {offsets = [2, 3], sizes = [16, 16], strides = [1, 1]} : vector<22x22xf32> to vector<16x16xf32>
      %396 = vector.broadcast %84 : f32 to vector<16x16xf32>
      %397 = arith.mulf %395, %396 : vector<16x16xf32>
      %398 = arith.addf %394, %397 : vector<16x16xf32>
      %399 = vector.extract_strided_slice %251 {offsets = [2, 4], sizes = [16, 16], strides = [1, 1]} : vector<22x22xf32> to vector<16x16xf32>
      %400 = vector.broadcast %36 : f32 to vector<16x16xf32>
      %401 = arith.mulf %399, %400 : vector<16x16xf32>
      %402 = arith.addf %398, %401 : vector<16x16xf32>
      %403 = vector.extract_strided_slice %253 {offsets = [2, 4], sizes = [16, 16], strides = [1, 1]} : vector<22x22xf32> to vector<16x16xf32>
      %404 = vector.broadcast %85 : f32 to vector<16x16xf32>
      %405 = arith.mulf %403, %404 : vector<16x16xf32>
      %406 = arith.addf %402, %405 : vector<16x16xf32>
      %407 = vector.extract_strided_slice %251 {offsets = [2, 5], sizes = [16, 16], strides = [1, 1]} : vector<22x22xf32> to vector<16x16xf32>
      %408 = vector.broadcast %37 : f32 to vector<16x16xf32>
      %409 = arith.mulf %407, %408 : vector<16x16xf32>
      %410 = arith.addf %406, %409 : vector<16x16xf32>
      %411 = vector.extract_strided_slice %253 {offsets = [2, 5], sizes = [16, 16], strides = [1, 1]} : vector<22x22xf32> to vector<16x16xf32>
      %412 = vector.broadcast %86 : f32 to vector<16x16xf32>
      %413 = arith.mulf %411, %412 : vector<16x16xf32>
      %414 = arith.addf %410, %413 : vector<16x16xf32>
      %415 = vector.extract_strided_slice %251 {offsets = [2, 6], sizes = [16, 16], strides = [1, 1]} : vector<22x22xf32> to vector<16x16xf32>
      %416 = vector.broadcast %38 : f32 to vector<16x16xf32>
      %417 = arith.mulf %415, %416 : vector<16x16xf32>
      %418 = arith.addf %414, %417 : vector<16x16xf32>
      %419 = vector.extract_strided_slice %253 {offsets = [2, 6], sizes = [16, 16], strides = [1, 1]} : vector<22x22xf32> to vector<16x16xf32>
      %420 = vector.broadcast %87 : f32 to vector<16x16xf32>
      %421 = arith.mulf %419, %420 : vector<16x16xf32>
      %422 = arith.addf %418, %421 : vector<16x16xf32>
      %423 = vector.extract_strided_slice %251 {offsets = [3, 0], sizes = [16, 16], strides = [1, 1]} : vector<22x22xf32> to vector<16x16xf32>
      %424 = vector.broadcast %39 : f32 to vector<16x16xf32>
      %425 = arith.mulf %423, %424 : vector<16x16xf32>
      %426 = arith.addf %422, %425 : vector<16x16xf32>
      %427 = vector.extract_strided_slice %253 {offsets = [3, 0], sizes = [16, 16], strides = [1, 1]} : vector<22x22xf32> to vector<16x16xf32>
      %428 = vector.broadcast %88 : f32 to vector<16x16xf32>
      %429 = arith.mulf %427, %428 : vector<16x16xf32>
      %430 = arith.addf %426, %429 : vector<16x16xf32>
      %431 = vector.extract_strided_slice %251 {offsets = [3, 1], sizes = [16, 16], strides = [1, 1]} : vector<22x22xf32> to vector<16x16xf32>
      %432 = vector.broadcast %40 : f32 to vector<16x16xf32>
      %433 = arith.mulf %431, %432 : vector<16x16xf32>
      %434 = arith.addf %430, %433 : vector<16x16xf32>
      %435 = vector.extract_strided_slice %253 {offsets = [3, 1], sizes = [16, 16], strides = [1, 1]} : vector<22x22xf32> to vector<16x16xf32>
      %436 = vector.broadcast %89 : f32 to vector<16x16xf32>
      %437 = arith.mulf %435, %436 : vector<16x16xf32>
      %438 = arith.addf %434, %437 : vector<16x16xf32>
      %439 = vector.extract_strided_slice %251 {offsets = [3, 2], sizes = [16, 16], strides = [1, 1]} : vector<22x22xf32> to vector<16x16xf32>
      %440 = vector.broadcast %41 : f32 to vector<16x16xf32>
      %441 = arith.mulf %439, %440 : vector<16x16xf32>
      %442 = arith.addf %438, %441 : vector<16x16xf32>
      %443 = vector.extract_strided_slice %253 {offsets = [3, 2], sizes = [16, 16], strides = [1, 1]} : vector<22x22xf32> to vector<16x16xf32>
      %444 = vector.broadcast %90 : f32 to vector<16x16xf32>
      %445 = arith.mulf %443, %444 : vector<16x16xf32>
      %446 = arith.addf %442, %445 : vector<16x16xf32>
      %447 = vector.extract_strided_slice %251 {offsets = [3, 3], sizes = [16, 16], strides = [1, 1]} : vector<22x22xf32> to vector<16x16xf32>
      %448 = vector.broadcast %42 : f32 to vector<16x16xf32>
      %449 = arith.mulf %447, %448 : vector<16x16xf32>
      %450 = arith.addf %446, %449 : vector<16x16xf32>
      %451 = vector.extract_strided_slice %253 {offsets = [3, 3], sizes = [16, 16], strides = [1, 1]} : vector<22x22xf32> to vector<16x16xf32>
      %452 = vector.broadcast %91 : f32 to vector<16x16xf32>
      %453 = arith.mulf %451, %452 : vector<16x16xf32>
      %454 = arith.addf %450, %453 : vector<16x16xf32>
      %455 = vector.extract_strided_slice %251 {offsets = [3, 4], sizes = [16, 16], strides = [1, 1]} : vector<22x22xf32> to vector<16x16xf32>
      %456 = vector.broadcast %43 : f32 to vector<16x16xf32>
      %457 = arith.mulf %455, %456 : vector<16x16xf32>
      %458 = arith.addf %454, %457 : vector<16x16xf32>
      %459 = vector.extract_strided_slice %253 {offsets = [3, 4], sizes = [16, 16], strides = [1, 1]} : vector<22x22xf32> to vector<16x16xf32>
      %460 = vector.broadcast %92 : f32 to vector<16x16xf32>
      %461 = arith.mulf %459, %460 : vector<16x16xf32>
      %462 = arith.addf %458, %461 : vector<16x16xf32>
      %463 = vector.extract_strided_slice %251 {offsets = [3, 5], sizes = [16, 16], strides = [1, 1]} : vector<22x22xf32> to vector<16x16xf32>
      %464 = vector.broadcast %44 : f32 to vector<16x16xf32>
      %465 = arith.mulf %463, %464 : vector<16x16xf32>
      %466 = arith.addf %462, %465 : vector<16x16xf32>
      %467 = vector.extract_strided_slice %253 {offsets = [3, 5], sizes = [16, 16], strides = [1, 1]} : vector<22x22xf32> to vector<16x16xf32>
      %468 = vector.broadcast %93 : f32 to vector<16x16xf32>
      %469 = arith.mulf %467, %468 : vector<16x16xf32>
      %470 = arith.addf %466, %469 : vector<16x16xf32>
      %471 = vector.extract_strided_slice %251 {offsets = [3, 6], sizes = [16, 16], strides = [1, 1]} : vector<22x22xf32> to vector<16x16xf32>
      %472 = vector.broadcast %45 : f32 to vector<16x16xf32>
      %473 = arith.mulf %471, %472 : vector<16x16xf32>
      %474 = arith.addf %470, %473 : vector<16x16xf32>
      %475 = vector.extract_strided_slice %253 {offsets = [3, 6], sizes = [16, 16], strides = [1, 1]} : vector<22x22xf32> to vector<16x16xf32>
      %476 = vector.broadcast %94 : f32 to vector<16x16xf32>
      %477 = arith.mulf %475, %476 : vector<16x16xf32>
      %478 = arith.addf %474, %477 : vector<16x16xf32>
      %479 = vector.extract_strided_slice %251 {offsets = [4, 0], sizes = [16, 16], strides = [1, 1]} : vector<22x22xf32> to vector<16x16xf32>
      %480 = vector.broadcast %46 : f32 to vector<16x16xf32>
      %481 = arith.mulf %479, %480 : vector<16x16xf32>
      %482 = arith.addf %478, %481 : vector<16x16xf32>
      %483 = vector.extract_strided_slice %253 {offsets = [4, 0], sizes = [16, 16], strides = [1, 1]} : vector<22x22xf32> to vector<16x16xf32>
      %484 = vector.broadcast %95 : f32 to vector<16x16xf32>
      %485 = arith.mulf %483, %484 : vector<16x16xf32>
      %486 = arith.addf %482, %485 : vector<16x16xf32>
      %487 = vector.extract_strided_slice %251 {offsets = [4, 1], sizes = [16, 16], strides = [1, 1]} : vector<22x22xf32> to vector<16x16xf32>
      %488 = vector.broadcast %47 : f32 to vector<16x16xf32>
      %489 = arith.mulf %487, %488 : vector<16x16xf32>
      %490 = arith.addf %486, %489 : vector<16x16xf32>
      %491 = vector.extract_strided_slice %253 {offsets = [4, 1], sizes = [16, 16], strides = [1, 1]} : vector<22x22xf32> to vector<16x16xf32>
      %492 = vector.broadcast %96 : f32 to vector<16x16xf32>
      %493 = arith.mulf %491, %492 : vector<16x16xf32>
      %494 = arith.addf %490, %493 : vector<16x16xf32>
      %495 = vector.extract_strided_slice %251 {offsets = [4, 2], sizes = [16, 16], strides = [1, 1]} : vector<22x22xf32> to vector<16x16xf32>
      %496 = vector.broadcast %48 : f32 to vector<16x16xf32>
      %497 = arith.mulf %495, %496 : vector<16x16xf32>
      %498 = arith.addf %494, %497 : vector<16x16xf32>
      %499 = vector.extract_strided_slice %253 {offsets = [4, 2], sizes = [16, 16], strides = [1, 1]} : vector<22x22xf32> to vector<16x16xf32>
      %500 = vector.broadcast %97 : f32 to vector<16x16xf32>
      %501 = arith.mulf %499, %500 : vector<16x16xf32>
      %502 = arith.addf %498, %501 : vector<16x16xf32>
      %503 = vector.extract_strided_slice %251 {offsets = [4, 3], sizes = [16, 16], strides = [1, 1]} : vector<22x22xf32> to vector<16x16xf32>
      %504 = vector.broadcast %49 : f32 to vector<16x16xf32>
      %505 = arith.mulf %503, %504 : vector<16x16xf32>
      %506 = arith.addf %502, %505 : vector<16x16xf32>
      %507 = vector.extract_strided_slice %253 {offsets = [4, 3], sizes = [16, 16], strides = [1, 1]} : vector<22x22xf32> to vector<16x16xf32>
      %508 = vector.broadcast %98 : f32 to vector<16x16xf32>
      %509 = arith.mulf %507, %508 : vector<16x16xf32>
      %510 = arith.addf %506, %509 : vector<16x16xf32>
      %511 = vector.extract_strided_slice %251 {offsets = [4, 4], sizes = [16, 16], strides = [1, 1]} : vector<22x22xf32> to vector<16x16xf32>
      %512 = vector.broadcast %50 : f32 to vector<16x16xf32>
      %513 = arith.mulf %511, %512 : vector<16x16xf32>
      %514 = arith.addf %510, %513 : vector<16x16xf32>
      %515 = vector.extract_strided_slice %253 {offsets = [4, 4], sizes = [16, 16], strides = [1, 1]} : vector<22x22xf32> to vector<16x16xf32>
      %516 = vector.broadcast %99 : f32 to vector<16x16xf32>
      %517 = arith.mulf %515, %516 : vector<16x16xf32>
      %518 = arith.addf %514, %517 : vector<16x16xf32>
      %519 = vector.extract_strided_slice %251 {offsets = [4, 5], sizes = [16, 16], strides = [1, 1]} : vector<22x22xf32> to vector<16x16xf32>
      %520 = vector.broadcast %51 : f32 to vector<16x16xf32>
      %521 = arith.mulf %519, %520 : vector<16x16xf32>
      %522 = arith.addf %518, %521 : vector<16x16xf32>
      %523 = vector.extract_strided_slice %253 {offsets = [4, 5], sizes = [16, 16], strides = [1, 1]} : vector<22x22xf32> to vector<16x16xf32>
      %524 = vector.broadcast %100 : f32 to vector<16x16xf32>
      %525 = arith.mulf %523, %524 : vector<16x16xf32>
      %526 = arith.addf %522, %525 : vector<16x16xf32>
      %527 = vector.extract_strided_slice %251 {offsets = [4, 6], sizes = [16, 16], strides = [1, 1]} : vector<22x22xf32> to vector<16x16xf32>
      %528 = vector.broadcast %52 : f32 to vector<16x16xf32>
      %529 = arith.mulf %527, %528 : vector<16x16xf32>
      %530 = arith.addf %526, %529 : vector<16x16xf32>
      %531 = vector.extract_strided_slice %253 {offsets = [4, 6], sizes = [16, 16], strides = [1, 1]} : vector<22x22xf32> to vector<16x16xf32>
      %532 = vector.broadcast %101 : f32 to vector<16x16xf32>
      %533 = arith.mulf %531, %532 : vector<16x16xf32>
      %534 = arith.addf %530, %533 : vector<16x16xf32>
      %535 = vector.extract_strided_slice %251 {offsets = [5, 0], sizes = [16, 16], strides = [1, 1]} : vector<22x22xf32> to vector<16x16xf32>
      %536 = vector.broadcast %53 : f32 to vector<16x16xf32>
      %537 = arith.mulf %535, %536 : vector<16x16xf32>
      %538 = arith.addf %534, %537 : vector<16x16xf32>
      %539 = vector.extract_strided_slice %253 {offsets = [5, 0], sizes = [16, 16], strides = [1, 1]} : vector<22x22xf32> to vector<16x16xf32>
      %540 = vector.broadcast %102 : f32 to vector<16x16xf32>
      %541 = arith.mulf %539, %540 : vector<16x16xf32>
      %542 = arith.addf %538, %541 : vector<16x16xf32>
      %543 = vector.extract_strided_slice %251 {offsets = [5, 1], sizes = [16, 16], strides = [1, 1]} : vector<22x22xf32> to vector<16x16xf32>
      %544 = vector.broadcast %54 : f32 to vector<16x16xf32>
      %545 = arith.mulf %543, %544 : vector<16x16xf32>
      %546 = arith.addf %542, %545 : vector<16x16xf32>
      %547 = vector.extract_strided_slice %253 {offsets = [5, 1], sizes = [16, 16], strides = [1, 1]} : vector<22x22xf32> to vector<16x16xf32>
      %548 = vector.broadcast %103 : f32 to vector<16x16xf32>
      %549 = arith.mulf %547, %548 : vector<16x16xf32>
      %550 = arith.addf %546, %549 : vector<16x16xf32>
      %551 = vector.extract_strided_slice %251 {offsets = [5, 2], sizes = [16, 16], strides = [1, 1]} : vector<22x22xf32> to vector<16x16xf32>
      %552 = vector.broadcast %55 : f32 to vector<16x16xf32>
      %553 = arith.mulf %551, %552 : vector<16x16xf32>
      %554 = arith.addf %550, %553 : vector<16x16xf32>
      %555 = vector.extract_strided_slice %253 {offsets = [5, 2], sizes = [16, 16], strides = [1, 1]} : vector<22x22xf32> to vector<16x16xf32>
      %556 = vector.broadcast %104 : f32 to vector<16x16xf32>
      %557 = arith.mulf %555, %556 : vector<16x16xf32>
      %558 = arith.addf %554, %557 : vector<16x16xf32>
      %559 = vector.extract_strided_slice %251 {offsets = [5, 3], sizes = [16, 16], strides = [1, 1]} : vector<22x22xf32> to vector<16x16xf32>
      %560 = vector.broadcast %56 : f32 to vector<16x16xf32>
      %561 = arith.mulf %559, %560 : vector<16x16xf32>
      %562 = arith.addf %558, %561 : vector<16x16xf32>
      %563 = vector.extract_strided_slice %253 {offsets = [5, 3], sizes = [16, 16], strides = [1, 1]} : vector<22x22xf32> to vector<16x16xf32>
      %564 = vector.broadcast %105 : f32 to vector<16x16xf32>
      %565 = arith.mulf %563, %564 : vector<16x16xf32>
      %566 = arith.addf %562, %565 : vector<16x16xf32>
      %567 = vector.extract_strided_slice %251 {offsets = [5, 4], sizes = [16, 16], strides = [1, 1]} : vector<22x22xf32> to vector<16x16xf32>
      %568 = vector.broadcast %57 : f32 to vector<16x16xf32>
      %569 = arith.mulf %567, %568 : vector<16x16xf32>
      %570 = arith.addf %566, %569 : vector<16x16xf32>
      %571 = vector.extract_strided_slice %253 {offsets = [5, 4], sizes = [16, 16], strides = [1, 1]} : vector<22x22xf32> to vector<16x16xf32>
      %572 = vector.broadcast %106 : f32 to vector<16x16xf32>
      %573 = arith.mulf %571, %572 : vector<16x16xf32>
      %574 = arith.addf %570, %573 : vector<16x16xf32>
      %575 = vector.extract_strided_slice %251 {offsets = [5, 5], sizes = [16, 16], strides = [1, 1]} : vector<22x22xf32> to vector<16x16xf32>
      %576 = vector.broadcast %58 : f32 to vector<16x16xf32>
      %577 = arith.mulf %575, %576 : vector<16x16xf32>
      %578 = arith.addf %574, %577 : vector<16x16xf32>
      %579 = vector.extract_strided_slice %253 {offsets = [5, 5], sizes = [16, 16], strides = [1, 1]} : vector<22x22xf32> to vector<16x16xf32>
      %580 = vector.broadcast %107 : f32 to vector<16x16xf32>
      %581 = arith.mulf %579, %580 : vector<16x16xf32>
      %582 = arith.addf %578, %581 : vector<16x16xf32>
      %583 = vector.extract_strided_slice %251 {offsets = [5, 6], sizes = [16, 16], strides = [1, 1]} : vector<22x22xf32> to vector<16x16xf32>
      %584 = vector.broadcast %59 : f32 to vector<16x16xf32>
      %585 = arith.mulf %583, %584 : vector<16x16xf32>
      %586 = arith.addf %582, %585 : vector<16x16xf32>
      %587 = vector.extract_strided_slice %253 {offsets = [5, 6], sizes = [16, 16], strides = [1, 1]} : vector<22x22xf32> to vector<16x16xf32>
      %588 = vector.broadcast %108 : f32 to vector<16x16xf32>
      %589 = arith.mulf %587, %588 : vector<16x16xf32>
      %590 = arith.addf %586, %589 : vector<16x16xf32>
      %591 = vector.extract_strided_slice %251 {offsets = [6, 0], sizes = [16, 16], strides = [1, 1]} : vector<22x22xf32> to vector<16x16xf32>
      %592 = vector.broadcast %60 : f32 to vector<16x16xf32>
      %593 = arith.mulf %591, %592 : vector<16x16xf32>
      %594 = arith.addf %590, %593 : vector<16x16xf32>
      %595 = vector.extract_strided_slice %253 {offsets = [6, 0], sizes = [16, 16], strides = [1, 1]} : vector<22x22xf32> to vector<16x16xf32>
      %596 = vector.broadcast %109 : f32 to vector<16x16xf32>
      %597 = arith.mulf %595, %596 : vector<16x16xf32>
      %598 = arith.addf %594, %597 : vector<16x16xf32>
      %599 = vector.extract_strided_slice %251 {offsets = [6, 1], sizes = [16, 16], strides = [1, 1]} : vector<22x22xf32> to vector<16x16xf32>
      %600 = vector.broadcast %61 : f32 to vector<16x16xf32>
      %601 = arith.mulf %599, %600 : vector<16x16xf32>
      %602 = arith.addf %598, %601 : vector<16x16xf32>
      %603 = vector.extract_strided_slice %253 {offsets = [6, 1], sizes = [16, 16], strides = [1, 1]} : vector<22x22xf32> to vector<16x16xf32>
      %604 = vector.broadcast %110 : f32 to vector<16x16xf32>
      %605 = arith.mulf %603, %604 : vector<16x16xf32>
      %606 = arith.addf %602, %605 : vector<16x16xf32>
      %607 = vector.extract_strided_slice %251 {offsets = [6, 2], sizes = [16, 16], strides = [1, 1]} : vector<22x22xf32> to vector<16x16xf32>
      %608 = vector.broadcast %62 : f32 to vector<16x16xf32>
      %609 = arith.mulf %607, %608 : vector<16x16xf32>
      %610 = arith.addf %606, %609 : vector<16x16xf32>
      %611 = vector.extract_strided_slice %253 {offsets = [6, 2], sizes = [16, 16], strides = [1, 1]} : vector<22x22xf32> to vector<16x16xf32>
      %612 = vector.broadcast %111 : f32 to vector<16x16xf32>
      %613 = arith.mulf %611, %612 : vector<16x16xf32>
      %614 = arith.addf %610, %613 : vector<16x16xf32>
      %615 = vector.extract_strided_slice %251 {offsets = [6, 3], sizes = [16, 16], strides = [1, 1]} : vector<22x22xf32> to vector<16x16xf32>
      %616 = vector.broadcast %63 : f32 to vector<16x16xf32>
      %617 = arith.mulf %615, %616 : vector<16x16xf32>
      %618 = arith.addf %614, %617 : vector<16x16xf32>
      %619 = vector.extract_strided_slice %253 {offsets = [6, 3], sizes = [16, 16], strides = [1, 1]} : vector<22x22xf32> to vector<16x16xf32>
      %620 = vector.broadcast %112 : f32 to vector<16x16xf32>
      %621 = arith.mulf %619, %620 : vector<16x16xf32>
      %622 = arith.addf %618, %621 : vector<16x16xf32>
      %623 = vector.extract_strided_slice %251 {offsets = [6, 4], sizes = [16, 16], strides = [1, 1]} : vector<22x22xf32> to vector<16x16xf32>
      %624 = vector.broadcast %64 : f32 to vector<16x16xf32>
      %625 = arith.mulf %623, %624 : vector<16x16xf32>
      %626 = arith.addf %622, %625 : vector<16x16xf32>
      %627 = vector.extract_strided_slice %253 {offsets = [6, 4], sizes = [16, 16], strides = [1, 1]} : vector<22x22xf32> to vector<16x16xf32>
      %628 = vector.broadcast %113 : f32 to vector<16x16xf32>
      %629 = arith.mulf %627, %628 : vector<16x16xf32>
      %630 = arith.addf %626, %629 : vector<16x16xf32>
      %631 = vector.extract_strided_slice %251 {offsets = [6, 5], sizes = [16, 16], strides = [1, 1]} : vector<22x22xf32> to vector<16x16xf32>
      %632 = vector.broadcast %65 : f32 to vector<16x16xf32>
      %633 = arith.mulf %631, %632 : vector<16x16xf32>
      %634 = arith.addf %630, %633 : vector<16x16xf32>
      %635 = vector.extract_strided_slice %253 {offsets = [6, 5], sizes = [16, 16], strides = [1, 1]} : vector<22x22xf32> to vector<16x16xf32>
      %636 = vector.broadcast %114 : f32 to vector<16x16xf32>
      %637 = arith.mulf %635, %636 : vector<16x16xf32>
      %638 = arith.addf %634, %637 : vector<16x16xf32>
      %639 = vector.extract_strided_slice %251 {offsets = [6, 6], sizes = [16, 16], strides = [1, 1]} : vector<22x22xf32> to vector<16x16xf32>
      %640 = vector.broadcast %66 : f32 to vector<16x16xf32>
      %641 = arith.mulf %639, %640 : vector<16x16xf32>
      %642 = arith.addf %638, %641 : vector<16x16xf32>
      %643 = vector.extract_strided_slice %253 {offsets = [6, 6], sizes = [16, 16], strides = [1, 1]} : vector<22x22xf32> to vector<16x16xf32>
      %644 = vector.broadcast %115 : f32 to vector<16x16xf32>
      %645 = arith.mulf %643, %644 : vector<16x16xf32>
      %646 = arith.addf %642, %645 : vector<16x16xf32>
      %647 = arith.negf %646 : vector<16x16xf32>
      %648 = math.exp %647 : vector<16x16xf32>
      %cst_127 = arith.constant 1.000000e+00 : f32
      %649 = vector.broadcast %cst_127 : f32 to vector<16x16xf32>
      %650 = arith.addf %649, %648 : vector<16x16xf32>
      %651 = arith.divf %649, %650 : vector<16x16xf32>
      %652 = vector.extract_strided_slice %651 {offsets = [0, 0], sizes = [1, 16], strides = [1, 1]} : vector<16x16xf32> to vector<1x16xf32>
      %c0_128 = arith.constant 0 : index
      %c0_129 = arith.constant 0 : index
      %c0_130 = arith.constant 0 : index
      %653 = vector.load %arg4[%c0_128, %c0_129, %c0_130] : memref<1x1x256xf32, #tpu.memory_space<vmem>>, vector<1x1x16xf32>
      %654 = vector.shape_cast %653 : vector<1x1x16xf32> to vector<1x16xf32>
      %655 = vector.shape_cast %652 : vector<1x16xf32> to vector<1x1x16xf32>
      tpu.vector_store %arg4[%c0_128, %c0_129, %c0_130], %655 {strides = array<i32>} : memref<1x1x256xf32, #tpu.memory_space<vmem>>, vector<1x1x16xf32>,
      %656 = vector.extract_strided_slice %651 {offsets = [1, 0], sizes = [1, 16], strides = [1, 1]} : vector<16x16xf32> to vector<1x16xf32>
      %c0_131 = arith.constant 0 : index
      %c0_132 = arith.constant 0 : index
      %c16_133 = arith.constant 16 : index
      %657 = vector.load %arg4[%c0_131, %c0_132, %c16_133] : memref<1x1x256xf32, #tpu.memory_space<vmem>>, vector<1x1x16xf32>
      %658 = vector.shape_cast %657 : vector<1x1x16xf32> to vector<1x16xf32>
      %659 = vector.shape_cast %656 : vector<1x16xf32> to vector<1x1x16xf32>
      tpu.vector_store %arg4[%c0_131, %c0_132, %c16_133], %659 {strides = array<i32>} : memref<1x1x256xf32, #tpu.memory_space<vmem>>, vector<1x1x16xf32>,
      %660 = vector.extract_strided_slice %651 {offsets = [2, 0], sizes = [1, 16], strides = [1, 1]} : vector<16x16xf32> to vector<1x16xf32>
      %c0_134 = arith.constant 0 : index
      %c0_135 = arith.constant 0 : index
      %c32_136 = arith.constant 32 : index
      %661 = vector.load %arg4[%c0_134, %c0_135, %c32_136] : memref<1x1x256xf32, #tpu.memory_space<vmem>>, vector<1x1x16xf32>
      %662 = vector.shape_cast %661 : vector<1x1x16xf32> to vector<1x16xf32>
      %663 = vector.shape_cast %660 : vector<1x16xf32> to vector<1x1x16xf32>
      tpu.vector_store %arg4[%c0_134, %c0_135, %c32_136], %663 {strides = array<i32>} : memref<1x1x256xf32, #tpu.memory_space<vmem>>, vector<1x1x16xf32>,
      %664 = vector.extract_strided_slice %651 {offsets = [3, 0], sizes = [1, 16], strides = [1, 1]} : vector<16x16xf32> to vector<1x16xf32>
      %c0_137 = arith.constant 0 : index
      %c0_138 = arith.constant 0 : index
      %c48_139 = arith.constant 48 : index
      %665 = vector.load %arg4[%c0_137, %c0_138, %c48_139] : memref<1x1x256xf32, #tpu.memory_space<vmem>>, vector<1x1x16xf32>
      %666 = vector.shape_cast %665 : vector<1x1x16xf32> to vector<1x16xf32>
      %667 = vector.shape_cast %664 : vector<1x16xf32> to vector<1x1x16xf32>
      tpu.vector_store %arg4[%c0_137, %c0_138, %c48_139], %667 {strides = array<i32>} : memref<1x1x256xf32, #tpu.memory_space<vmem>>, vector<1x1x16xf32>,
      %668 = vector.extract_strided_slice %651 {offsets = [4, 0], sizes = [1, 16], strides = [1, 1]} : vector<16x16xf32> to vector<1x16xf32>
      %c0_140 = arith.constant 0 : index
      %c0_141 = arith.constant 0 : index
      %c64_142 = arith.constant 64 : index
      %669 = vector.load %arg4[%c0_140, %c0_141, %c64_142] : memref<1x1x256xf32, #tpu.memory_space<vmem>>, vector<1x1x16xf32>
      %670 = vector.shape_cast %669 : vector<1x1x16xf32> to vector<1x16xf32>
      %671 = vector.shape_cast %668 : vector<1x16xf32> to vector<1x1x16xf32>
      tpu.vector_store %arg4[%c0_140, %c0_141, %c64_142], %671 {strides = array<i32>} : memref<1x1x256xf32, #tpu.memory_space<vmem>>, vector<1x1x16xf32>,
      %672 = vector.extract_strided_slice %651 {offsets = [5, 0], sizes = [1, 16], strides = [1, 1]} : vector<16x16xf32> to vector<1x16xf32>
      %c0_143 = arith.constant 0 : index
      %c0_144 = arith.constant 0 : index
      %c80_145 = arith.constant 80 : index
      %673 = vector.load %arg4[%c0_143, %c0_144, %c80_145] : memref<1x1x256xf32, #tpu.memory_space<vmem>>, vector<1x1x16xf32>
      %674 = vector.shape_cast %673 : vector<1x1x16xf32> to vector<1x16xf32>
      %675 = vector.shape_cast %672 : vector<1x16xf32> to vector<1x1x16xf32>
      tpu.vector_store %arg4[%c0_143, %c0_144, %c80_145], %675 {strides = array<i32>} : memref<1x1x256xf32, #tpu.memory_space<vmem>>, vector<1x1x16xf32>,
      %676 = vector.extract_strided_slice %651 {offsets = [6, 0], sizes = [1, 16], strides = [1, 1]} : vector<16x16xf32> to vector<1x16xf32>
      %c0_146 = arith.constant 0 : index
      %c0_147 = arith.constant 0 : index
      %c96_148 = arith.constant 96 : index
      %677 = vector.load %arg4[%c0_146, %c0_147, %c96_148] : memref<1x1x256xf32, #tpu.memory_space<vmem>>, vector<1x1x16xf32>
      %678 = vector.shape_cast %677 : vector<1x1x16xf32> to vector<1x16xf32>
      %679 = vector.shape_cast %676 : vector<1x16xf32> to vector<1x1x16xf32>
      tpu.vector_store %arg4[%c0_146, %c0_147, %c96_148], %679 {strides = array<i32>} : memref<1x1x256xf32, #tpu.memory_space<vmem>>, vector<1x1x16xf32>,
      %680 = vector.extract_strided_slice %651 {offsets = [7, 0], sizes = [1, 16], strides = [1, 1]} : vector<16x16xf32> to vector<1x16xf32>
      %c0_149 = arith.constant 0 : index
      %c0_150 = arith.constant 0 : index
      %c112 = arith.constant 112 : index
      %681 = vector.load %arg4[%c0_149, %c0_150, %c112] : memref<1x1x256xf32, #tpu.memory_space<vmem>>, vector<1x1x16xf32>
      %682 = vector.shape_cast %681 : vector<1x1x16xf32> to vector<1x16xf32>
      %683 = vector.shape_cast %680 : vector<1x16xf32> to vector<1x1x16xf32>
      tpu.vector_store %arg4[%c0_149, %c0_150, %c112], %683 {strides = array<i32>} : memref<1x1x256xf32, #tpu.memory_space<vmem>>, vector<1x1x16xf32>,
      %684 = vector.extract_strided_slice %651 {offsets = [8, 0], sizes = [1, 16], strides = [1, 1]} : vector<16x16xf32> to vector<1x16xf32>
      %c0_151 = arith.constant 0 : index
      %c0_152 = arith.constant 0 : index
      %c128 = arith.constant 128 : index
      %685 = vector.load %arg4[%c0_151, %c0_152, %c128] : memref<1x1x256xf32, #tpu.memory_space<vmem>>, vector<1x1x16xf32>
      %686 = vector.shape_cast %685 : vector<1x1x16xf32> to vector<1x16xf32>
      %687 = vector.shape_cast %684 : vector<1x16xf32> to vector<1x1x16xf32>
      tpu.vector_store %arg4[%c0_151, %c0_152, %c128], %687 {strides = array<i32>} : memref<1x1x256xf32, #tpu.memory_space<vmem>>, vector<1x1x16xf32>,
      %688 = vector.extract_strided_slice %651 {offsets = [9, 0], sizes = [1, 16], strides = [1, 1]} : vector<16x16xf32> to vector<1x16xf32>
      %c0_153 = arith.constant 0 : index
      %c0_154 = arith.constant 0 : index
      %c144 = arith.constant 144 : index
      %689 = vector.load %arg4[%c0_153, %c0_154, %c144] : memref<1x1x256xf32, #tpu.memory_space<vmem>>, vector<1x1x16xf32>
      %690 = vector.shape_cast %689 : vector<1x1x16xf32> to vector<1x16xf32>
      %691 = vector.shape_cast %688 : vector<1x16xf32> to vector<1x1x16xf32>
      tpu.vector_store %arg4[%c0_153, %c0_154, %c144], %691 {strides = array<i32>} : memref<1x1x256xf32, #tpu.memory_space<vmem>>, vector<1x1x16xf32>,
      %692 = vector.extract_strided_slice %651 {offsets = [10, 0], sizes = [1, 16], strides = [1, 1]} : vector<16x16xf32> to vector<1x16xf32>
      %c0_155 = arith.constant 0 : index
      %c0_156 = arith.constant 0 : index
      %c160 = arith.constant 160 : index
      %693 = vector.load %arg4[%c0_155, %c0_156, %c160] : memref<1x1x256xf32, #tpu.memory_space<vmem>>, vector<1x1x16xf32>
      %694 = vector.shape_cast %693 : vector<1x1x16xf32> to vector<1x16xf32>
      %695 = vector.shape_cast %692 : vector<1x16xf32> to vector<1x1x16xf32>
      tpu.vector_store %arg4[%c0_155, %c0_156, %c160], %695 {strides = array<i32>} : memref<1x1x256xf32, #tpu.memory_space<vmem>>, vector<1x1x16xf32>,
      %696 = vector.extract_strided_slice %651 {offsets = [11, 0], sizes = [1, 16], strides = [1, 1]} : vector<16x16xf32> to vector<1x16xf32>
      %c0_157 = arith.constant 0 : index
      %c0_158 = arith.constant 0 : index
      %c176 = arith.constant 176 : index
      %697 = vector.load %arg4[%c0_157, %c0_158, %c176] : memref<1x1x256xf32, #tpu.memory_space<vmem>>, vector<1x1x16xf32>
      %698 = vector.shape_cast %697 : vector<1x1x16xf32> to vector<1x16xf32>
      %699 = vector.shape_cast %696 : vector<1x16xf32> to vector<1x1x16xf32>
      tpu.vector_store %arg4[%c0_157, %c0_158, %c176], %699 {strides = array<i32>} : memref<1x1x256xf32, #tpu.memory_space<vmem>>, vector<1x1x16xf32>,
      %700 = vector.extract_strided_slice %651 {offsets = [12, 0], sizes = [1, 16], strides = [1, 1]} : vector<16x16xf32> to vector<1x16xf32>
      %c0_159 = arith.constant 0 : index
      %c0_160 = arith.constant 0 : index
      %c192 = arith.constant 192 : index
      %701 = vector.load %arg4[%c0_159, %c0_160, %c192] : memref<1x1x256xf32, #tpu.memory_space<vmem>>, vector<1x1x16xf32>
      %702 = vector.shape_cast %701 : vector<1x1x16xf32> to vector<1x16xf32>
      %703 = vector.shape_cast %700 : vector<1x16xf32> to vector<1x1x16xf32>
      tpu.vector_store %arg4[%c0_159, %c0_160, %c192], %703 {strides = array<i32>} : memref<1x1x256xf32, #tpu.memory_space<vmem>>, vector<1x1x16xf32>,
      %704 = vector.extract_strided_slice %651 {offsets = [13, 0], sizes = [1, 16], strides = [1, 1]} : vector<16x16xf32> to vector<1x16xf32>
      %c0_161 = arith.constant 0 : index
      %c0_162 = arith.constant 0 : index
      %c208 = arith.constant 208 : index
      %705 = vector.load %arg4[%c0_161, %c0_162, %c208] : memref<1x1x256xf32, #tpu.memory_space<vmem>>, vector<1x1x16xf32>
      %706 = vector.shape_cast %705 : vector<1x1x16xf32> to vector<1x16xf32>
      %707 = vector.shape_cast %704 : vector<1x16xf32> to vector<1x1x16xf32>
      tpu.vector_store %arg4[%c0_161, %c0_162, %c208], %707 {strides = array<i32>} : memref<1x1x256xf32, #tpu.memory_space<vmem>>, vector<1x1x16xf32>,
      %708 = vector.extract_strided_slice %651 {offsets = [14, 0], sizes = [1, 16], strides = [1, 1]} : vector<16x16xf32> to vector<1x16xf32>
      %c0_163 = arith.constant 0 : index
      %c0_164 = arith.constant 0 : index
      %c224 = arith.constant 224 : index
      %709 = vector.load %arg4[%c0_163, %c0_164, %c224] : memref<1x1x256xf32, #tpu.memory_space<vmem>>, vector<1x1x16xf32>
      %710 = vector.shape_cast %709 : vector<1x1x16xf32> to vector<1x16xf32>
      %711 = vector.shape_cast %708 : vector<1x16xf32> to vector<1x1x16xf32>
      tpu.vector_store %arg4[%c0_163, %c0_164, %c224], %711 {strides = array<i32>} : memref<1x1x256xf32, #tpu.memory_space<vmem>>, vector<1x1x16xf32>,
      %712 = vector.extract_strided_slice %651 {offsets = [15, 0], sizes = [1, 16], strides = [1, 1]} : vector<16x16xf32> to vector<1x16xf32>
      %c0_165 = arith.constant 0 : index
      %c0_166 = arith.constant 0 : index
      %c240 = arith.constant 240 : index
      %713 = vector.load %arg4[%c0_165, %c0_166, %c240] : memref<1x1x256xf32, #tpu.memory_space<vmem>>, vector<1x1x16xf32>
      %714 = vector.shape_cast %713 : vector<1x1x16xf32> to vector<1x16xf32>
      %715 = vector.shape_cast %712 : vector<1x16xf32> to vector<1x1x16xf32>
      tpu.vector_store %arg4[%c0_165, %c0_166, %c240], %715 {strides = array<i32>} : memref<1x1x256xf32, #tpu.memory_space<vmem>>, vector<1x1x16xf32>,
    } else {
    }
    return
  }
  func.func @transform_0(%arg0: i32, %arg1: i32) -> (i32, i32, i32) {
    %c0_i32 = arith.constant 0 : i32
    %c0_i32_0 = arith.constant 0 : i32
    return %arg0, %arg1, %c0_i32 : i32, i32, i32
  }
  func.func @transform_1(%arg0: i32, %arg1: i32) -> i32 {
    %c0_i32 = arith.constant 0 : i32
    %c0_i32_0 = arith.constant 0 : i32
    return %c0_i32 : i32
  }
  func.func @transform_2(%arg0: i32, %arg1: i32) -> (i32, i32, i32) {
    %c0_i32 = arith.constant 0 : i32
    %c0_i32_0 = arith.constant 0 : i32
    %c0_i32_1 = arith.constant 0 : i32
    return %arg0, %c0_i32, %c0_i32_0 : i32, i32, i32
  }
}

</mosaic_0001>

<bundles_post_ra>
// kernel: tpu_custom_call.1
= control target key start
LH: loop header
LB: loop body
LE: loop exit
PB: predicated region body
PF: predicated region fallthrough
CT: control target
= control target key end

     0   :  { %s5818_s0 = inlined_call_operand.hbm [shape: f32[2,4,256], index: 0, kind: input, shape index: {}]   ;;  %s5819_s1 = inlined_call_operand.vmem [shape: f32[98], index: 1, kind: input, shape index: {}]   ;;  %s5820_s2 = inlined_call_operand.hbm [shape: f32[2,1,256], index: 2, kind: output, shape index: {}]  }
   0x1   :  { %5946 = sst [smem:[#allocation66_spill]] %s5818_s0 }
   0x2   :  { %5947 = sst [smem:[#allocation67_spill]] %s5819_s1 }
   0x3   :  { %5948 = sst [smem:[#allocation68_spill]] %s5820_s2 }
   0x4   :  { %7 = vsyncpa [#allocation6], 0 }
   0x5   :  { %9 = vsyncpa [#allocation6 + $0x1], 0 }
   0x6   :  { %10 = vsyncpa [#allocation8], 0 }
   0x7   :  { %11 = vsyncpa [#allocation7], 0 }
   0x8   :  { %13 = vsyncpa [#allocation7 + $0x1], 0  ;;  %s3158_s9 = smov 0   ;;  %s3160_s10 = smov 0  }
   0x9   :  { %s3162_s11 = smov 0   ;;  %s3164_s12 = smov 0  }
   0xa   :  { %s3166_s13 = smov 0   ;;  %s3168_s14 = smov 0  }
   0xb LB: > { %5949 = sst [smem:[#allocation14_spill]] %s3094_s9  ;;  %s2749_s15 = sadd.s32 4294967295, %s3114_s14   ;;  %s3114_s14 = sphi %s3168_s14, %s19_s14   ;;  %s3110_s13 = sphi %s3166_s13, %s6258_s13   ;;  %s3106_s12 = sphi %s3164_s12, %s6257_s12   ;;  %s3102_s11 = sphi %s3162_s11, %s6256_s11   ;;  %s3098_s10 = sphi %s3160_s10, %s6255_s10   ;;  %s3094_s9 = sphi %s3158_s9, %s6254_s9  }
   0xc   : > { %5950 = sst [smem:[#allocation15_spill]] %s3098_s10  ;;  %s2750_s16 = sadd.s32 4294967294, %s3114_s14  }
   0xd   : > { %5951 = sst [smem:[#allocation16_spill]] %s3102_s11  ;;  %p53_p0 = scmp.ne.s32.totalorder %s3098_s10, %s3094_s9 }
   0xe   : > { %5952 = sst [smem:[#allocation17_spill]] %s3106_s12  ;;  %p3192_p1 = scmp.eq.s32.totalorder %s2749_s15, 0 }
   0xf   : > { %5953 = sst [smem:[#allocation18_spill]] %s3110_s13  ;;  %p3196_p2 = scmp.eq.s32.totalorder %s2749_s15, 1 }
  0x10   : > { %5954 = sst [smem:[#allocation19_spill]] %s3114_s14  ;;  %p104_p3 = scmp.eq.s32.totalorder %s2750_s16, 1 }
  0x11   : > { %s5955_s17 = scalar_select %p3192_p1, 1, 0 }
  0x12   : > { %p3202_p4 = por %p3192_p1, %p53_p0  ;;  %p2751_p5 = scmp.ge.s32.totalorder %s3114_s14, 1 }
  0x13   : > { %p3207_p6 = por %p104_p3, %p53_p0  ;;  %p111_p7 = scmp.lt.s32.totalorder %s3114_s14, 3 }
  0x14   : > { %s5957_s19 = scalar_select %p3202_p4, 1, 0 }
  0x15   : > { %s5958_s20 = scalar_select %p3207_p6, 1, 0 }
  0x16   : > { %s5960_s1 = sld [smem:[#allocation67_spill]]  ;;  %p3215_p8 = pnand %p2751_p5, %p111_p7 }
  0x17   : > { %5959 = sst [smem:[#allocation20_spill]] %s5958_s20  ;;  %s31_s26 = sadd.s32 1, %s3110_s13 }
  0x18   : > { %p2875_p10 = pneg %p3215_p8  ;;  %s40_s27 = sadd.s32 1, %s3102_s11 }
  0x19   : > { %p33_p12 = scmp.ge.s32.totalorder %s31_s26, 2 }
  0x1a   : > { %p3224_p11 = pnand %p2875_p10, %p3192_p1 }
  0x1c   : > { %s124_s23 = sshll.u32 %s5960_s1, 4  ;;  %p2985_p0 = pneg %p3224_p11  ;;  %s125_s23 = int_to_ptr.vmem [resolvable:$true] %s124_s23 }
  0x1d   : > { %s2983_s28 = scalar_lea.vmem %s125_s23, 16  ;;  %p2991_p7 = scmp.lt.s32.totalorder %s125_s23, %s125_s23 }
  0x1e   : > { %p2984_p13 = scmp.ne.s32.totalorder %s125_s23, %s2983_s28  ;;  %p2992_p6 = scmp.lt.s32.totalorder %s2983_s28, %s2983_s28 }
  0x20   : > { %p2986_p3 = pnand %p2985_p0, %p2984_p13  ;;  %p2993_p9 = por %p2992_p6, %p2991_p7 }
  0x22   : > { %p2987_p5 = pneg %p2986_p3 }
  0x24   : > { %p2994_p4 = pnand %p2993_p9, %p2987_p5 }
  0x26   : > { %2997 = shalt.err (!%p2994_p4)
}
  0x27   : > { %s3116_s29 = smov [#allocation9]   ;;  %s6260_s26 = smov (%p33_p12, %s31_s26), 0 }
  0x28   : > { %2878 = dma.vmem_to_smem (!%p3224_p11), %s125_s23, 16, %s3116_s29, [#allocation8]  }
  0x29   : > { %5963 = sst [smem:[#allocation21_spill]] %s6260_s26  ;;  %p47_p10 = scmp.ne.s32.totalorder %s3102_s11, %s3098_s10 }
  0x2a   : > { %p48_p6 = scmp.eq.s32.totalorder %s3114_s14, 0  ;;  %s35_s30 = ssub.s32 %s3110_s13, %s6260_s26 }
  0x2b   : > { %p2888_p4 = scmp.lt.s32.totalorder %s3114_s14, 2  ;;  %p38_p9 = scmp.eq.s32.totalorder %s35_s30, 0 }
  0x2c   : > { %p49_p13 = por %p48_p6, %p47_p10  ;;  %p3244_p0 = por %p3196_p2, %p47_p10 }
  0x2d   : > { %s135_s4 = sand.u32 1, %s3102_s11   ;;  %s2865_s7 = sshll.u32 %s3110_s13, 7 }
  0x2e   : > { %s5964_s3 = scalar_select %p3244_p0, 1, 0 }
  0x2f   : > { %s3250_s5 = scalar_select %p38_p9, %s3102_s11, %s40_s27  }
  0x30   : > { %5965 = sst [smem:[#allocation22_spill]] %s5964_s3  ;;  %s2754_s6 = sshll.u32 %s135_s4, 3 }
  0x31   : > { %5966 = sst [smem:[#allocation23_spill]] %s3250_s5  ;;  %s5967_s0 = sld [smem:[#allocation66_spill]] }
  0x32   : > { %s139_s21 = scalar_lea.vmem [#allocation5], %s2754_s6  ;;  %p3260_p2 = pnand %p2888_p4, %p49_p13 }
  0x33   : > { %s149_s18 = sshll.u32 %s139_s21, 4  ;;  %s136_s23 = scalar_lea.sflag [#allocation6], %s135_s4  ;;  %s3258_s18 = int_to_ptr.vmem [resolvable:$true] %s149_s18 }
  0x34   : > { %p3000_p12 = pneg %p3260_p2 }
  0x37   : > { %s3256_s16 = scalar_lea.hbm %s5967_s0, %s2865_s7  ;;  %s3003_s29 = scalar_lea.hbm %s5967_s0, 256 }
  0x38   : > { %s2998_s25 = scalar_lea.hbm %s3256_s16, 128  ;;  %p3004_p7 = scmp.lt.u32.totalorder %s3256_s16, %s5967_s0 }
  0x39   : > { %p2999_p11 = scmp.ne.s32.totalorder %s3256_s16, %s2998_s25  ;;  %p3005_p10 = scmp.lt.u32.totalorder %s3003_s29, %s2998_s25 }
  0x3a   : > { %p3007_p4 = scmp.lt.u32.totalorder %s2998_s25, %s3256_s16 }
  0x3b   : > { %p3001_p3 = pnand %p3000_p12, %p2999_p11  ;;  %p3006_p6 = por %p3005_p10, %p3004_p7 }
  0x3d   : > { %p3002_p5 = pneg %p3001_p3  ;;  %p3008_p9 = por %p3007_p4, %p3006_p6 }
  0x3f   : > { %p3009_p13 = pnand %p3008_p9, %p3002_p5 }
  0x41   : > { %3012 = shalt.err (!%p3009_p13)
}
  0x42   : > { %s3013_s4 = scalar_lea.vmem %s3258_s18, 128  ;;  %s3117_s7 = smov [#allocation5]  }
  0x43   : > { %p3014_p11 = scmp.ne.s32.totalorder %s3258_s18, %s3013_s4  ;;  %s3018_s8 = sshll.u32 %s3117_s7, 4  ;;  %s3019_s8 = int_to_ptr.vmem [resolvable:$false] %s3018_s8 }
  0x44   : > { %s3020_s15 = scalar_lea.vmem %s3019_s8, 256  ;;  %p3021_p1 = scmp.lt.s32.totalorder %s3258_s18, %s3019_s8 }
  0x45   : > { %p3016_p3 = pnand %p3014_p11, %p3000_p12  ;;  %p3022_p7 = scmp.lt.s32.totalorder %s3020_s15, %s3013_s4 }
  0x47   : > { %p3017_p0 = pneg %p3016_p3  ;;  %p3023_p10 = por %p3022_p7, %p3021_p1 }
  0x49   : > { %p3024_p6 = pnand %p3023_p10, %p3017_p0 }
  0x4b   : > { %3027 = shalt.err (!%p3024_p6)
}
  0x4c   : > { %2882 = dma.hbm_to_vmem [thread:$0]  (!%p3260_p2), %s3256_s16, 128, %s3258_s18, %s136_s23  }
  0x4d   : > { %158 = sbr.rel (%p3215_p8) target bundleno = 1011 (0x3f3), region = 28 }
  0x54   : > { %s3292_s21 = sand.u32 1, %s3098_s10   ;;  %p5970_p1 = scmp.ne.s32.totalorder %s5957_s19, 0 }
  0x55   : > { %5969 = sst [smem:[#allocation24_spill]] %s3292_s21  ;;  %s2758_s25 = sshll.u32 %s3292_s21, 3 }
  0x56   : > { %s161_s27 = scalar_lea.sflag [#allocation6], %s3292_s21  ;;  %s164_s28 = scalar_lea.vmem [#allocation5], %s2758_s25 }
  0x57   : > { %3081 = dma.done.wait (%p5970_p1), %s161_s27, 128  }
  0x58   : > { %3083 = vsyncadd (%p5970_p1), %s161_s27, 4294967168  ;;  %p5971_p0 = scmp.ne.s32.totalorder %s5955_s17, 0 }
  0x5a   : > { %3085 = dma.done.wait (%p5971_p0), [#allocation8], 16  }
  0x5b   : > { %3087 = vsyncadd (%p5971_p0), [#allocation8], 4294967280 }
  0x5c   : > { %173 = sfence }
  0x5d   : > { %v5865_v0 = vlaneseq  ;;  %v200_v1 = vld [vmem:[%s164_s28] sm:$0xff]  ;;  %vm204_vm0 = vcmask 1043456   ;;  %v3118_v8 = vmov -inf   ;;  %v3119_v11 = vmov 0.0   ;;  %s5827_s17 = smov 96   ;;  %s5825_s19 = smov 112  }
  0x5e   : > { %v202_v2 = vcombine.high %v200_v1, %v200_v1  ;;  %v205_v3 = vsel %vm204_vm0, %v200_v1, 0.0  ;;  %v219_v4 = vsel %vm204_vm0, %v200_v1, -inf  ;;  %v3120_v16 = vmov 1966171168   ;;  %s5833_s24 = smov 64   ;;  %s5829_s16 = smov 80  }
  0x5f   : > { %vm3307_vm1 = vcmp.lt.s32.totalorder %v5865_v0, 256  ;;  %v206_v6 = vrot.slane %v205_v3, 4  ;;  %v220_v7 = vrot.slane %v219_v4, 4  ;;  %v238_v17 = vunpack.c.l.s4 %v3120_v16  ;;  %s5831_s18 = smov 48   ;;  %s5835_s22 = smov 32  }
  0x60   : > { %199 = vst.msk [vmem:[#allocation3] sm:$0x3] %vm3307_vm1, %v3118_v8  ;;  %v212_v9 = vsel %vm204_vm0, %v202_v2, 0.0  ;;  %v226_v10 = vsel %vm204_vm0, %v202_v2, -inf  ;;  %198 = vst.msk [vmem:[#allocation2] sm:$0x3] %vm3307_vm1, %v3119_v11 }
  0x61   : > { %v207_v12 = vadd.f32 %v206_v6, %v205_v3  ;;  %v213_v13 = vrot.slane %v212_v9, 4  ;;  %v221_v14 = vmax.f32 %v219_v4, %v220_v7  ;;  %v227_v15 = vrot.slane %v226_v10, 4  ;;  %s5837_s23 = smov 16   ;;  %s3128_s29 = smov 3  }
  0x62   : > { %v239_v26 = vunpack.c.0.s8 %v238_v17  ;;  %v241_v27 = vshrl.u32 %v5865_v0, 7  ;;  %vm383_vm2 = vcmask 179200   ;;  %s3129_s30 = smov 115   ;;  %s3130_s6 = smov 99   ;;  %vm386_vm3 = vcmask 177152  }
  0x63   : > { %v208_v18 = vrot.slane %v207_v12, 2  ;;  %v214_v19 = vadd.f32 %v213_v13, %v212_v9  ;;  %v222_v20 = vrot.slane %v221_v14, 2  ;;  %v228_v21 = vmax.f32 %v226_v10, %v227_v15  ;;  %388 = vst.msk [vmem:[#allocation4 + $0x18] sm:$0xff] %vm383_vm2, %v3119_v11  ;;  %384 = vst.msk [vmem:[#allocation4] sm:$0xff] %vm383_vm2, %v3119_v11  ;;  %s3131_s4 = smov 67   ;;  %s3132_s7 = smov 83  }
  0x64   : > { %v3319_v38 = vsub.s32 %v239_v26, %v241_v27  ;;  %385 = vst.msk [vmem:[#allocation4 + $0x8] sm:$0xff] %vm383_vm2, %v3119_v11  ;;  %389 = vst.msk [vmem:[#allocation4 + $0x20] sm:$0xff] %vm383_vm2, %v3119_v11  ;;  %v3343_v52 = vsub.s32 0, %v241_v27  ;;  %s3133_s8 = smov 35   ;;  %s3134_s15 = smov 51   ;;  %vm399_vm4 = vcmask 147480  }
  0x65   : > { %v209_v22 = vadd.f32 %v208_v18, %v207_v12  ;;  %v215_v23 = vrot.slane %v214_v19, 2  ;;  %v223_v24 = vmax.f32 %v221_v14, %v222_v20  ;;  %v229_v25 = vrot.slane %v228_v21, 2  ;;  %s3135_s25 = smov 19   ;;  %390 = vst.msk [vmem:[#allocation4 + $0x28] sm:$0x3f] %vm386_vm3, %v3119_v11  ;;  %s3399_s27 = sld [smem:[#allocation9 + $0x32]] }
  0x66   : > { %5974 = vst [vmem:[#allocation25_spill] sm:$0xff] %v3319_v38  ;;  %387 = vst.msk [vmem:[#allocation4 + $0x10] sm:$0x3f] %vm386_vm3, %v3119_v11  ;;  %s3401_s28 = sld [smem:[#allocation9 + $0x33]]  ;;  %s5978_s0 = smov 122   ;;  %vm818_vm5 = vcmask 1046528  }
  0x67   : > { %v210_v28 = vrot.slane %v209_v22, 1  ;;  %v216_v29 = vadd.f32 %v215_v23, %v214_v19  ;;  %v224_v30 = vrot.slane %v223_v24, 1  ;;  %v230_v31 = vmax.f32 %v228_v21, %v229_v25  ;;  %v258_v43 = vld [vmem:[#allocation3] sm:$0x3]  ;;  %v233_v44 = vld [vmem:[#allocation2] sm:$0x3] }
  0x68   : > { %s2818_s1 = sld [smem:[#allocation9 + $0x3a]]  ;;  %s2819_s26 = sld [smem:[#allocation9 + $0x3b]]  ;;  %vm1091_vm6 = vcmask 1045504   ;;  %vm1364_vm7 = vcmask 1044480   ;;  %vm1909_vm8 = vcmask 1042432   ;;  %vm2182_vm9 = vcmask 1041408  }
  0x69   : > { %v211_v32 = vadd.f32 %v210_v28, %v209_v22  ;;  %v217_v33 = vrot.slane %v216_v29, 1  ;;  %v225_v34 = vmax.f32 %v223_v24, %v224_v30  ;;  %v231_v35 = vrot.slane %v230_v31, 1  ;;  %s3521_s13 = sld [smem:[#allocation9 + $0x3c]]  ;;  %s3540_s5 = sld [smem:[#allocation9 + $0x40]] }
  0x6a   : > { %s3542_s11 = sld [smem:[#allocation9 + $0x41]]  ;;  %s3548_s10 = sld [smem:[#allocation9 + $0x8]] }
  0x6b   : > { %v218_v36 = vadd.f32 %v217_v33, %v216_v29  ;;  %v232_v37 = vmax.f32 %v230_v31, %v231_v35  ;;  %s3550_s14 = sld [smem:[#allocation9 + $0x9]]  ;;  %s3554_s20 = sld [smem:[#allocation9 + $0xa]] }
  0x6c   : > { %s3556_s9 = sld [smem:[#allocation9 + $0xb]]  ;;  %s3576_s3 = sld [smem:[#allocation9 + $0x7]] }
  0x6d   : > { %v236_v39 = vcombine.low %v211_v32, %v218_v36  ;;  %v261_v40 = vcombine.low %v225_v34, %v232_v37  ;;  %s3574_s2 = sld [smem:[#allocation9 + $0x43]]  ;;  %s5980_s12 = smov 126  }
  0x6e   : > { %s3586_s21 = sld [smem:[#allocation9 + $0x38]] }
  0x6f   : > { %v243_v41 = vrot.slane %v236_v39, %v3319_v38  ;;  %v268_v42 = vrot.slane %v261_v40, %v3319_v38 }
  0x71   : > { %v250_v45 = vrot.slane %v243_v41, %v3319_v38  ;;  %v275_v46 = vrot.slane %v268_v42, %v3319_v38 }
  0x73   : > { %v277_v47 = vmax.f32 %v258_v43, %v275_v46  ;;  %v252_v48 = vadd.f32 %v250_v45, %v233_v44 }
  0x75   : > { %278 = vst.msk [vmem:[#allocation3] sm:$0x3] %vm3307_vm1, %v277_v47  ;;  %257 = vst.msk [vmem:[#allocation2] sm:$0x3] %vm3307_vm1, %v252_v48 }
  0x7c   : > { %v382_v49 = vld [vmem:[#allocation3] sm:$0x3]  ;;  %v380_v50 = vld [vmem:[#allocation2] sm:$0x3] }
  0x7d   : > { %518 = vrot.lane.b32.xlu1 %v382_v49, %s5827_s17  ;;  %496 = vrot.lane.b32.xlu0 %v382_v49, %s5825_s19  ;;  %v381_v51 = vmul.f32 0.25, %v380_v50  ;;  %v405_v53 = vrot.slane %v382_v49, %v3343_v52  ;;  %v476_v57 = vrot.slane %v382_v49, 1 }
  0x7f   : > { %v395_v54 = vrot.slane %v381_v51, %v3343_v52  ;;  %v467_v55 = vrot.slane %v381_v51, 1  ;;  %v480_v58 = vrot.slane %v476_v57, %v3343_v52  ;;  %v694_v57 = vstv %s3401_s28  ;;  %s3581_s28 = sld [smem:[#allocation9 + $0xc]] }
  0x81   : > { %562 = vrot.lane.b32.xlu1 %v382_v49, %s5833_s24  ;;  %540 = vrot.lane.b32.xlu0 %v382_v49, %s5829_s16  ;;  %v471_v56 = vrot.slane %v467_v55, %v3343_v52  ;;  %v668_v55 = vstv %s3399_s27  ;;  %s5979_s27 = smov 127  }
  0x85   : > { %584 = vrot.lane.b32.xlu1 %v382_v49, %s5831_s18  ;;  %606 = vrot.lane.b32.xlu0 %v382_v49, %s5835_s22 }
  0x89   : > { %628 = vrot.lane.b32.xlu1 %v382_v49, %s5837_s23  ;;  %485 = vrot.lane.b32.xlu0 %v381_v51, %s5825_s19  ;;  %s5849_s19 = smov 125  }
  0x8d   : > { %529 = vrot.lane.b32.xlu1 %v381_v51, %s5829_s16  ;;  %507 = vrot.lane.b32.xlu0 %v381_v51, %s5827_s17  ;;  %s3453_s17 = sld [smem:[#allocation9 + $0x1]]  ;;  %s5839_s16 = smov 124  }
  0x91   : > { %551 = vrot.lane.b32.xlu1 %v381_v51, %s5833_s24  ;;  %573 = vrot.lane.b32.xlu0 %v381_v51, %s5831_s18  ;;  %s3462_s18 = sld [smem:[#allocation9 + $0x2]]  ;;  %s5841_s24 = smov 123  }
  0x95   : > { %595 = vrot.lane.b32.xlu1 %v381_v51, %s5835_s22  ;;  %617 = vrot.lane.b32.xlu0 %v381_v51, %s5837_s23  ;;  %s3469_s22 = sld [smem:[#allocation9 + $0x3]]  ;;  %s5843_s23 = smov 122  }
  0x99   : > { %406 = vrot.lane.b32.xlu1 %v405_v53, %s3128_s29  ;;  %396 = vrot.lane.b32.xlu0 %v395_v54, %s3128_s29 }
  0x9d   : > { %415 = vrot.lane.b32.xlu1 %v405_v53, %s3129_s30  ;;  %411 = vrot.lane.b32.xlu0 %v395_v54, %s3129_s30  ;;  %s3409_s30 = sld [smem:[#allocation9]] }
  0xa1   : > { %423 = vrot.lane.b32.xlu1 %v405_v53, %s3130_s6  ;;  %419 = vrot.lane.b32.xlu0 %v395_v54, %s3130_s6  ;;  %s3412_s6 = sld [smem:[#allocation9 + $0x31]] }
  0xa5   : > { %435 = vrot.lane.b32.xlu1 %v395_v54, %s3131_s4  ;;  %427 = vrot.lane.b32.xlu0 %v395_v54, %s3132_s7 }
  0xa7   : > { %5975 = sst [smem:[#allocation26_spill]] %s3412_s6 }
  0xa9   : > { %451 = vrot.lane.b32.xlu1 %v395_v54, %s3133_s8  ;;  %443 = vrot.lane.b32.xlu0 %v395_v54, %s3134_s15 }
  0xad   : > { %472 = vrot.lane.b32.xlu1 %v471_v56, %s3128_s29  ;;  %459 = vrot.lane.b32.xlu0 %v395_v54, %s3135_s25 }
  0xb1   : > { %439 = vrot.lane.b32.xlu1 %v405_v53, %s3131_s4  ;;  %431 = vrot.lane.b32.xlu0 %v405_v53, %s3132_s7  ;;  %s3417_s4 = sld [smem:[#allocation9 + $0x35]]  ;;  %s5845_s7 = smov 127  }
  0xb5   : > { %455 = vrot.lane.b32.xlu1 %v405_v53, %s3133_s8  ;;  %447 = vrot.lane.b32.xlu0 %v405_v53, %s3134_s15  ;;  %s3429_s8 = sld [smem:[#allocation9 + $0x36]]  ;;  %s5847_s15 = smov 126  }
  0xb9   : > { %481 = vrot.lane.b32.xlu1 %v480_v58, %s3128_s29  ;;  %463 = vrot.lane.b32.xlu0 %v405_v53, %s3135_s25  ;;  %s3440_s25 = sld [smem:[#allocation9 + $0x37]] }
  0xef   : > { %v519_v59 = vpop.permute.xlu1 %518  ;;  %v497_v60 = vpop.permute.xlu0 %496 }
  0xf0   : > { %v520_v61 = vrot.slane %v519_v59, 1  ;;  %v498_v62 = vrot.slane %v497_v60, 1 }
  0xf2   : > { %v524_v63 = vrot.slane %v520_v61, %v3343_v52  ;;  %v502_v1 = vrot.slane %v498_v62, %v3343_v52 }
  0xf3   : > { %v563_v2 = vpop.permute.xlu1 %562  ;;  %v541_v3 = vpop.permute.xlu0 %540 }
  0xf4   : > { %v564_v4 = vrot.slane %v563_v2, 1  ;;  %v542_v5 = vrot.slane %v541_v3, 1  ;;  %525 = vrot.lane.b32.xlu1 %v524_v63, %s3128_s29  ;;  %503 = vrot.lane.b32.xlu0 %v502_v1, %s3128_s29  ;;  %v5868_v63 = vstv %s3409_s30  ;;  %v5867_v3 = vstv %s3412_s6  ;;  %s3588_s6 = sld [smem:[#allocation9 + $0xd]] }
  0xf6   : > { %v568_v6 = vrot.slane %v564_v4, %v3343_v52  ;;  %v546_v7 = vrot.slane %v542_v5, %v3343_v52  ;;  %v746_v4 = vstv %s3417_s4  ;;  %s2844_s4 = sld [smem:[#allocation9 + $0x54]] }
  0xf7   : > { %v585_v8 = vpop.permute.xlu1 %584  ;;  %v607_v9 = vpop.permute.xlu0 %606 }
  0xf8   : > { %v586_v10 = vrot.slane %v585_v8, 1  ;;  %v608_v12 = vrot.slane %v607_v9, 1  ;;  %569 = vrot.lane.b32.xlu1 %v568_v6, %s3128_s29  ;;  %547 = vrot.lane.b32.xlu0 %v546_v7, %s3128_s29  ;;  %v772_v8 = vstv %s3429_s8  ;;  %s4164_s8 = sld [smem:[#allocation9 + $0x18]] }
  0xfa   : > { %v590_v11 = vrot.slane %v586_v10, %v3343_v52  ;;  %v612_v13 = vrot.slane %v608_v12, %v3343_v52  ;;  %v798_v12 = vstv %s3440_s25  ;;  %s4166_s25 = sld [smem:[#allocation9 + $0x2a]] }
  0xfb   : > { %v629_v14 = vpop.permute.xlu1 %628  ;;  %v486_v15 = vpop.permute.xlu0 %485 }
  0xfc   : > { %v630_v16 = vrot.slane %v629_v14, 1  ;;  %v487_v17 = vrot.slane %v486_v15, 1  ;;  %591 = vrot.lane.b32.xlu1 %v590_v11, %s3128_s29  ;;  %613 = vrot.lane.b32.xlu0 %v612_v13, %s3128_s29  ;;  %v655_v13 = vstv %s3453_s17  ;;  %v681_v15 = vstv %s3462_s18  ;;  %s2776_s17 = sld [smem:[#allocation9 + $0x10]]  ;;  %s2779_s18 = sld [smem:[#allocation9 + $0x13]] }
  0xfe   : > { %v634_v18 = vrot.slane %v630_v16, %v3343_v52  ;;  %v491_v19 = vrot.slane %v487_v17, %v3343_v52  ;;  %v707_v17 = vstv %s3469_s22  ;;  %s2780_s22 = sld [smem:[#allocation9 + $0x14]] }
  0xff   : > { %v530_v20 = vpop.permute.xlu1 %529  ;;  %v508_v21 = vpop.permute.xlu0 %507 }
 0x100   : > { %v531_v22 = vrot.slane %v530_v20, 1  ;;  %v509_v23 = vrot.slane %v508_v21, 1  ;;  %635 = vrot.lane.b32.xlu1 %v634_v18, %s3128_s29  ;;  %492 = vrot.lane.b32.xlu0 %v491_v19, %s3128_s29 }
 0x102   : > { %v535_v24 = vrot.slane %v531_v22, %v3343_v52  ;;  %v513_v25 = vrot.slane %v509_v23, %v3343_v52 }
 0x103   : > { %v552_v26 = vpop.permute.xlu1 %551  ;;  %v574_v27 = vpop.permute.xlu0 %573 }
 0x104   : > { %v553_v28 = vrot.slane %v552_v26, 1  ;;  %v575_v29 = vrot.slane %v574_v27, 1  ;;  %514 = vrot.lane.b32.xlu1 %v513_v25, %s3128_s29  ;;  %536 = vrot.lane.b32.xlu0 %v535_v24, %s3128_s29 }
 0x106   : > { %v557_v30 = vrot.slane %v553_v28, %v3343_v52  ;;  %v579_v31 = vrot.slane %v575_v29, %v3343_v52 }
 0x107   : > { %v596_v32 = vpop.permute.xlu1 %595  ;;  %v618_v33 = vpop.permute.xlu0 %617 }
 0x108   : > { %v597_v34 = vrot.slane %v596_v32, 1  ;;  %v619_v35 = vrot.slane %v618_v33, 1  ;;  %558 = vrot.lane.b32.xlu1 %v557_v30, %s3128_s29  ;;  %580 = vrot.lane.b32.xlu0 %v579_v31, %s3128_s29 }
 0x10a   : > { %v601_v36 = vrot.slane %v597_v34, %v3343_v52  ;;  %v623_v37 = vrot.slane %v619_v35, %v3343_v52 }
 0x10b   : > { %v407_v39 = vpop.permute.xlu1 %406  ;;  %v397_v40 = vpop.permute.xlu0 %396 }
 0x10c   : > { %410 = vst.msk [vmem:[#allocation4 + $0x1b] sm:$0x1] %vm399_vm4, %v407_v39  ;;  %400 = vst.msk [vmem:[#allocation4 + $0x3] sm:$0x1] %vm399_vm4, %v397_v40  ;;  %602 = vrot.lane.b32.xlu1 %v601_v36, %s3128_s29  ;;  %624 = vrot.lane.b32.xlu0 %v623_v37, %s3128_s29  ;;  %s3405_s29 = sld [smem:[#allocation9 + $0x34]]  ;;  %v3519_v36 = vstv %s2818_s1  ;;  %s3538_s1 = sld [smem:[#allocation9 + $0x3e]] }
 0x10f   : > { %v416_v41 = vpop.permute.xlu1 %415  ;;  %v412_v42 = vpop.permute.xlu0 %411 }
 0x110   : > { %418 = vst.msk [vmem:[#allocation4 + $0x1c] sm:$0x1] %vm399_vm4, %v416_v41  ;;  %414 = vst.msk [vmem:[#allocation4 + $0x4] sm:$0x1] %vm399_vm4, %v412_v42 }
 0x112   : > { %v720_v62 = vstv %s3405_s29  ;;  %s2783_s29 = sld [smem:[#allocation9 + $0x17]] }
 0x113   : > { %v424_v43 = vpop.permute.xlu1 %423  ;;  %v420_v44 = vpop.permute.xlu0 %419 }
 0x114   : > { %426 = vst.msk [vmem:[#allocation4 + $0x1d] sm:$0x1] %vm399_vm4, %v424_v43  ;;  %422 = vst.msk [vmem:[#allocation4 + $0x5] sm:$0x1] %vm399_vm4, %v420_v44 }
 0x117   : > { %v436_v45 = vpop.permute.xlu1 %435  ;;  %v428_v46 = vpop.permute.xlu0 %427 }
 0x118   : > { %438 = vst.msk [vmem:[#allocation4 + $0x7] sm:$0x1] %vm399_vm4, %v436_v45  ;;  %430 = vst.msk [vmem:[#allocation4 + $0x6] sm:$0x1] %vm399_vm4, %v428_v46  ;;  %v3552_v46 = vstv %s2819_s26  ;;  %s3571_s26 = sld [smem:[#allocation9 + $0x42]] }
 0x11b   : > { %v452_v47 = vpop.permute.xlu1 %451  ;;  %v444_v48 = vpop.permute.xlu0 %443 }
 0x11c   : > { %454 = vst.msk [vmem:[#allocation4 + $0x9] sm:$0x1] %vm399_vm4, %v452_v47  ;;  %446 = vst.msk [vmem:[#allocation4 + $0x8] sm:$0x1] %vm399_vm4, %v444_v48 }
 0x11f   : > { %v473_v49 = vpop.permute.xlu1 %472  ;;  %v460_v50 = vpop.permute.xlu0 %459  ;;  %v3432_v1 = vld [vmem:[#allocation4] sm:$0xff] }
 0x120   : > { %475 = vst.msk [vmem:[#allocation4 + $0xb] sm:$0x1] %vm399_vm4, %v473_v49  ;;  %462 = vst.msk [vmem:[#allocation4 + $0xa] sm:$0x1] %vm399_vm4, %v460_v50  ;;  %v646_v5 = vmul.f32 %v5868_v63, %v3432_v1  ;;  %v656_v14 = vmul.f32 %v655_v13, %v3432_v1  ;;  %v682_v16 = vmul.f32 %v681_v15, %v3432_v1 }
 0x121   : > { %v708_v18 = vmul.f32 %v707_v17, %v3432_v1 }
 0x123   : > { %v440_v51 = vpop.permute.xlu1 %439  ;;  %v432_v52 = vpop.permute.xlu0 %431 }
 0x124   : > { %442 = vst.msk [vmem:[#allocation4 + $0x1f] sm:$0x1] %vm399_vm4, %v440_v51  ;;  %434 = vst.msk [vmem:[#allocation4 + $0x1e] sm:$0x1] %vm399_vm4, %v432_v52 }
 0x127   : > { %v456_v53 = vpop.permute.xlu1 %455  ;;  %v448_v54 = vpop.permute.xlu0 %447 }
 0x128   : > { %458 = vst.msk [vmem:[#allocation4 + $0x21] sm:$0x1] %vm399_vm4, %v456_v53  ;;  %450 = vst.msk [vmem:[#allocation4 + $0x20] sm:$0x1] %vm399_vm4, %v448_v54 }
 0x12b   : > { %v3414_v56 = vld [vmem:[#allocation4 + $0x18] sm:$0xff]  ;;  %v482_v58 = vpop.permute.xlu1 %481  ;;  %v464_v59 = vpop.permute.xlu0 %463 }
 0x12c   : > { %v669_v60 = vmul.f32 %v668_v55, %v3414_v56  ;;  %484 = vst.msk [vmem:[#allocation4 + $0x23] sm:$0x1] %vm399_vm4, %v482_v58  ;;  %466 = vst.msk [vmem:[#allocation4 + $0x22] sm:$0x1] %vm399_vm4, %v464_v59  ;;  %v695_v61 = vmul.f32 %v694_v57, %v3414_v56  ;;  %v721_v2 = vmul.f32 %v720_v62, %v3414_v56 }
 0x12d   : > { %v651_v6 = vmul.f32 %v5867_v3, %v3414_v56  ;;  %v747_v7 = vmul.f32 %v746_v4, %v3414_v56  ;;  %v773_v10 = vmul.f32 %v772_v8, %v3414_v56  ;;  %v799_v11 = vmul.f32 %v798_v12, %v3414_v56 }
 0x12e   : > { %673 = vrot.lane.b32.xlu0 %v669_v60, %s5845_s7  ;;  %v905_v43 = vmul.f32 %v3519_v36, %v3414_v56  ;;  %v945_v52 = vmul.f32 %v3552_v46, %v3414_v56 }
 0x12f   : > { %v3455_v9 = vadd.f32 %v651_v6, %v646_v5  ;;  %v3614_v6 = vstv %s3540_s5  ;;  %s2836_s5 = sld [smem:[#allocation9 + $0x4c]] }
 0x130   : > { %v911_v51 = vrot.slane %v905_v43, 1  ;;  %v951_v5 = vrot.slane %v945_v52, 1  ;;  %v3671_v43 = vstv %s3586_s21  ;;  %s2775_s21 = sld [smem:[#allocation9 + $0xf]] }
 0x131   : > { %5984 = vst [vmem:[#allocation29_spill] sm:$0xff] %v3671_v43  ;;  %v829_v3 = vmul.f32 %v3671_v43, %v3414_v56 }
 0x132   : > { %699 = vrot.lane.b32.xlu0 %v695_v61, %s5847_s15 }
 0x136   : > { %725 = vrot.lane.b32.xlu0 %v721_v2, %s5849_s19  ;;  %v3608_v2 = vstv %s3538_s1  ;;  %s4223_s1 = sld [smem:[#allocation9 + $0x19]] }
 0x13a   : > { %751 = vrot.lane.b32.xlu0 %v747_v7, %s5839_s16  ;;  %s3476_s16 = sld [smem:[#allocation9 + $0x4]]  ;;  %v3617_v7 = vstv %s3548_s10  ;;  %s2831_s10 = sld [smem:[#allocation9 + $0x47]] }
 0x13e   : > { %777 = vrot.lane.b32.xlu0 %v773_v10, %s5841_s24  ;;  %s3483_s24 = sld [smem:[#allocation9 + $0x5]] }
 0x140   : > { %v733_v19 = vstv %s3476_s16  ;;  %s2778_s16 = sld [smem:[#allocation9 + $0x12]] }
 0x141   : > { %v734_v20 = vmul.f32 %v733_v19, %v3432_v1 }
 0x142   : > { %803 = vrot.lane.b32.xlu0 %v799_v11, %s5843_s23  ;;  %s3490_s23 = sld [smem:[#allocation9 + $0x6]] }
 0x144   : > { %v5880_v21 = vstv %s3483_s24 }
 0x145   : > { %v760_v22 = vmul.f32 %v5880_v21, %v3432_v1 }
 0x146   : > { %660 = vrot.lane.b32.xlu0 %v656_v14, %s5845_s7  ;;  %s5976_s7 = smov 124   ;;  %v3620_v14 = vstv %s3542_s11  ;;  %s2832_s11 = sld [smem:[#allocation9 + $0x48]] }
 0x147   : > { %v1178_v63 = vmul.f32 %v3620_v14, %v3414_v56 }
 0x148   : > { %v5878_v23 = vstv %s3490_s23  ;;  %v5993_v38 = vstv %s3490_s23  ;;  %s2782_s23 = sld [smem:[#allocation9 + $0x16]] }
 0x149   : > { %v786_v24 = vmul.f32 %v5878_v23, %v3432_v1 }
 0x14a   : > { %686 = vrot.lane.b32.xlu0 %v682_v16, %s5847_s15  ;;  %s5977_s15 = smov 123   ;;  %v3623_v16 = vstv %s3550_s14  ;;  %s2833_s14 = sld [smem:[#allocation9 + $0x49]] }
 0x14e   : > { %712 = vrot.lane.b32.xlu0 %v708_v18, %s5849_s19  ;;  %s2817_s19 = sld [smem:[#allocation9 + $0x39]]  ;;  %v3626_v18 = vstv %s3554_s20  ;;  %s2834_s20 = sld [smem:[#allocation9 + $0x4a]] }
 0x152   : > { %738 = vrot.lane.b32.xlu0 %v734_v20, %s5976_s7  ;;  %v3629_v20 = vstv %s3556_s9  ;;  %s2829_s9 = sld [smem:[#allocation9 + $0x45]] }
 0x154   : > { %v3511_v31 = vstv %s2817_s19  ;;  %s3536_s19 = sld [smem:[#allocation9 + $0x3d]] }
 0x155   : > { %v865_v32 = vmul.f32 %v3511_v31, %v3414_v56 }
 0x156   : > { %764 = vrot.lane.b32.xlu0 %v760_v22, %s5977_s15 }
 0x157   : > { %v871_v41 = vrot.slane %v865_v32, 1 }
 0x15a   : > { %790 = vrot.lane.b32.xlu0 %v786_v24, %s5978_s0  ;;  %v3605_v61 = vstv %s3536_s19  ;;  %s4185_s19 = sld [smem:[#allocation9 + $0x5b]] }
 0x15b   : > { %v1025_v32 = vmul.f32 %v3605_v61, %v3414_v56 }
 0x166   : > { %v526_v25 = vpop.permute.xlu1 %525  ;;  %v504_v26 = vpop.permute.xlu0 %503 }
 0x167   : > { %528 = vst.msk [vmem:[#allocation4 + $0x25] sm:$0x1] %vm399_vm4, %v526_v25  ;;  %506 = vst.msk [vmem:[#allocation4 + $0x24] sm:$0x1] %vm399_vm4, %v504_v26 }
 0x16a   : > { %v570_v27 = vpop.permute.xlu1 %569  ;;  %v548_v28 = vpop.permute.xlu0 %547 }
 0x16b   : > { %572 = vst.msk [vmem:[#allocation4 + $0x27] sm:$0x1] %vm399_vm4, %v570_v27  ;;  %550 = vst.msk [vmem:[#allocation4 + $0x26] sm:$0x1] %vm399_vm4, %v548_v28  ;;  %v3646_v27 = vstv %s3571_s26  ;;  %v3649_v28 = vstv %s3574_s2  ;;  %s2828_s2 = sld [smem:[#allocation9 + $0x44]]  ;;  %s4260_s26 = sld [smem:[#allocation9 + $0x1a]] }
 0x16c   : > { %v1218_v21 = vmul.f32 %v3646_v27, %v3414_v56 }
 0x16e   : > { %v592_v29 = vpop.permute.xlu1 %591  ;;  %v614_v30 = vpop.permute.xlu0 %613 }
 0x16f   : > { %594 = vst.msk [vmem:[#allocation4 + $0x28] sm:$0x1] %vm399_vm4, %v592_v29  ;;  %616 = vst.msk [vmem:[#allocation4 + $0x29] sm:$0x1] %vm399_vm4, %v614_v30  ;;  %v845_v29 = vmul.f32 %v3617_v7, %v3432_v1  ;;  %v3654_v30 = vstv %s3576_s3  ;;  %s2835_s3 = sld [smem:[#allocation9 + $0x4b]] }
 0x170   : > { %5982 = vst [vmem:[#allocation27_spill] sm:$0xff] %v3654_v30 }
 0x172   : > { %v3517_v33 = vld [vmem:[#allocation4 + $0x20] sm:$0xff]  ;;  %v636_v34 = vpop.permute.xlu1 %635  ;;  %v493_v35 = vpop.permute.xlu0 %492 }
 0x173   : > { %638 = vst.msk [vmem:[#allocation4 + $0x2a] sm:$0x1] %vm399_vm4, %v636_v34  ;;  %495 = vst.msk [vmem:[#allocation4 + $0xc] sm:$0x1] %vm399_vm4, %v493_v35  ;;  %v670_v37 = vmul.f32 %v668_v55, %v3517_v33  ;;  %v3530_v39 = vmul.f32 %v3511_v31, %v3517_v33  ;;  %v3534_v40 = vmul.f32 %v3519_v36, %v3517_v33  ;;  %v3584_v55 = vstv %s3521_s13  ;;  %s5981_s13 = smov 125  }
 0x174   : > { %v696_v48 = vmul.f32 %v694_v57, %v3517_v33  ;;  %v3569_v50 = vmul.f32 %v3552_v46, %v3517_v33  ;;  %v722_v58 = vmul.f32 %v720_v62, %v3517_v33  ;;  %v3601_v60 = vmul.f32 %v3584_v55, %v3517_v33 }
 0x175   : > { %675 = vrot.lane.b32.xlu1 %v670_v37, %s5979_s27  ;;  %v5876_v42 = vrot.slane %v3530_v39, 1  ;;  %v5875_v49 = vrot.slane %v3534_v40, 1  ;;  %v985_v62 = vmul.f32 %v3584_v55, %v3414_v56  ;;  %v748_v24 = vmul.f32 %v746_v4, %v3517_v33 }
 0x176   : > { %v515_v44 = vpop.permute.xlu1 %514  ;;  %v537_v45 = vpop.permute.xlu0 %536  ;;  %v5871_v59 = vrot.slane %v3569_v50, 1  ;;  %v5870_v25 = vrot.slane %v3601_v60, 1  ;;  %v3642_v26 = vmul.f32 %v3605_v61, %v3517_v33  ;;  %v885_v34 = vmul.f32 %v3623_v16, %v3432_v1 }
 0x177   : > { %517 = vst.msk [vmem:[#allocation4 + $0xd] sm:$0x1] %vm399_vm4, %v515_v44  ;;  %539 = vst.msk [vmem:[#allocation4 + $0xe] sm:$0x1] %vm399_vm4, %v537_v45  ;;  %v873_v47 = vsel %vm818_vm5, %v871_v41, %v5876_v42  ;;  %v913_v57 = vsel %vm818_vm5, %v911_v51, %v5875_v49  ;;  %v991_v4 = vrot.slane %v985_v62, 1  ;;  %v3662_v35 = vstv %s3581_s28  ;;  %s4306_s28 = sld [smem:[#allocation9 + $0x1b]] }
 0x178   : > { %876 = vrot.lane.b32.xlu0 %v873_v47, %s5979_s27  ;;  %v953_v22 = vsel %vm818_vm5, %v951_v5, %v5871_v59  ;;  %5983 = vst [vmem:[#allocation28_spill] sm:$0xff] %v3662_v35  ;;  %v925_v37 = vmul.f32 %v3626_v18, %v3432_v1  ;;  %v3668_v41 = vmul.f32 %v3629_v20, %v3432_v1  ;;  %v3674_v44 = vstv %s3588_s6  ;;  %s2795_s6 = sld [smem:[#allocation9 + $0x23]] }
 0x179   : > { %701 = vrot.lane.b32.xlu1 %v696_v48, %s5980_s12  ;;  %5985 = vst [vmem:[#allocation30_spill] sm:$0xff] %v3674_v44  ;;  %v993_v47 = vsel %vm818_vm5, %v991_v4, %v5870_v25  ;;  %v774_v48 = vmul.f32 %v772_v8, %v3517_v33  ;;  %v5869_v51 = vrot.slane %v3642_v26, 1  ;;  %v3687_v52 = vmul.f32 %v3608_v2, %v3517_v33 }
 0x17a   : > { %v559_v53 = vpop.permute.xlu1 %558  ;;  %v581_v54 = vpop.permute.xlu0 %580  ;;  %v1031_v8 = vrot.slane %v1025_v32, 1  ;;  %v891_v5 = vrot.slane %v885_v34, 1  ;;  %v3699_v62 = vmul.f32 %v3674_v44, %v3432_v1  ;;  %v800_v4 = vmul.f32 %v798_v12, %v3517_v33 }
 0x17b   : > { %561 = vst.msk [vmem:[#allocation4 + $0xf] sm:$0x1] %vm399_vm4, %v559_v53  ;;  %583 = vst.msk [vmem:[#allocation4 + $0x10] sm:$0x1] %vm399_vm4, %v581_v54  ;;  %v851_v53 = vrot.slane %v845_v29, 1  ;;  %v812_v54 = vmul.f32 %v3654_v30, %v3432_v1  ;;  %v5874_v32 = vrot.slane %v3687_v52, 1 }
 0x17c   : > { %916 = vrot.lane.b32.xlu0 %v913_v57, %s5980_s12  ;;  %v1005_v57 = vmul.f32 %v3662_v35, %v3432_v1  ;;  %v1033_v29 = vsel %vm818_vm5, %v1031_v8, %v5869_v51 }
 0x17d   : > { %727 = vrot.lane.b32.xlu1 %v722_v58, %s5981_s13  ;;  %v1065_v58 = vmul.f32 %v3608_v2, %v3414_v56 }
 0x17e   : > { %v603_v10 = vpop.permute.xlu1 %602  ;;  %v625_v11 = vpop.permute.xlu0 %624 }
 0x17f   : > { %605 = vst.msk [vmem:[#allocation4 + $0x11] sm:$0x1] %vm399_vm4, %v603_v10  ;;  %627 = vst.msk [vmem:[#allocation4 + $0x12] sm:$0x1] %vm399_vm4, %v625_v11  ;;  %v3703_v10 = vmul.f32 %v3614_v6, %v3517_v33  ;;  %v1071_v8 = vrot.slane %v1065_v58, 1 }
 0x180   : > { %956 = vrot.lane.b32.xlu0 %v953_v22, %s5981_s13  ;;  %v931_v22 = vrot.slane %v925_v37, 1  ;;  %v1138_v37 = vmul.f32 %v3614_v6, %v3414_v56 }
 0x181   : > { %753 = vrot.lane.b32.xlu1 %v748_v24, %s5976_s7  ;;  %v971_v24 = vrot.slane %v3668_v41, 1  ;;  %v1073_v58 = vsel %vm818_vm5, %v1071_v8, %v5874_v32 }
 0x182   : > { %v3676_v45 = vld [vmem:[#allocation4 + $0x8] sm:$0xff]  ;;  %v1144_v59 = vrot.slane %v1138_v37, 2 }
 0x183   : > { %v3707_v11 = vmul.f32 %v3617_v7, %v3676_v45  ;;  %v3719_v34 = vmul.f32 %v3623_v16, %v3676_v45  ;;  %v3729_v0 = vmul.f32 %v3626_v18, %v3676_v45  ;;  %v3764_v8 = vmul.f32 %v3654_v30, %v3676_v45 }
 0x184   : > { %996 = vrot.lane.b32.xlu0 %v993_v47, %s5976_s7  ;;  %v819_v47 = vrot.slane %v812_v54, 1  ;;  %v3738_v54 = vmul.f32 %v3620_v14, %v3517_v33 }
 0x185   : > { %779 = vrot.lane.b32.xlu1 %v774_v48, %s5977_s15  ;;  %v5873_v41 = vrot.slane %v3707_v11, 1  ;;  %v1011_v48 = vrot.slane %v1005_v57, 1  ;;  %v5872_v12 = vrot.slane %v3719_v34, 1  ;;  %5986 = vst [vmem:[#allocation31_spill] sm:$0xff] %v3729_v0  ;;  %v5877_v25 = vrot.slane %v3729_v0, 1  ;;  %5988 = vst [vmem:[#allocation33_spill] sm:$0xff] %v3764_v8 }
 0x187   : > { %v3743_v57 = vsel %vm818_vm5, %v851_v53, %v5873_v41  ;;  %v3754_v51 = vsel %vm818_vm5, %v891_v5, %v5872_v12  ;;  %v3760_v53 = vmul.f32 %v3629_v20, %v3676_v45  ;;  %v3773_v5 = vmul.f32 %v3646_v27, %v3517_v33 }
 0x188   : > { %1036 = vrot.lane.b32.xlu0 %v1033_v29, %s5977_s15  ;;  %v5879_v29 = vrot.slane %v3703_v10, 2  ;;  %v3778_v37 = vsel %vm818_vm5, %v931_v22, %v5877_v25  ;;  %v3782_v12 = vmul.f32 %v3662_v35, %v3676_v45  ;;  %v5887_v41 = vrot.slane %v3738_v54, 2 }
 0x189   : > { %805 = vrot.lane.b32.xlu1 %v800_v4, %s5978_s0  ;;  %v657_v4 = vmul.f32 %v655_v13, %v3676_v45  ;;  %5987 = vst [vmem:[#allocation32_spill] sm:$0xff] %v3760_v53  ;;  %v3768_v13 = vmul.f32 %v3671_v43, %v3517_v33  ;;  %v5885_v32 = vrot.slane %v3760_v53, 1  ;;  %v3797_v25 = vmul.f32 %v3674_v44, %v3676_v45 }
 0x18a   : > { %5990 = vst [vmem:[#allocation35_spill] sm:$0xff] %v3782_v12  ;;  %v1146_v42 = vsel %vm1091_vm6, %v1144_v59, %v5879_v29  ;;  %v5884_v22 = vrot.slane %v3782_v12, 1  ;;  %v1051_v29 = vrot.slane %v3699_v62, 1  ;;  %v709_v62 = vmul.f32 %v707_v17, %v3676_v45 }
 0x18b   : > { %5989 = vst [vmem:[#allocation34_spill] sm:$0xff] %v3768_v13  ;;  %v5881_v49 = vrot.slane %v3768_v13, 1  ;;  %5991 = vst [vmem:[#allocation36_spill] sm:$0xff] %v3797_v25  ;;  %v3803_v23 = vsel %vm818_vm5, %v971_v24, %v5885_v32  ;;  %v5992_v32 = vstv %s3483_s24  ;;  %v787_v13 = vmul.f32 %v5993_v38, %v3676_v45  ;;  %s2777_s24 = sld [smem:[#allocation9 + $0x11]] }
 0x18c   : > { %1076 = vrot.lane.b32.xlu0 %v1073_v58, %s5978_s0  ;;  %v835_v58 = vrot.slane %v829_v3, 1  ;;  %v683_v3 = vmul.f32 %v681_v15, %v3676_v45  ;;  %v3822_v24 = vsel %vm818_vm5, %v1011_v48, %v5884_v22  ;;  %v3864_v22 = vstv %s2829_s9  ;;  %s2838_s9 = sld [smem:[#allocation9 + $0x4e]] }
 0x18d   : > { %662 = vrot.lane.b32.xlu1 %v657_v4, %s5979_s27  ;;  %v5882_v4 = vrot.slane %v3764_v8, 1 }
 0x18e   : > { %v3813_v15 = vsel %vm818_vm5, %v835_v58, %v5881_v49  ;;  %v3827_v58 = vmul.f32 %v3649_v28, %v3517_v33  ;;  %v1224_v49 = vrot.slane %v1218_v21, 2  ;;  %v3859_v21 = vld [vmem:[#allocation4 + $0x28] sm:$0x3f] }
 0x18f   : > { %v3808_v59 = vsel %vm818_vm5, %v819_v47, %v5882_v4  ;;  %v5883_v47 = vrot.slane %v3797_v25, 1  ;;  %v1258_v4 = vmul.f32 %v3649_v28, %v3414_v56  ;;  %v907_v8 = vmul.f32 %v3519_v36, %v3859_v21 }
 0x190   : > { %1149 = vrot.lane.b32.xlu0 %v1146_v42, %s5979_s27  ;;  %v1184_v42 = vrot.slane %v1178_v63, 2  ;;  %v947_v25 = vmul.f32 %v3552_v46, %v3859_v21  ;;  %v987_v12 = vmul.f32 %v3584_v55, %v3859_v21 }
 0x191   : > { %688 = vrot.lane.b32.xlu1 %v683_v3, %s5980_s12  ;;  %v5886_v3 = vrot.slane %v3773_v5, 2  ;;  %v3839_v48 = vsel %vm818_vm5, %v1051_v29, %v5883_v47  ;;  %v735_v29 = vmul.f32 %v733_v19, %v3676_v45  ;;  %v5888_v47 = vrot.slane %v3827_v58, 2 }
 0x192   : > { %v1186_v63 = vsel %vm1091_vm6, %v1184_v42, %v5887_v41  ;;  %v3845_v42 = vstv %s2828_s2  ;;  %v914_v30 = vrot.slane %v907_v8, 1  ;;  %s2789_s2 = sld [smem:[#allocation9 + $0x1d]] }
 0x193   : > { %v1226_v17 = vsel %vm1091_vm6, %v1224_v49, %v5886_v3  ;;  %v1298_v49 = vmul.f32 %v3845_v42, %v3414_v56  ;;  %v761_v3 = vmul.f32 %v5992_v32, %v3676_v45 }
 0x194   : > { %1189 = vrot.lane.b32.xlu0 %v1186_v63, %s5980_s12  ;;  %v3856_v63 = vmul.f32 %v3845_v42, %v3517_v33 }
 0x195   : > { %714 = vrot.lane.b32.xlu1 %v709_v62, %s5981_s13  ;;  %v1264_v62 = vrot.slane %v1258_v4, 2  ;;  %v867_v4 = vmul.f32 %v3511_v31, %v3859_v21  ;;  %v1304_v41 = vrot.slane %v1298_v49, 2 }
 0x197   : > { %v1266_v19 = vsel %vm1091_vm6, %v1264_v62, %v5888_v47  ;;  %v1338_v62 = vmul.f32 %v3864_v22, %v3414_v56  ;;  %v3883_v47 = vstv %s2831_s10  ;;  %v874_v49 = vrot.slane %v867_v4, 1  ;;  %s2790_s10 = sld [smem:[#allocation9 + $0x1e]] }
 0x198   : > { %1229 = vrot.lane.b32.xlu0 %v1226_v17, %s5981_s13  ;;  %v5893_v17 = vrot.slane %v3856_v63, 2  ;;  %v3894_v31 = vmul.f32 %v3883_v47, %v3517_v33  ;;  %v1411_v38 = vmul.f32 %v3883_v47, %v3414_v56 }
 0x199   : > { %740 = vrot.lane.b32.xlu1 %v735_v29, %s5976_s7  ;;  %v3875_v29 = vmul.f32 %v3864_v22, %v3517_v33 }
 0x19a   : > { %v1306_v32 = vsel %vm1091_vm6, %v1304_v41, %v5893_v17  ;;  %v1344_v41 = vrot.slane %v1338_v62, 2  ;;  %v3904_v17 = vstv %s2832_s11  ;;  %s2839_s11 = sld [smem:[#allocation9 + $0x4f]] }
 0x19b   : > { %v3912_v4 = vmul.f32 %v3904_v17, %v3517_v33 }
 0x19c   : > { %1269 = vrot.lane.b32.xlu0 %v1266_v19, %s5976_s7  ;;  %v5897_v19 = vrot.slane %v3875_v29, 2 }
 0x19d   : > { %766 = vrot.lane.b32.xlu1 %v761_v3, %s5977_s15 }
 0x19e   : > { %v1346_v43 = vsel %vm1091_vm6, %v1344_v41, %v5897_v19  ;;  %v1417_v41 = vrot.slane %v1411_v38, 3  ;;  %v1451_v19 = vmul.f32 %v3904_v17, %v3414_v56  ;;  %v5996_v38 = vrot.slane %v3534_v40, 1 }
 0x19f   : > { %v3967_v40 = vstv %s2835_s3  ;;  %s2792_s3 = sld [smem:[#allocation9 + $0x20]] }
 0x1a0   : > { %1309 = vrot.lane.b32.xlu0 %v1306_v32, %s5977_s15  ;;  %v3897_v3 = vpop.permute.xlu0 %673  ;;  %v3925_v32 = vstv %s2833_s14  ;;  %s2791_s14 = sld [smem:[#allocation9 + $0x1f]] }
 0x1a1   : > { %792 = vrot.lane.b32.xlu1 %v787_v13, %s5978_s0  ;;  %v5994_v13 = vrot.slane %v3530_v39, 1  ;;  %v3933_v8 = vmul.f32 %v3925_v32, %v3517_v33 }
 0x1a3   : > { %v875_v62 = vsel %vm818_vm5, %v5994_v13, %v874_v49  ;;  %v915_v13 = vsel %vm818_vm5, %v5996_v38, %v914_v30  ;;  %v3946_v49 = vstv %s2834_s20  ;;  %v5998_v30 = vrot.slane %v3569_v50, 1  ;;  %s2840_s20 = sld [smem:[#allocation9 + $0x50]] }
 0x1a4   : > { %1349 = vrot.lane.b32.xlu0 %v1346_v43, %s5978_s0  ;;  %v3915_v36 = vpop.permute.xlu0 %699  ;;  %v5995_v43 = vrot.slane %v3894_v31, 3  ;;  %v994_v38 = vrot.slane %v987_v12, 1  ;;  %v3975_v12 = vmul.f32 %v3967_v40, %v3517_v33  ;;  %v3988_v50 = vstv %s2836_s5  ;;  %s2841_s5 = sld [smem:[#allocation9 + $0x51]] }
 0x1a5   : > { %878 = vrot.lane.b32.xlu1 %v875_v62, %s5979_s27  ;;  %v954_v62 = vrot.slane %v947_v25, 1  ;;  %v3954_v25 = vmul.f32 %v3946_v49, %v3517_v33 }
 0x1a6   : > { %v1419_v39 = vsel %vm1364_vm7, %v1417_v41, %v5995_v43  ;;  %v1457_v41 = vrot.slane %v1451_v19, 3  ;;  %v1491_v43 = vmul.f32 %v3925_v32, %v3414_v56 }
 0x1a7   : > { %v955_v19 = vsel %vm818_vm5, %v5998_v30, %v954_v62  ;;  %v6000_v62 = vrot.slane %v3601_v60, 1  ;;  %v1578_v60 = vrot.slane %v3975_v12, 3 }
 0x1a8   : > { %1422 = vrot.lane.b32.xlu0 %v1419_v39, %s5979_s27  ;;  %v3936_v46 = vpop.permute.xlu0 %725  ;;  %v5997_v39 = vrot.slane %v3912_v4, 3 }
 0x1a9   : > { %918 = vrot.lane.b32.xlu1 %v915_v13, %s5980_s12  ;;  %v1027_v13 = vmul.f32 %v3605_v61, %v3859_v21 }
 0x1aa   : > { %v1459_v44 = vsel %vm1364_vm7, %v1457_v41, %v5997_v39  ;;  %v1497_v41 = vrot.slane %v1491_v43, 3  ;;  %v1531_v39 = vmul.f32 %v3946_v49, %v3414_v56  ;;  %v995_v43 = vsel %vm818_vm5, %v6000_v62, %v994_v38 }
 0x1ab   : > { %v1034_v30 = vrot.slane %v1027_v13, 1  ;;  %v3996_v38 = vmul.f32 %v3988_v50, %v3517_v33  ;;  %v6002_v13 = vrot.slane %v3642_v26, 1 }
 0x1ac   : > { %1462 = vrot.lane.b32.xlu0 %v1459_v44, %s5980_s12  ;;  %v3957_v55 = vpop.permute.xlu0 %751  ;;  %v5999_v44 = vrot.slane %v3933_v8, 3 }
 0x1ad   : > { %958 = vrot.lane.b32.xlu1 %v955_v19, %s5981_s13  ;;  %v1067_v19 = vmul.f32 %v3608_v2, %v3859_v21 }
 0x1ae   : > { %v1499_v53 = vsel %vm1364_vm7, %v1497_v41, %v5999_v44  ;;  %v1537_v41 = vrot.slane %v1531_v39, 3  ;;  %v1571_v44 = vmul.f32 %v3967_v40, %v3414_v56  ;;  %v1035_v39 = vsel %vm818_vm5, %v6002_v13, %v1034_v30 }
 0x1af   : > { %v1074_v62 = vrot.slane %v1067_v19, 1  ;;  %v6003_v30 = vrot.slane %v3687_v52, 1 }
 0x1b0   : > { %1502 = vrot.lane.b32.xlu0 %v1499_v53, %s5981_s13  ;;  %v3978_v61 = vpop.permute.xlu0 %777  ;;  %v6001_v53 = vrot.slane %v3954_v25, 3 }
 0x1b1   : > { %998 = vrot.lane.b32.xlu1 %v995_v43, %s5976_s7  ;;  %v1140_v43 = vmul.f32 %v3614_v6, %v3859_v21  ;;  %v1075_v19 = vsel %vm818_vm5, %v6003_v30, %v1074_v62  ;;  %v6004_v62 = vrot.slane %v3703_v10, 2 }
 0x1b2   : > { %v1539_v35 = vsel %vm1364_vm7, %v1537_v41, %v6001_v53  ;;  %v1577_v41 = vrot.slane %v1571_v44, 3  ;;  %v1611_v53 = vmul.f32 %v3988_v50, %v3414_v56  ;;  %v1180_v44 = vmul.f32 %v3620_v14, %v3859_v21 }
 0x1b3   : > { %v1147_v6 = vrot.slane %v1140_v43, 2 }
 0x1b4   : > { %1542 = vrot.lane.b32.xlu0 %v1539_v35, %s5976_s7  ;;  %v804_v2 = vpop.permute.xlu0 %803  ;;  %v1579_v0 = vsel %vm1364_vm7, %v1577_v41, %v1578_v60  ;;  %v1618_v35 = vrot.slane %v3996_v38, 3  ;;  %v1187_v30 = vrot.slane %v1180_v44, 2  ;;  %v4221_v38 = vstv %s4164_s8  ;;  %s4767_s8 = sld [smem:[#allocation9 + $0x3f]] }
 0x1b5   : > { %1038 = vrot.lane.b32.xlu1 %v1035_v39, %s5977_s15  ;;  %v1617_v39 = vrot.slane %v1611_v53, 3  ;;  %v1148_v43 = vsel %vm1091_vm6, %v6004_v62, %v1147_v6  ;;  %v1260_v6 = vmul.f32 %v3649_v28, %v3859_v21 }
 0x1b8   : > { %1582 = vrot.lane.b32.xlu0 %v1579_v0, %s5977_s15  ;;  %v661_v26 = vpop.permute.xlu0 %660  ;;  %v1619_v0 = vsel %vm1364_vm7, %v1617_v39, %v1618_v35  ;;  %v1300_v39 = vmul.f32 %v3845_v42, %v3859_v21 }
 0x1b9   : > { %v666_v13 = vadd.f32 %v661_v26, %v3455_v9  ;;  %1078 = vrot.lane.b32.xlu1 %v1075_v19, %s5978_s0  ;;  %v1220_v9 = vmul.f32 %v3646_v27, %v3859_v21  ;;  %v6005_v26 = vrot.slane %v3738_v54, 2  ;;  %v1267_v54 = vrot.slane %v1260_v6, 2 }
 0x1ba   : > { %v1493_v6 = vmul.f32 %v3925_v32, %v3859_v21  ;;  %v6011_v32 = vrot.slane %v3912_v4, 3 }
 0x1bb   : > { %v679_v41 = vadd.f32 %v3897_v3, %v666_v13  ;;  %v1188_v19 = vsel %vm1091_vm6, %v6005_v26, %v1187_v30  ;;  %v1227_v10 = vrot.slane %v1220_v9, 2  ;;  %v1413_v30 = vmul.f32 %v3883_v47, %v3859_v21 }
 0x1bc   : > { %1622 = vrot.lane.b32.xlu0 %v1619_v0, %s5978_s0  ;;  %v687_v52 = vpop.permute.xlu0 %686  ;;  %v1307_v0 = vrot.slane %v1300_v39, 2  ;;  %v1453_v47 = vmul.f32 %v3904_v17, %v3859_v21  ;;  %v4083_v26 = vstv %s2776_s17  ;;  %s2842_s17 = sld [smem:[#allocation9 + $0x52]] }
 0x1bd   : > { %v692_v14 = vadd.f32 %v687_v52, %v679_v41  ;;  %1151 = vrot.lane.b32.xlu1 %v1148_v43, %s5979_s27  ;;  %v1340_v52 = vmul.f32 %v3864_v22, %v3859_v21  ;;  %v4066_v22 = vstv %s2775_s21  ;;  %s2793_s21 = sld [smem:[#allocation9 + $0x21]] }
 0x1bf   : > { %v705_v3 = vadd.f32 %v3915_v36, %v692_v14  ;;  %v1347_v43 = vrot.slane %v1340_v52, 2  ;;  %v1573_v52 = vmul.f32 %v3967_v40, %v3859_v21 }
 0x1c0   : > { %856 = vrot.lane.b32.xlu0 %v3743_v57, %s5979_s27  ;;  %v713_v53 = vpop.permute.xlu0 %712  ;;  %v6006_v57 = vrot.slane %v3773_v5, 2 }
 0x1c1   : > { %v718_v44 = vadd.f32 %v713_v53, %v705_v3  ;;  %1191 = vrot.lane.b32.xlu1 %v1188_v19, %s5980_s12  ;;  %v1420_v3 = vrot.slane %v1413_v30, 3  ;;  %v4091_v19 = vmul.f32 %v4083_v26, %v3676_v45 }
 0x1c2   : > { %v1228_v13 = vsel %vm1091_vm6, %v6006_v57, %v1227_v10  ;;  %v1460_v10 = vrot.slane %v1453_v47, 3 }
 0x1c3   : > { %v731_v27 = vadd.f32 %v3936_v46, %v718_v44  ;;  %v1158_v44 = vmul.f32 %v4083_v26, %v3432_v1 }
 0x1c4   : > { %896 = vrot.lane.b32.xlu0 %v3754_v51, %s5980_s12  ;;  %v739_v36 = vpop.permute.xlu0 %738  ;;  %v6007_v51 = vrot.slane %v3827_v58, 2  ;;  %v1461_v57 = vsel %vm1364_vm7, %v6011_v32, %v1460_v10  ;;  %v4187_v10 = vstv %s2782_s23  ;;  %s4690_s23 = sld [smem:[#allocation9 + $0x25]] }
 0x1c5   : > { %v744_v41 = vadd.f32 %v739_v36, %v731_v27  ;;  %1231 = vrot.lane.b32.xlu1 %v1228_v13, %s5981_s13  ;;  %v4103_v27 = vstv %s2777_s24  ;;  %v1500_v13 = vrot.slane %v1493_v6, 3  ;;  %v1164_v39 = vrot.slane %v1158_v44, 2  ;;  %s2794_s24 = sld [smem:[#allocation9 + $0x22]] }
 0x1c6   : > { %v1268_v5 = vsel %vm1091_vm6, %v6007_v51, %v1267_v54  ;;  %v4111_v36 = vmul.f32 %v4103_v27, %v3676_v45  ;;  %v1533_v54 = vmul.f32 %v3946_v49, %v3859_v21  ;;  %v6012_v49 = vrot.slane %v3933_v8, 3 }
 0x1c7   : > { %v757_v28 = vadd.f32 %v3957_v55, %v744_v41  ;;  %v1198_v41 = vmul.f32 %v4103_v27, %v3432_v1  ;;  %v4189_v6 = vstv %s2783_s29  ;;  %v4203_v32 = vmul.f32 %v4187_v10, %v3676_v45  ;;  %s4716_s29 = sld [smem:[#allocation9 + $0x56]] }
 0x1c8   : > { %936 = vrot.lane.b32.xlu0 %v3778_v37, %s5981_s13  ;;  %v765_v46 = vpop.permute.xlu0 %764  ;;  %v6008_v37 = vrot.slane %v3856_v63, 2  ;;  %v5912_v4 = vrot.slane %v4111_v36, 2 }
 0x1c9   : > { %v770_v62 = vadd.f32 %v765_v46, %v757_v28  ;;  %1271 = vrot.lane.b32.xlu1 %v1268_v5, %s5976_s7  ;;  %v4122_v28 = vstv %s2778_s16  ;;  %v1501_v5 = vsel %vm1364_vm7, %v6012_v49, %v1500_v13  ;;  %v1431_v49 = vmul.f32 %v4189_v6, %v3432_v1  ;;  %s6066_s16 = sld [smem:[#allocation26_spill]] }
 0x1ca   : > { %v1308_v58 = vsel %vm1091_vm6, %v6008_v37, %v1307_v0  ;;  %v4130_v51 = vmul.f32 %v4122_v28, %v3676_v45  ;;  %v1540_v0 = vrot.slane %v1533_v54, 3 }
 0x1cb   : > { %v783_v42 = vadd.f32 %v3978_v61, %v770_v62  ;;  %v4070_v61 = vmul.f32 %v4066_v22, %v3676_v45  ;;  %v1204_v62 = vrot.slane %v1198_v41, 2 }
 0x1cc   : > { %976 = vrot.lane.b32.xlu0 %v3803_v23, %s5976_s7  ;;  %v791_v55 = vpop.permute.xlu0 %790  ;;  %v6009_v23 = vrot.slane %v3875_v29, 2  ;;  %v5910_v37 = vrot.slane %v4130_v51, 2 }
 0x1cd   : > { %v796_v9 = vadd.f32 %v791_v55, %v783_v42  ;;  %1311 = vrot.lane.b32.xlu1 %v1308_v58, %s5977_s15  ;;  %v5914_v29 = vrot.slane %v4070_v61, 2  ;;  %v1238_v42 = vmul.f32 %v4122_v28, %v3432_v1  ;;  %v4141_v55 = vstv %s2779_s18  ;;  %v4151_v58 = vld [vmem:[#allocation4 + $0x10] sm:$0x3f]  ;;  %s4610_s18 = sld [smem:[#allocation9 + $0x53]] }
 0x1ce   : > { %v1348_v63 = vsel %vm1091_vm6, %v6009_v23, %v1347_v43  ;;  %v1206_v8 = vsel %vm1091_vm6, %v1204_v62, %v5912_v4  ;;  %v4149_v40 = vmul.f32 %v4141_v55, %v3676_v45  ;;  %v6013_v43 = vrot.slane %v3954_v25, 3 }
 0x1cf   : > { %v809_v14 = vadd.f32 %v804_v2, %v796_v9  ;;  %v1118_v2 = vmul.f32 %v4066_v22, %v3432_v1  ;;  %v1580_v9 = vrot.slane %v1573_v52, 3  ;;  %v1244_v23 = vrot.slane %v1238_v42, 2 }
 0x1d0   : > { %1016 = vrot.lane.b32.xlu0 %v3822_v24, %s5977_s15  ;;  %v1541_v30 = vsel %vm1364_vm7, %v6013_v43, %v1540_v0  ;;  %v5908_v47 = vrot.slane %v4149_v40, 2  ;;  %v887_v13 = vmul.f32 %v3623_v16, %v4151_v58  ;;  %v6017_v52 = vrot.slane %v3707_v11, 1 }
 0x1d1   : > { %v826_v53 = vadd.f32 %v3808_v59, %v809_v14  ;;  %1351 = vrot.lane.b32.xlu1 %v1348_v63, %s5978_s0  ;;  %v6010_v59 = vrot.slane %v3894_v31, 3  ;;  %v5913_v31 = vrot.slane %v4091_v19, 2  ;;  %v1613_v14 = vmul.f32 %v3988_v50, %v3859_v21 }
 0x1d2   : > { %v1278_v63 = vmul.f32 %v4141_v55, %v3432_v1  ;;  %v1246_v25 = vsel %vm1091_vm6, %v1244_v23, %v5910_v37  ;;  %v847_v50 = vmul.f32 %v3617_v7, %v4151_v58  ;;  %v4191_v7 = vstv %s2795_s6  ;;  %s4743_s6 = sld [smem:[#allocation9 + $0xe]] }
 0x1d3   : > { %v4086_v24 = vadd.f32 %v3813_v15, %v826_v53  ;;  %v1421_v17 = vsel %vm1364_vm7, %v6010_v59, %v1420_v3  ;;  %v1124_v15 = vrot.slane %v1118_v2, 2  ;;  %v1166_v46 = vsel %vm1091_vm6, %v1164_v39, %v5913_v31  ;;  %6014 = vst [vmem:[#allocation37_spill] sm:$0xff] %v4191_v7 }
 0x1d4   : > { %1056 = vrot.lane.b32.xlu0 %v3839_v48, %s5978_s0  ;;  %v4162_v3 = vstv %s2780_s22  ;;  %v1581_v53 = vsel %vm1364_vm7, %v1578_v60, %v1580_v9  ;;  %v1620_v2 = vrot.slane %v1613_v14, 3  ;;  %v1284_v59 = vrot.slane %v1278_v63, 2  ;;  %s2845_s22 = sld [smem:[#allocation9 + $0x55]] }
 0x1d5   : > { %1424 = vrot.lane.b32.xlu1 %v1421_v17, %s5979_s27  ;;  %v1126_v48 = vsel %vm1091_vm6, %v1124_v15, %v5914_v29  ;;  %v4174_v21 = vmul.f32 %v4162_v3, %v3676_v45  ;;  %v1318_v17 = vmul.f32 %v4162_v3, %v3432_v1  ;;  %v4193_v15 = vstv %s2844_s4  ;;  %s4745_s4 = sld [smem:[#allocation9 + $0x26]] }
 0x1d6   : > { %6015 = vst [vmem:[#allocation38_spill] sm:$0xff] %v4193_v15  ;;  %v1286_v60 = vsel %vm1091_vm6, %v1284_v59, %v5908_v47  ;;  %v1391_v39 = vmul.f32 %v4187_v10, %v3432_v1  ;;  %v1903_v41 = vmul.f32 %v4191_v7, %v3432_v1  ;;  %v1920_v16 = vmul.f32 %v4193_v15, %v3414_v56 }
 0x1d7   : > { %v5907_v44 = vrot.slane %v4174_v21, 2  ;;  %v1324_v54 = vrot.slane %v1318_v17, 2  ;;  %v5906_v42 = vrot.slane %v4203_v32, 3  ;;  %v894_v56 = vrot.slane %v887_v13, 1 }
 0x1d8   : > { %1129 = vrot.lane.b32.xlu0 %v1126_v48, %s5979_s27  ;;  %v854_v48 = vrot.slane %v847_v50, 1  ;;  %v927_v43 = vmul.f32 %v3626_v18, %v4151_v58  ;;  %v4252_v11 = vmul.f32 %v4193_v15, %v3517_v33  ;;  %v1397_v9 = vrot.slane %v1391_v39, 3 }
 0x1d9   : > { %1464 = vrot.lane.b32.xlu1 %v1461_v57, %s5980_s12  ;;  %v1621_v57 = vsel %vm1364_vm7, %v1618_v35, %v1620_v2  ;;  %v4228_v35 = vstv %s4166_s25  ;;  %v1326_v0 = vsel %vm1091_vm6, %v1324_v54, %v5907_v44  ;;  %v1910_v14 = vrot.slane %v1903_v41, 5  ;;  %v4293_v41 = vld [vmem:[#allocation4] sm:$0xff]  ;;  %s4773_s25 = sld [smem:[#allocation9 + $0x57]] }
 0x1da   : > { %6016 = vst [vmem:[#allocation39_spill] sm:$0xff] %v4228_v35  ;;  %v855_v62 = vsel %vm818_vm5, %v6017_v52, %v854_v48  ;;  %6019 = vst [vmem:[#allocation41_spill] sm:$0xff] %v4252_v11  ;;  %v4256_v23 = vstv %s4185_s19  ;;  %v5903_v50 = vrot.slane %v4252_v11, 5  ;;  %v1399_v59 = vsel %vm1364_vm7, %v1397_v9, %v5906_v42  ;;  %s4795_s19 = sld [smem:[#allocation9 + $0x27]] }
 0x1db   : > { %6020 = vst [vmem:[#allocation42_spill] sm:$0xff] %v4256_v23  ;;  %v967_v48 = vmul.f32 %v3629_v20, %v4151_v58  ;;  %v934_v13 = vrot.slane %v927_v43, 1  ;;  %v1437_v20 = vrot.slane %v1431_v49, 3  ;;  %v4310_v49 = vmul.f32 %v4228_v35, %v3676_v45 }
 0x1dc   : > { %1169 = vrot.lane.b32.xlu0 %v1166_v46, %s5980_s12  ;;  %v4445_v11 = vstv %s2790_s10  ;;  %s4932_s10 = sld [smem:[#allocation9 + $0x29]] }
 0x1dd   : > { %1504 = vrot.lane.b32.xlu1 %v1501_v5, %s5981_s13  ;;  %6024 = vst [vmem:[#allocation45_spill] sm:$0xff] %v4310_v49 }
 0x1e0   : > { %1209 = vrot.lane.b32.xlu0 %v1206_v8, %s5981_s13  ;;  %v4241_v8 = vmul.f32 %v4189_v6, %v3676_v45 }
 0x1e1   : > { %1544 = vrot.lane.b32.xlu1 %v1541_v30, %s5976_s7  ;;  %v4248_v30 = vmul.f32 %v4191_v7, %v3676_v45  ;;  %v1280_v7 = vmul.f32 %v4141_v55, %v4151_v58 }
 0x1e2   : > { %v5905_v17 = vrot.slane %v4241_v8, 3 }
 0x1e3   : > { %6018 = vst [vmem:[#allocation40_spill] sm:$0xff] %v4248_v30  ;;  %v5904_v18 = vrot.slane %v4248_v30, 5  ;;  %v1240_v30 = vmul.f32 %v4122_v28, %v4151_v58 }
 0x1e4   : > { %1249 = vrot.lane.b32.xlu0 %v1246_v25, %s5976_s7  ;;  %v1926_v25 = vrot.slane %v1920_v16, 5  ;;  %v4297_v16 = vld [vmem:[#allocation4 + $0x18] sm:$0xff]  ;;  %v1439_v9 = vsel %vm1364_vm7, %v1437_v20, %v5905_v17  ;;  %v5909_v17 = vrot.slane %v4310_v49, 6 }
 0x1e5   : > { %1584 = vrot.lane.b32.xlu1 %v1581_v53, %s5977_s15  ;;  %v2176_v53 = vmul.f32 %v4228_v35, %v3432_v1  ;;  %v6021_v1 = vrot.slane %v3719_v34, 1  ;;  %v4285_v54 = vsel %vm1909_vm8, %v1910_v14, %v5904_v18  ;;  %v1471_v34 = vmul.f32 %v4293_v41, %v4221_v38  ;;  %v6028_v18 = vld [vmem:[#allocation28_spill] sm:$0xff] }
 0x1e6   : > { %6022 = vst [vmem:[#allocation43_spill] sm:$0xff] %v4285_v54  ;;  %v4290_v39 = vsel %vm1909_vm8, %v1926_v25, %v5903_v50  ;;  %v974_v50 = vrot.slane %v967_v48, 1  ;;  %v1007_v20 = vmul.f32 %v6028_v18, %v4151_v58  ;;  %v1320_v54 = vmul.f32 %v4162_v3, %v4151_v58 }
 0x1e7   : > { %v4195_v12 = vpop.permute.xlu1 %675  ;;  %6023 = vst [vmem:[#allocation44_spill] sm:$0xff] %v4290_v39  ;;  %v1477_v42 = vrot.slane %v1471_v34, 3 }
 0x1e8   : > { %1289 = vrot.lane.b32.xlu0 %v1286_v60, %s5977_s15  ;;  %v4274_v60 = vmul.f32 %v4221_v38, %v3676_v45  ;;  %v1014_v37 = vrot.slane %v1007_v20, 1  ;;  %v4397_v20 = vstv %s2789_s2  ;;  %s4902_s2 = sld [smem:[#allocation9 + $0x15]] }
 0x1e9   : > { %1624 = vrot.lane.b32.xlu1 %v1621_v57, %s5978_s0  ;;  %v895_v57 = vsel %vm818_vm5, %v6021_v1, %v894_v56  ;;  %v2183_v56 = vrot.slane %v2176_v53, 6  ;;  %v6026_v53 = vld [vmem:[#allocation31_spill] sm:$0xff] }
 0x1ea   : > { %v4216_v46 = vpop.permute.xlu0 %876  ;;  %v5911_v14 = vrot.slane %v4274_v60, 3  ;;  %v6027_v1 = vrot.slane %v6026_v53, 1  ;;  %v4340_v53 = vstv %s4260_s26  ;;  %s4870_s26 = sld [smem:[#allocation9 + $0x28]] }
 0x1eb   : > { %v4230_v5 = vpop.permute.xlu1 %701  ;;  %v4345_v18 = vsel %vm2182_vm9, %v2183_v56, %v5909_v17  ;;  %v6031_v56 = vld [vmem:[#allocation32_spill] sm:$0xff]  ;;  %v1551_v31 = vmul.f32 %v4293_v41, %v4340_v53 }
 0x1ec   : > { %1329 = vrot.lane.b32.xlu0 %v1326_v0, %s5978_s0  ;;  %v2193_v0 = vmul.f32 %v4297_v16, %v4256_v23  ;;  %6029 = vst [vmem:[#allocation31_spill] sm:$0xff] %v4345_v18  ;;  %v1200_v18 = vmul.f32 %v4103_v27, %v4151_v58  ;;  %v4455_v27 = vmul.f32 %v4445_v11, %v3676_v45 }
 0x1ed   : > { %858 = vrot.lane.b32.xlu1 %v855_v62, %s5979_s27  ;;  %v4304_v62 = vstv %s4223_s1  ;;  %s4837_s1 = sld [smem:[#allocation9 + $0x58]] }
 0x1ee   : > { %v4258_v63 = vpop.permute.xlu0 %916  ;;  %v4320_v25 = vmul.f32 %v4304_v62, %v3676_v45  ;;  %v1511_v44 = vmul.f32 %v4293_v41, %v4304_v62 }
 0x1ef   : > { %v4266_v2 = vpop.permute.xlu1 %727 }
 0x1f0   : > { %1402 = vrot.lane.b32.xlu0 %v1399_v59, %s5979_s27  ;;  %v4324_v59 = vmul.f32 %v4256_v23, %v3517_v33  ;;  %v2199_v33 = vrot.slane %v2193_v0, 6  ;;  %v5917_v34 = vrot.slane %v4320_v25, 3  ;;  %v4355_v0 = vmul.f32 %v4340_v53, %v3676_v45 }
 0x1f1   : > { %898 = vrot.lane.b32.xlu1 %v895_v57, %s5980_s12  ;;  %v935_v57 = vsel %vm818_vm5, %v6027_v1, %v934_v13  ;;  %v1479_v13 = vsel %vm1364_vm7, %v1477_v42, %v5911_v14  ;;  %v6033_v42 = vld [vmem:[#allocation30_spill] sm:$0xff]  ;;  %v1517_v4 = vrot.slane %v1511_v44, 3  ;;  %v6035_v44 = vld [vmem:[#allocation35_spill] sm:$0xff]  ;;  %v1160_v23 = vmul.f32 %v4083_v26, %v4151_v58 }
 0x1f2   : > { %v4301_v52 = vpop.permute.xlu0 %956  ;;  %6025 = vst [vmem:[#allocation46_spill] sm:$0xff] %v4324_v59  ;;  %v5915_v47 = vrot.slane %v4324_v59, 6  ;;  %v1047_v14 = vmul.f32 %v6033_v42, %v4151_v58  ;;  %v1557_v59 = vrot.slane %v1551_v31, 3  ;;  %v6038_v31 = vld [vmem:[#allocation36_spill] sm:$0xff]  ;;  %v4428_v26 = vld [vmem:[#allocation4 + $0x20] sm:$0xff] }
 0x1f3   : > { %v4312_v43 = vpop.permute.xlu1 %753 }
 0x1f4   : > { %1442 = vrot.lane.b32.xlu0 %v1439_v9, %s5980_s12  ;;  %v4360_v1 = vsel %vm2182_vm9, %v2199_v33, %v5915_v47  ;;  %v4374_v33 = vstv %s4306_s28  ;;  %v1054_v42 = vrot.slane %v1047_v14, 1  ;;  %v1120_v47 = vmul.f32 %v4066_v22, %v4151_v58  ;;  %s4889_s28 = sld [smem:[#allocation9 + $0x59]] }
 0x1f5   : > { %938 = vrot.lane.b32.xlu1 %v935_v57, %s5981_s13  ;;  %6030 = vst [vmem:[#allocation28_spill] sm:$0xff] %v4360_v1  ;;  %v6032_v57 = vrot.slane %v6031_v56, 1  ;;  %v6036_v56 = vrot.slane %v6035_v44, 1  ;;  %v6037_v44 = vrot.slane %v4355_v0, 3  ;;  %v4407_v22 = vmul.f32 %v4397_v20, %v3676_v45 }
 0x1f6   : > { %v4337_v9 = vpop.permute.xlu0 %996  ;;  %v1127_v49 = vrot.slane %v1120_v47, 2  ;;  %v4420_v14 = vstv %s2838_s9  ;;  %v1167_v1 = vrot.slane %v1160_v23, 2  ;;  %s4930_s9 = sld [smem:[#allocation9 + $0x46]] }
 0x1f7   : > { %v4347_v48 = vpop.permute.xlu1 %779  ;;  %v975_v17 = vsel %vm818_vm5, %v6032_v57, %v974_v50  ;;  %v1519_v50 = vsel %vm1364_vm7, %v1517_v4, %v5917_v34  ;;  %v1015_v57 = vsel %vm818_vm5, %v6036_v56, %v1014_v37  ;;  %v1591_v4 = vmul.f32 %v4293_v41, %v4374_v33 }
 0x1f8   : > { %1482 = vrot.lane.b32.xlu0 %v1479_v13, %s5981_s13  ;;  %v1559_v37 = vsel %vm1364_vm7, %v1557_v59, %v6037_v44  ;;  %v6039_v56 = vrot.slane %v6038_v31, 1  ;;  %v1663_v59 = vmul.f32 %v4293_v41, %v4397_v20 }
 0x1f9   : > { %978 = vrot.lane.b32.xlu1 %v975_v17, %s5976_s7  ;;  %v4384_v17 = vmul.f32 %v4374_v33, %v3676_v45  ;;  %v1597_v35 = vrot.slane %v1591_v4, 3  ;;  %v4432_v4 = vmul.f32 %v4428_v26, %v4420_v14 }
 0x1fa   : > { %v4371_v29 = vpop.permute.xlu0 %1036 }
 0x1fb   : > { %v4376_v13 = vpop.permute.xlu1 %805  ;;  %v6040_v31 = vrot.slane %v4384_v17, 3 }
 0x1fc   : > { %6034 = vst [vmem:[#allocation32_spill] sm:$0xff] %v4376_v13  ;;  %1522 = vrot.lane.b32.xlu0 %v1519_v50, %s5976_s7  ;;  %v1553_v13 = vmul.f32 %v4340_v53, %v4151_v58 }
 0x1fd   : > { %1018 = vrot.lane.b32.xlu1 %v1015_v57, %s5977_s15  ;;  %v1055_v57 = vsel %vm818_vm5, %v6039_v56, %v1054_v42  ;;  %v1599_v47 = vsel %vm1364_vm7, %v1597_v35, %v6040_v31  ;;  %v6041_v56 = vrot.slane %v4070_v61, 2  ;;  %v1669_v35 = vrot.slane %v1663_v59, 4 }
 0x1fe   : > { %v4395_v34 = vpop.permute.xlu0 %1076  ;;  %v1683_v31 = vmul.f32 %v4297_v16, %v4420_v14  ;;  %v6043_v61 = vrot.slane %v4407_v22, 4  ;;  %v6044_v59 = vrot.slane %v4091_v19, 2  ;;  %v6046_v19 = vrot.slane %v4432_v4, 4 }
 0x1ff   : > { %v4399_v50 = vpop.permute.xlu1 %662 }
 0x200   : > { %1562 = vrot.lane.b32.xlu0 %v1559_v37, %s5977_s15  ;;  %v1671_v23 = vsel %vm204_vm0, %v1669_v35, %v6043_v61  ;;  %v1689_v15 = vrot.slane %v1683_v31, 4  ;;  %v1703_v35 = vmul.f32 %v4293_v41, %v4445_v11  ;;  %v6047_v31 = vrot.slane %v4111_v36, 2 }
 0x201   : > { %1058 = vrot.lane.b32.xlu1 %v1055_v57, %s5978_s0  ;;  %v1128_v57 = vsel %vm1091_vm6, %v6041_v56, %v1127_v49  ;;  %v1168_v56 = vsel %vm1091_vm6, %v6044_v59, %v1167_v1  ;;  %v4468_v49 = vstv %s2839_s11  ;;  %v4491_v1 = vstv %s2791_s14  ;;  %s4963_s11 = sld [smem:[#allocation9 + $0x5a]]  ;;  %s4998_s14 = sld [smem:[#allocation9 + $0x2b]] }
 0x202   : > { %v4418_v44 = vpop.permute.xlu0 %1149  ;;  %v4478_v28 = vmul.f32 %v4428_v26, %v4468_v49  ;;  %v1709_v39 = vrot.slane %v1703_v35, 4  ;;  %v6049_v36 = vrot.slane %v4455_v27, 4  ;;  %v4501_v55 = vmul.f32 %v4491_v1, %v3676_v45 }
 0x203   : > { %v4422_v37 = vpop.permute.xlu1 %688  ;;  %v6050_v35 = vrot.slane %v4130_v51, 2 }
 0x204   : > { %1602 = vrot.lane.b32.xlu0 %v1599_v47, %s5978_s0  ;;  %v6052_v51 = vrot.slane %v4478_v28, 4 }
 0x205   : > { %1131 = vrot.lane.b32.xlu1 %v1128_v57, %s5979_s27  ;;  %v1207_v57 = vrot.slane %v1200_v18, 2  ;;  %v1691_v18 = vsel %vm204_vm0, %v1689_v15, %v6046_v19  ;;  %v1723_v15 = vmul.f32 %v4297_v16, %v4468_v49 }
 0x206   : > { %v4443_v42 = vpop.permute.xlu0 %1189 }
 0x207   : > { %6042 = vst [vmem:[#allocation30_spill] sm:$0xff] %v4443_v42  ;;  %v4447_v47 = vpop.permute.xlu1 %714  ;;  %v1208_v59 = vsel %vm1091_vm6, %v6047_v31, %v1207_v57  ;;  %v4514_v57 = vstv %s2840_s20  ;;  %s5030_s20 = sld [smem:[#allocation9 + $0x5c]] }
 0x208   : > { %1674 = vrot.lane.b32.xlu0 %v1671_v23, %s5979_s27  ;;  %v4524_v3 = vmul.f32 %v4428_v26, %v4514_v57 }
 0x209   : > { %1171 = vrot.lane.b32.xlu1 %v1168_v56, %s5980_s12  ;;  %v1247_v56 = vrot.slane %v1240_v30, 2  ;;  %v1711_v30 = vsel %vm204_vm0, %v1709_v39, %v6049_v36  ;;  %v1743_v39 = vmul.f32 %v4293_v41, %v4491_v1 }
 0x20a   : > { %v4466_v61 = vpop.permute.xlu0 %1229 }
 0x20b   : > { %6045 = vst [vmem:[#allocation35_spill] sm:$0xff] %v4466_v61  ;;  %v4470_v23 = vpop.permute.xlu1 %740  ;;  %v1248_v31 = vsel %vm1091_vm6, %v6050_v35, %v1247_v56  ;;  %v1749_v61 = vrot.slane %v1743_v39, 4  ;;  %v4537_v56 = vstv %s2792_s3  ;;  %v6057_v39 = vrot.slane %v4174_v21, 2  ;;  %s5069_s3 = sld [smem:[#allocation9 + $0x2c]] }
 0x20c   : > { %1694 = vrot.lane.b32.xlu0 %v1691_v18, %s5979_s27 }
 0x20d   : > { %1211 = vrot.lane.b32.xlu1 %v1208_v59, %s5981_s13  ;;  %v1287_v59 = vrot.slane %v1280_v7, 2 }
 0x20e   : > { %v4489_v19 = vpop.permute.xlu0 %1269 }
 0x20f   : > { %6048 = vst [vmem:[#allocation36_spill] sm:$0xff] %v4489_v19  ;;  %v4493_v18 = vpop.permute.xlu1 %766  ;;  %v1729_v19 = vrot.slane %v1723_v15, 4  ;;  %v6053_v15 = vrot.slane %v4149_v40, 2  ;;  %v6056_v40 = vrot.slane %v4501_v55, 4 }
 0x210   : > { %1714 = vrot.lane.b32.xlu0 %v1711_v30, %s5980_s12 }
 0x211   : > { %1251 = vrot.lane.b32.xlu1 %v1248_v31, %s5976_s7  ;;  %v1731_v7 = vsel %vm204_vm0, %v1729_v19, %v6052_v51  ;;  %v1288_v35 = vsel %vm1091_vm6, %v6053_v15, %v1287_v59  ;;  %v1327_v31 = vrot.slane %v1320_v54, 2  ;;  %v1763_v19 = vmul.f32 %v4297_v16, %v4514_v57 }
 0x212   : > { %v4512_v36 = vpop.permute.xlu0 %1309  ;;  %v1751_v54 = vsel %vm204_vm0, %v1749_v61, %v6056_v40  ;;  %v5925_v59 = vrot.slane %v4524_v3, 4  ;;  %v1783_v61 = vmul.f32 %v4293_v41, %v4537_v56 }
 0x213   : > { %6051 = vst [vmem:[#allocation47_spill] sm:$0xff] %v4512_v36  ;;  %v4516_v30 = vpop.permute.xlu1 %792  ;;  %v1393_v36 = vmul.f32 %v4187_v10, %v4151_v58  ;;  %v4547_v10 = vmul.f32 %v4537_v56, %v3676_v45  ;;  %v1328_v15 = vsel %vm1091_vm6, %v6057_v39, %v1327_v31  ;;  %v4560_v45 = vstv %s2841_s5  ;;  %s5096_s5 = sld [smem:[#allocation9 + $0x5d]] }
 0x214   : > { %1734 = vrot.lane.b32.xlu0 %v1731_v7, %s5980_s12  ;;  %v6060_v31 = vrot.slane %v4203_v32, 3 }
 0x215   : > { %1291 = vrot.lane.b32.xlu1 %v1288_v35, %s5977_s15  ;;  %v1400_v35 = vrot.slane %v1393_v36, 3  ;;  %v4583_v36 = vstv %s2793_s21  ;;  %v6063_v32 = vrot.slane %v4547_v10, 4  ;;  %s5098_s21 = sld [smem:[#allocation9 + $0x1c]] }
 0x216   : > { %v4535_v51 = vpop.permute.xlu0 %1349 }
 0x217   : > { %6054 = vst [vmem:[#allocation48_spill] sm:$0xff] %v4535_v51  ;;  %v4539_v7 = vpop.permute.xlu1 %878  ;;  %v1433_v51 = vmul.f32 %v4189_v6, %v4151_v58  ;;  %v4570_v6 = vmul.f32 %v4428_v26, %v4560_v45 }
 0x218   : > { %6055 = vst [vmem:[#allocation49_spill] sm:$0xff] %v4539_v7  ;;  %1754 = vrot.lane.b32.xlu0 %v1751_v54, %s5981_s13  ;;  %v1769_v7 = vrot.slane %v1763_v19, 4  ;;  %v1401_v19 = vsel %vm1364_vm7, %v6060_v31, %v1400_v35  ;;  %v6065_v31 = vrot.slane %v4241_v8, 3 }
 0x219   : > { %1331 = vrot.lane.b32.xlu1 %v1328_v15, %s5978_s0  ;;  %v1440_v39 = vrot.slane %v1433_v51, 3  ;;  %v1473_v15 = vmul.f32 %v4221_v38, %v4151_v58  ;;  %v4591_v38 = vld [vmem:[#allocation4 + $0x8] sm:$0xff] }
 0x21a   : > { %v4558_v40 = vpop.permute.xlu0 %1422  ;;  %v1771_v21 = vsel %vm204_vm0, %v1769_v7, %v5925_v59  ;;  %v1803_v7 = vmul.f32 %v4297_v16, %v4560_v45 }
 0x21b   : > { %6058 = vst [vmem:[#allocation50_spill] sm:$0xff] %v4558_v40  ;;  %v4562_v54 = vpop.permute.xlu1 %918  ;;  %v1789_v40 = vrot.slane %v1783_v61, 4  ;;  %v4595_v61 = vmul.f32 %v4591_v38, %v4583_v36 }
 0x21c   : > { %6059 = vst [vmem:[#allocation51_spill] sm:$0xff] %v4562_v54  ;;  %1774 = vrot.lane.b32.xlu0 %v1771_v21, %s5981_s13  ;;  %v4608_v54 = vstv %s2842_s17  ;;  %s5118_s17 = sld [smem:[#allocation9 + $0x4d]] }
 0x21d   : > { %1404 = vrot.lane.b32.xlu1 %v1401_v19, %s5979_s27  ;;  %v1791_v51 = vsel %vm204_vm0, %v1789_v40, %v6063_v32  ;;  %6064 = vst [vmem:[#allocation54_spill] sm:$0xff] %v4595_v61  ;;  %v1441_v19 = vsel %vm1364_vm7, %v6065_v31, %v1440_v39  ;;  %v1809_v40 = vrot.slane %v1803_v7, 4  ;;  %v1823_v32 = vmul.f32 %v4293_v41, %v4583_v36 }
 0x21e   : > { %v4581_v59 = vpop.permute.xlu0 %1462  ;;  %v6069_v39 = vrot.slane %v4570_v6, 4  ;;  %v4620_v7 = vmul.f32 %v4428_v26, %v4608_v54 }
 0x21f   : > { %6061 = vst [vmem:[#allocation52_spill] sm:$0xff] %v4581_v59  ;;  %v4585_v21 = vpop.permute.xlu1 %958  ;;  %v1480_v59 = vrot.slane %v1473_v15, 3 }
 0x220   : > { %6062 = vst [vmem:[#allocation53_spill] sm:$0xff] %v4585_v21  ;;  %1794 = vrot.lane.b32.xlu0 %v1791_v51, %s5976_s7  ;;  %v1513_v21 = vmul.f32 %v4304_v62, %v4151_v58  ;;  %v1811_v15 = vsel %vm204_vm0, %v1809_v40, %v6069_v39  ;;  %v6070_v51 = vstv %s3409_s30  ;;  %v1829_v40 = vrot.slane %v1823_v32, 4  ;;  %s2796_s30 = sld [smem:[#allocation9 + $0x24]] }
 0x221   : > { %1444 = vrot.lane.b32.xlu1 %v1441_v19, %s5980_s12  ;;  %v647_v31 = vmul.f32 %v4591_v38, %v6070_v51  ;;  %v6071_v19 = vrot.slane %v4274_v60, 3  ;;  %v1843_v39 = vmul.f32 %v4297_v16, %v4608_v54  ;;  %v6072_v62 = vstv %s6066_s16  ;;  %s5158_s16 = sld [smem:[#allocation9 + $0x5e]] }
 0x222   : > { %v4606_v35 = vpop.permute.xlu0 %1502  ;;  %v652_v42 = vmul.f32 %v4428_v26, %v6072_v62  ;;  %v6076_v62 = vrot.slane %v4320_v25, 3 }
 0x223   : > { %6067 = vst [vmem:[#allocation55_spill] sm:$0xff] %v4606_v35  ;;  %v4612_v8 = vpop.permute.xlu1 %998  ;;  %v1481_v35 = vsel %vm1364_vm7, %v6071_v19, %v1480_v59  ;;  %v6075_v59 = vrot.slane %v4595_v61, 4 }
 0x224   : > { %6068 = vst [vmem:[#allocation56_spill] sm:$0xff] %v4612_v8  ;;  %1814 = vrot.lane.b32.xlu0 %v1811_v15, %s5976_s7  ;;  %v1520_v8 = vrot.slane %v1513_v21, 3  ;;  %v4639_v15 = vstv %s2794_s24  ;;  %v654_v32 = vadd.f32 %v652_v42, %v647_v31  ;;  %v4664_v42 = vstv %s4610_s18  ;;  %s5130_s24 = sld [smem:[#allocation9 + $0x2d]]  ;;  %s5193_s18 = sld [smem:[#allocation9 + $0x2e]] }
 0x225   : > { %1484 = vrot.lane.b32.xlu1 %v1481_v35, %s5981_s13  ;;  %v1831_v53 = vsel %vm204_vm0, %v1829_v40, %v6075_v59  ;;  %v4649_v35 = vmul.f32 %v4591_v38, %v4639_v15  ;;  %v1849_v40 = vrot.slane %v1843_v39, 4  ;;  %v1863_v59 = vmul.f32 %v4293_v41, %v4639_v15 }
 0x226   : > { %v4637_v51 = vpop.permute.xlu0 %1542  ;;  %v1521_v19 = vsel %vm1364_vm7, %v6076_v62, %v1520_v8  ;;  %v667_v21 = vadd.f32 %v4399_v50, %v654_v32  ;;  %v4674_v31 = vmul.f32 %v4428_v26, %v4664_v42  ;;  %v6078_v50 = vrot.slane %v4355_v0, 3 }
 0x227   : > { %6073 = vst [vmem:[#allocation57_spill] sm:$0xff] %v4637_v51  ;;  %v4641_v60 = vpop.permute.xlu1 %1038  ;;  %v1560_v51 = vrot.slane %v1553_v13, 3  ;;  %v6077_v13 = vrot.slane %v4620_v7, 4  ;;  %v1665_v32 = vmul.f32 %v4397_v20, %v4151_v58  ;;  %v1869_v62 = vrot.slane %v1863_v59, 4 }
 0x228   : > { %6074 = vst [vmem:[#allocation58_spill] sm:$0xff] %v4641_v60  ;;  %1834 = vrot.lane.b32.xlu0 %v1831_v53, %s5977_s15  ;;  %v1593_v60 = vmul.f32 %v4374_v33, %v4151_v58  ;;  %v4688_v33 = vstv %s2796_s30  ;;  %s5223_s30 = sld [smem:[#allocation9 + $0x5f]] }
 0x229   : > { %1524 = vrot.lane.b32.xlu1 %v1521_v19, %s5976_s7  ;;  %v1851_v8 = vsel %vm204_vm0, %v1849_v40, %v6077_v13  ;;  %v1561_v39 = vsel %vm1364_vm7, %v6078_v50, %v1560_v51  ;;  %v1883_v19 = vmul.f32 %v4297_v16, %v4664_v42  ;;  %v680_v40 = vadd.f32 %v4195_v12, %v667_v21  ;;  %v4706_v50 = vld [vmem:[#allocation4 + $0x28] sm:$0x3f] }
 0x22a   : > { %v4661_v61 = vpop.permute.xlu0 %1582  ;;  %v1600_v53 = vrot.slane %v1593_v60, 3  ;;  %v6080_v51 = vrot.slane %v4649_v35, 4  ;;  %v4700_v59 = vmul.f32 %v4591_v38, %v4688_v33  ;;  %v6081_v12 = vrot.slane %v4384_v17, 3 }
 0x22b   : > { %v4666_v25 = vpop.permute.xlu1 %1078  ;;  %v693_v60 = vadd.f32 %v4422_v37, %v680_v40  ;;  %v6084_v37 = vrot.slane %v4407_v22, 4 }
 0x22c   : > { %1854 = vrot.lane.b32.xlu0 %v1851_v8, %s5977_s15  ;;  %v1871_v20 = vsel %vm204_vm0, %v1869_v62, %v6080_v51  ;;  %v1601_v21 = vsel %vm1364_vm7, %v6081_v12, %v1600_v53  ;;  %v1672_v8 = vrot.slane %v1665_v32, 4  ;;  %v1889_v62 = vrot.slane %v1883_v19, 4 }
 0x22d   : > { %1564 = vrot.lane.b32.xlu1 %v1561_v39, %s5977_s15  ;;  %v1685_v39 = vmul.f32 %v4706_v50, %v4420_v14  ;;  %v1936_v51 = vmul.f32 %v4293_v41, %v4688_v33  ;;  %v6083_v14 = vrot.slane %v4674_v31, 4  ;;  %v706_v19 = vadd.f32 %v4230_v5, %v693_v60 }
 0x22e   : > { %v4686_v13 = vpop.permute.xlu0 %1622  ;;  %v1673_v40 = vsel %vm204_vm0, %v6084_v37, %v1672_v8  ;;  %v6086_v60 = vrot.slane %v4432_v4, 4  ;;  %v4771_v4 = vstv %s4716_s29  ;;  %s5314_s29 = sld [smem:[#allocation9 + $0x30]] }
 0x22f   : > { %6079 = vst [vmem:[#allocation59_spill] sm:$0xff] %v4686_v13  ;;  %v4692_v0 = vpop.permute.xlu1 %1151  ;;  %v1891_v32 = vsel %vm204_vm0, %v1889_v62, %v6083_v14  ;;  %v1942_v62 = vrot.slane %v1936_v51, 5 }
 0x230   : > { %1874 = vrot.lane.b32.xlu0 %v1871_v20, %s5978_s0  ;;  %v4714_v20 = vstv %s2845_s22  ;;  %s5251_s22 = sld [smem:[#allocation9 + $0x2f]] }
 0x231   : > { %1604 = vrot.lane.b32.xlu1 %v1601_v21, %s5978_s0  ;;  %v4727_v12 = vmul.f32 %v4428_v26, %v4714_v20  ;;  %v1692_v21 = vrot.slane %v1685_v39, 4  ;;  %v1956_v14 = vmul.f32 %v4297_v16, %v4714_v20 }
 0x232   : > { %v857_v13 = vpop.permute.xlu0 %856 }
 0x233   : > { %v862_v17 = vadd.f32 %v857_v13, %v4086_v24  ;;  %v4719_v53 = vpop.permute.xlu1 %1191  ;;  %v1705_v24 = vmul.f32 %v4445_v11, %v4151_v58  ;;  %v5929_v39 = vrot.slane %v4727_v12, 5  ;;  %v1693_v51 = vsel %vm204_vm0, %v6086_v60, %v1692_v21 }
 0x234   : > { %6082 = vst [vmem:[#allocation60_spill] sm:$0xff] %v4719_v53  ;;  %1894 = vrot.lane.b32.xlu0 %v1891_v32, %s5978_s0  ;;  %v4741_v32 = vstv %s4690_s23  ;;  %s5287_s23 = sld [smem:[#allocation9 + $0x60]] }
 0x235   : > { %v882_v13 = vadd.f32 %v4216_v46, %v862_v17  ;;  %1676 = vrot.lane.b32.xlu1 %v1673_v40, %s5979_s27  ;;  %v6085_v46 = vrot.slane %v4700_v59, 5  ;;  %v4755_v5 = vmul.f32 %v4591_v38, %v4741_v32  ;;  %v1712_v17 = vrot.slane %v1705_v24, 4 }
 0x236   : > { %v897_v53 = vpop.permute.xlu0 %896  ;;  %v1962_v40 = vrot.slane %v1956_v14, 5  ;;  %v4783_v14 = vmul.f32 %v4428_v26, %v4771_v4 }
 0x237   : > { %v902_v22 = vadd.f32 %v897_v53, %v882_v13  ;;  %v4747_v11 = vpop.permute.xlu1 %1231  ;;  %v1944_v8 = vsel %vm1909_vm8, %v1942_v62, %v6085_v46  ;;  %v1725_v53 = vmul.f32 %v4706_v50, %v4468_v49  ;;  %v1976_v13 = vmul.f32 %v4293_v41, %v4741_v32 }
 0x238   : > { %1947 = vrot.lane.b32.xlu0 %v1944_v8, %s5979_s27  ;;  %v719_v62 = vadd.f32 %v4447_v47, %v706_v19  ;;  %v5927_v24 = vrot.slane %v4755_v5, 5  ;;  %v6087_v47 = vrot.slane %v4455_v27, 4  ;;  %v1745_v8 = vmul.f32 %v4491_v1, %v4151_v58 }
 0x239   : > { %v922_v37 = vadd.f32 %v4258_v63, %v902_v22  ;;  %1696 = vrot.lane.b32.xlu1 %v1693_v51, %s5979_s27  ;;  %v1964_v63 = vsel %vm1909_vm8, %v1962_v40, %v5929_v39  ;;  %v1732_v22 = vrot.slane %v1725_v53, 4  ;;  %v1982_v51 = vrot.slane %v1976_v13, 5 }
 0x23a   : > { %v937_v46 = vpop.permute.xlu0 %936  ;;  %v1713_v19 = vsel %vm204_vm0, %v6087_v47, %v1712_v17  ;;  %v732_v40 = vadd.f32 %v4266_v2, %v719_v62  ;;  %v4802_v17 = vstv %s4745_s4  ;;  %v5928_v13 = vrot.slane %v4783_v14, 5  ;;  %s6204_s4 = smov 48  }
 0x23b   : > { %v942_v21 = vadd.f32 %v937_v46, %v922_v37  ;;  %v4775_v49 = vpop.permute.xlu1 %1271  ;;  %v1996_v37 = vmul.f32 %v4297_v16, %v4771_v4  ;;  %v4799_v46 = vstv %s4743_s6  ;;  %v6089_v2 = vrot.slane %v4478_v28, 4  ;;  %s5344_s6 = sld [smem:[#allocation9 + $0x61]] }
 0x23c   : > { %1967 = vrot.lane.b32.xlu0 %v1964_v63, %s5979_s27  ;;  %v1752_v63 = vrot.slane %v1745_v8, 4  ;;  %v1765_v47 = vmul.f32 %v4706_v50, %v4514_v57  ;;  %v1085_v28 = vmul.f32 %v4293_v41, %v4799_v46  ;;  %v4835_v57 = vstv %s4773_s25  ;;  %s6206_s25 = smov 96  }
 0x23d   : > { %v962_v60 = vadd.f32 %v4301_v52, %v942_v21  ;;  %1716 = vrot.lane.b32.xlu1 %v1713_v19, %s5980_s12  ;;  %v1984_v52 = vsel %vm1909_vm8, %v1982_v51, %v5927_v24  ;;  %v4812_v21 = vmul.f32 %v4591_v38, %v4802_v17  ;;  %v1733_v62 = vsel %vm204_vm0, %v6089_v2, %v1732_v22 }
 0x23e   : > { %v977_v27 = vpop.permute.xlu0 %976  ;;  %v4823_v51 = vstv %s4767_s8  ;;  %v4832_v22 = vmul.f32 %v4591_v38, %v4799_v46  ;;  %v4864_v39 = vstv %s4795_s19  ;;  %s6205_s8 = smov 80   ;;  %s6207_s19 = smov 112  }
 0x23f   : > { %v982_v53 = vadd.f32 %v977_v27, %v962_v60  ;;  %v4804_v1 = vpop.permute.xlu1 %1311  ;;  %v2002_v60 = vrot.slane %v1996_v37, 5  ;;  %v2016_v27 = vmul.f32 %v4293_v41, %v4802_v17 }
 0x240   : > { %6088 = vst [vmem:[#allocation61_spill] sm:$0xff] %v4804_v1  ;;  %1987 = vrot.lane.b32.xlu0 %v1984_v52, %s5980_s12  ;;  %v745_v52 = vadd.f32 %v4470_v23, %v732_v40  ;;  %v4847_v40 = vmul.f32 %v4428_v26, %v4835_v57 }
 0x241   : > { %v1002_v19 = vadd.f32 %v4337_v9, %v982_v53  ;;  %1736 = vrot.lane.b32.xlu1 %v1733_v62, %s5980_s12  ;;  %v2004_v23 = vsel %vm1909_vm8, %v2002_v60, %v5928_v13  ;;  %v6091_v53 = vrot.slane %v4501_v55, 4  ;;  %v1772_v62 = vrot.slane %v1765_v47, 4 }
 0x242   : > { %v1017_v24 = vpop.permute.xlu0 %1016  ;;  %v2022_v13 = vrot.slane %v2016_v27, 5  ;;  %v758_v55 = vadd.f32 %v4312_v43, %v745_v52  ;;  %v1102_v47 = vmul.f32 %v4297_v16, %v4823_v51  ;;  %v6093_v27 = vrot.slane %v4812_v21, 5 }
 0x243   : > { %v1022_v9 = vadd.f32 %v1017_v24, %v1002_v19  ;;  %v4839_v8 = vpop.permute.xlu1 %1351  ;;  %v1753_v2 = vsel %vm204_vm0, %v6091_v53, %v1752_v63  ;;  %v4855_v24 = vmul.f32 %v4428_v26, %v4823_v51  ;;  %v1785_v19 = vmul.f32 %v4537_v56, %v4151_v58 }
 0x244   : > { %6090 = vst [vmem:[#allocation62_spill] sm:$0xff] %v4839_v8  ;;  %2007 = vrot.lane.b32.xlu0 %v2004_v23, %s5980_s12  ;;  %v2036_v23 = vmul.f32 %v4297_v16, %v4835_v57  ;;  %v1092_v63 = vrot.slane %v1085_v28, 2  ;;  %v4880_v43 = vmul.f32 %v4591_v38, %v4864_v39  ;;  %v6094_v28 = vrot.slane %v4524_v3, 4 }
 0x245   : > { %v1042_v60 = vadd.f32 %v4371_v29, %v1022_v9  ;;  %1756 = vrot.lane.b32.xlu1 %v1753_v2, %s5981_s13  ;;  %v2024_v9 = vsel %vm1909_vm8, %v2022_v13, %v6093_v27  ;;  %v1805_v53 = vmul.f32 %v4706_v50, %v4560_v45  ;;  %v2056_v52 = vmul.f32 %v4293_v41, %v4864_v39 }
 0x246   : > { %v1057_v37 = vpop.permute.xlu0 %1056  ;;  %v2042_v27 = vrot.slane %v2036_v23, 5  ;;  %v6095_v3 = vrot.slane %v4832_v22, 2  ;;  %v4900_v2 = vstv %s4837_s1  ;;  %v6097_v23 = vrot.slane %v4847_v40, 5  ;;  %s6236_s1 = sld [smem:[#allocation17_spill]] }
 0x247   : > { %v1062_v29 = vadd.f32 %v1057_v37, %v1042_v60  ;;  %v4872_v56 = vpop.permute.xlu1 %1424  ;;  %v1773_v37 = vsel %vm204_vm0, %v6094_v28, %v1772_v62  ;;  %v1792_v60 = vrot.slane %v1785_v19, 4  ;;  %v1108_v19 = vrot.slane %v1102_v47, 2 }
 0x248   : > { %6092 = vst [vmem:[#allocation63_spill] sm:$0xff] %v4872_v56  ;;  %2027 = vrot.lane.b32.xlu0 %v2024_v9, %s5981_s13  ;;  %v771_v9 = vadd.f32 %v4493_v18, %v758_v55  ;;  %v1094_v62 = vsel %vm1091_vm6, %v1092_v63, %v6095_v3  ;;  %v4912_v55 = vmul.f32 %v4428_v26, %v4900_v2  ;;  %v6098_v63 = vrot.slane %v4855_v24, 2 }
 0x249   : > { %v1082_v13 = vadd.f32 %v4395_v34, %v1062_v29  ;;  %1776 = vrot.lane.b32.xlu1 %v1773_v37, %s5981_s13  ;;  %v2044_v29 = vsel %vm1909_vm8, %v2042_v27, %v6097_v23  ;;  %v6099_v37 = vrot.slane %v4547_v10, 4  ;;  %v1812_v3 = vrot.slane %v1805_v53, 4 }
 0x24a   : > { %v1130_v28 = vpop.permute.xlu0 %1129  ;;  %v1110_v47 = vsel %vm1091_vm6, %v1108_v19, %v6098_v63  ;;  %v1825_v27 = vmul.f32 %v4583_v36, %v4151_v58  ;;  %v2062_v23 = vrot.slane %v2056_v52, 5  ;;  %v2076_v18 = vmul.f32 %v4297_v16, %v4900_v2 }
 0x24b   : > { %v1099_v45 = vadd.f32 %v1094_v62, %v1082_v13  ;;  %v4904_v34 = vpop.permute.xlu1 %1464  ;;  %v1793_v13 = vsel %vm204_vm0, %v6099_v37, %v1792_v60  ;;  %v784_v19 = vadd.f32 %v4347_v48, %v771_v9  ;;  %v6101_v36 = vrot.slane %v4880_v43, 5 }
 0x24c   : > { %6096 = vst [vmem:[#allocation64_spill] sm:$0xff] %v4904_v34  ;;  %2047 = vrot.lane.b32.xlu0 %v2044_v29, %s5981_s13  ;;  %v4928_v29 = vstv %s4870_s26  ;;  %v5930_v60 = vrot.slane %v4912_v55, 5  ;;  %v6102_v9 = vrot.slane %v4570_v6, 4  ;;  %v4951_v37 = vstv %s4889_s28  ;;  %v6109_v34 = vld [vmem:[#allocation32_spill] sm:$0xff]  ;;  %s6240_s26 = sld [smem:[#allocation22_spill]]  ;;  %s2866_s28 = sshll.u32 %s6236_s1, 5 }
 0x24d   : > { %v1115_v62 = vadd.f32 %v1110_v47, %v1099_v45  ;;  %1796 = vrot.lane.b32.xlu1 %v1793_v13, %s5976_s7  ;;  %v2064_v52 = vsel %vm1909_vm8, %v2062_v23, %v6101_v36  ;;  %v4942_v48 = vmul.f32 %v4591_v38, %v4928_v29  ;;  %v1845_v47 = vmul.f32 %v4706_v50, %v4608_v54  ;;  %v6103_v13 = vld [vmem:[#allocation27_spill] sm:$0xff] }
 0x24e   : > { %v1170_v63 = vpop.permute.xlu0 %1169  ;;  %v1813_v45 = vsel %vm204_vm0, %v6102_v9, %v1812_v3  ;;  %v2082_v36 = vrot.slane %v2076_v18, 5  ;;  %v797_v6 = vadd.f32 %v4516_v30, %v784_v19  ;;  %v6105_v30 = vld [vmem:[#allocation54_spill] sm:$0xff] }
 0x24f   : > { %v1135_v10 = vadd.f32 %v1130_v28, %v1115_v62  ;;  %v4934_v53 = vpop.permute.xlu1 %1504  ;;  %v1832_v28 = vrot.slane %v1825_v27, 4  ;;  %v814_v62 = vmul.f32 %v6103_v13, %v4151_v58  ;;  %v4961_v27 = vstv %s4902_s2 }
 0x250   : > { %6100 = vst [vmem:[#allocation65_spill] sm:$0xff] %v4934_v53  ;;  %2067 = vrot.lane.b32.xlu0 %v2064_v52, %s5976_s7  ;;  %v2096_v52 = vmul.f32 %v4293_v41, %v4928_v29  ;;  %v6106_v19 = vrot.slane %v6105_v30, 4  ;;  %v2116_v13 = vmul.f32 %v4297_v16, %v4951_v37  ;;  %v810_v30 = vadd.f32 %v6109_v34, %v797_v6 }
 0x251   : > { %v1155_v23 = vadd.f32 %v4418_v44, %v1135_v10  ;;  %1816 = vrot.lane.b32.xlu1 %v1813_v45, %s5976_s7  ;;  %v2084_v44 = vsel %vm1909_vm8, %v2082_v36, %v5930_v60  ;;  %v4973_v10 = vmul.f32 %v4428_v26, %v4951_v37  ;;  %v1852_v45 = vrot.slane %v1845_v47, 4  ;;  %v6107_v36 = vld [vmem:[#allocation29_spill] sm:$0xff] }
 0x252   : > { %v1210_v3 = vpop.permute.xlu0 %1209  ;;  %v831_v60 = vmul.f32 %v4706_v50, %v6107_v36  ;;  %v822_v18 = vrot.slane %v814_v62, 1  ;;  %v4993_v47 = vstv %s4930_s9  ;;  %v6111_v62 = vrot.slane %v4942_v48, 5  ;;  %p6248_p2 = scmp.ne.s32.totalorder %s6240_s26, 0 }
 0x253   : > { %v1175_v54 = vadd.f32 %v1170_v63, %v1155_v23  ;;  %v4965_v9 = vpop.permute.xlu1 %1544  ;;  %v1833_v63 = vsel %vm204_vm0, %v6106_v19, %v1832_v28  ;;  %v1865_v23 = vmul.f32 %v4639_v15, %v4151_v58  ;;  %v4990_v28 = vmul.f32 %v4293_v41, %v4961_v27 }
 0x254   : > { %6104 = vst [vmem:[#allocation27_spill] sm:$0xff] %v4965_v9  ;;  %2087 = vrot.lane.b32.xlu0 %v2084_v44, %s5976_s7  ;;  %v6108_v9 = vld [vmem:[#allocation30_spill] sm:$0xff]  ;;  %v2102_v44 = vrot.slane %v2096_v52, 5  ;;  %v4996_v19 = vstv %s4932_s10  ;;  %v838_v36 = vrot.slane %v831_v60, 1 }
 0x255   : > { %v1195_v53 = vadd.f32 %v6108_v9, %v1175_v54  ;;  %1836 = vrot.lane.b32.xlu1 %v1833_v63, %s5977_s15  ;;  %v5008_v6 = vmul.f32 %v4591_v38, %v4996_v19  ;;  %v6112_v54 = vrot.slane %v4620_v7, 4  ;;  %v1885_v63 = vmul.f32 %v4706_v50, %v4664_v42 }
 0x256   : > { %v1250_v56 = vpop.permute.xlu0 %1249  ;;  %v2104_v52 = vsel %vm1909_vm8, %v2102_v44, %v6111_v62  ;;  %v6113_v44 = vld [vmem:[#allocation33_spill] sm:$0xff] }
 0x257   : > { %v1215_v58 = vadd.f32 %v1210_v3, %v1195_v53  ;;  %v5000_v15 = vpop.permute.xlu1 %1584  ;;  %v1853_v9 = vsel %vm204_vm0, %v6112_v54, %v1852_v45  ;;  %v2122_v53 = vrot.slane %v2116_v13, 5  ;;  %v1872_v3 = vrot.slane %v1865_v23, 4  ;;  %v5047_v54 = vld [vmem:[#allocation4 + $0x10] sm:$0x3f] }
 0x258   : > { %6110 = vst [vmem:[#allocation54_spill] sm:$0xff] %v5000_v15  ;;  %2107 = vrot.lane.b32.xlu0 %v2104_v52, %s5977_s15  ;;  %v6114_v62 = vrot.slane %v6113_v44, 1  ;;  %v6115_v15 = vld [vmem:[#allocation35_spill] sm:$0xff]  ;;  %v2136_v52 = vmul.f32 %v4293_v41, %v4996_v19  ;;  %v5025_v45 = vmul.f32 %v4297_v16, %v4993_v47  ;;  %v5028_v13 = vstv %s4963_s11  ;;  %s6245_s11 = sld [smem:[#allocation68_spill]] }
 0x259   : > { %v1235_v8 = vadd.f32 %v6115_v15, %v1215_v58  ;;  %1856 = vrot.lane.b32.xlu1 %v1853_v9, %s5977_s15  ;;  %v6118_v15 = vrot.slane %v4649_v35, 4  ;;  %v1938_v9 = vmul.f32 %v5047_v54, %v4688_v33  ;;  %v2156_v35 = vmul.f32 %v4297_v16, %v5028_v13 }
 0x25a   : > { %v823_v34 = vsel %vm818_vm5, %v6114_v62, %v822_v18  ;;  %v1290_v1 = vpop.permute.xlu0 %1289  ;;  %v6117_v18 = vrot.slane %v4973_v10, 5  ;;  %v5064_v33 = vmul.f32 %v4428_v26, %v4993_v47 }
 0x25b   : > { %v827_v7 = vadd.f32 %v823_v34, %v810_v30  ;;  %v1255_v42 = vadd.f32 %v1250_v56, %v1235_v8  ;;  %v5032_v60 = vpop.permute.xlu1 %1624  ;;  %v5040_v30 = vmul.f32 %v4428_v26, %v5028_v13  ;;  %v1873_v34 = vsel %vm204_vm0, %v6118_v15, %v1872_v3 }
 0x25c   : > { %6116 = vst [vmem:[#allocation29_spill] sm:$0xff] %v5032_v60  ;;  %v2124_v23 = vsel %vm1909_vm8, %v2122_v53, %v6117_v18  ;;  %v1365_v8 = vrot.slane %v4990_v28, 3  ;;  %v1892_v56 = vrot.slane %v1885_v63, 4  ;;  %v6119_v53 = vld [vmem:[#allocation34_spill] sm:$0xff]  ;;  %v6121_v18 = vld [vmem:[#allocation36_spill] sm:$0xff]  ;;  %v5060_v28 = vmul.f32 %v4591_v38, %v4961_v27  ;;  %v6124_v60 = vld [vmem:[#allocation47_spill] sm:$0xff] }
 0x25d   : > { %2127 = vrot.lane.b32.xlu0 %v2124_v23, %s5977_s15  ;;  %v6120_v44 = vrot.slane %v6119_v53, 1  ;;  %v1275_v58 = vadd.f32 %v6121_v18, %v1255_v42  ;;  %1876 = vrot.lane.b32.xlu1 %v1873_v34, %s5978_s0  ;;  %v2142_v23 = vrot.slane %v2136_v52, 5  ;;  %v5067_v15 = vstv %s4998_s14 }
 0x25e   : > { %v1330_v63 = vpop.permute.xlu0 %1329  ;;  %v6122_v52 = vrot.slane %v5008_v6, 5  ;;  %v5077_v53 = vmul.f32 %v4591_v38, %v5067_v15  ;;  %s5763_s14 = scalar_lea.hbm %s6245_s11, %s2866_s28 }
 0x25f   : > { %v839_v62 = vsel %vm818_vm5, %v6120_v44, %v838_v36  ;;  %v1295_v36 = vadd.f32 %v1290_v1, %v1275_v58  ;;  %v859_v42 = vpop.permute.xlu1 %858  ;;  %v1945_v1 = vrot.slane %v1938_v9, 5  ;;  %v1958_v58 = vmul.f32 %v4706_v50, %v4714_v20 }
 0x260   : > { %v843_v3 = vadd.f32 %v839_v62, %v827_v7  ;;  %v2144_v34 = vsel %vm1909_vm8, %v2142_v23, %v6122_v52  ;;  %v6123_v62 = vrot.slane %v4674_v31, 4  ;;  %v1381_v52 = vrot.slane %v5025_v45, 3  ;;  %v6129_v31 = vld [vmem:[#allocation48_spill] sm:$0xff] }
 0x261   : > { %2147 = vrot.lane.b32.xlu0 %v2144_v34, %s5978_s0  ;;  %v1315_v23 = vadd.f32 %v6124_v60, %v1295_v36  ;;  %v2162_v7 = vrot.slane %v2156_v35, 5  ;;  %v6125_v34 = vld [vmem:[#allocation49_spill] sm:$0xff]  ;;  %v6126_v60 = vrot.slane %v5040_v30, 5 }
 0x262   : > { %v863_v44 = vadd.f32 %v859_v42, %v843_v3  ;;  %v1893_v18 = vsel %vm204_vm0, %v6123_v62, %v1892_v56  ;;  %v2209_v3 = vmul.f32 %v4293_v41, %v5067_v15  ;;  %v5931_v42 = vrot.slane %v5060_v28, 3  ;;  %v1403_v9 = vpop.permute.xlu0 %1402 }
 0x263   : > { %1896 = vrot.lane.b32.xlu1 %v1893_v18, %s5978_s0  ;;  %v5094_v62 = vstv %s5030_s20  ;;  %v1335_v20 = vadd.f32 %v1330_v63, %v1315_v23  ;;  %v899_v45 = vpop.permute.xlu1 %898  ;;  %v2164_v35 = vsel %vm1909_vm8, %v2162_v7, %v6126_v60  ;;  %v6128_v18 = vrot.slane %v4700_v59, 5  ;;  %s6246_s20 = smov %s6245_s11 }
 0x264   : > { %v883_v56 = vadd.f32 %v6125_v34, %v863_v44  ;;  %v5106_v36 = vmul.f32 %v4428_v26, %v5094_v62  ;;  %v1965_v63 = vrot.slane %v1958_v58, 5  ;;  %v1978_v23 = vmul.f32 %v5047_v54, %v4741_v32 }
 0x265   : > { %2167 = vrot.lane.b32.xlu0 %v2164_v35, %s5978_s0  ;;  %v1946_v34 = vsel %vm1909_vm8, %v6128_v18, %v1945_v1  ;;  %v1355_v7 = vadd.f32 %v6129_v31, %v1335_v20  ;;  %v2215_v60 = vrot.slane %v2209_v3, 6  ;;  %v2229_v41 = vmul.f32 %v4297_v16, %v5094_v62 }
 0x266   : > { %6127 = vst [vmem:[#allocation30_spill] sm:$0xff] %v5106_v36  ;;  %v903_v44 = vadd.f32 %v899_v45, %v883_v56  ;;  %v1367_v59 = vsel %vm1364_vm7, %v1365_v8, %v5931_v42  ;;  %v6130_v1 = vrot.slane %v5064_v33, 3  ;;  %v6131_v56 = vld [vmem:[#allocation51_spill] sm:$0xff]  ;;  %v1443_v45 = vpop.permute.xlu0 %1442  ;;  %v5128_v31 = vstv %s5069_s3 }
 0x267   : > { %1949 = vrot.lane.b32.xlu1 %v1946_v34, %s5979_s27  ;;  %v1372_v3 = vadd.f32 %v1367_v59, %v1355_v7  ;;  %v939_v20 = vpop.permute.xlu1 %938  ;;  %v6132_v16 = vrot.slane %v5077_v53, 6  ;;  %v5932_v8 = vrot.slane %v5106_v36, 6  ;;  %v6134_v18 = vrot.slane %v4727_v12, 5 }
 0x268   : > { %v1383_v58 = vsel %vm1364_vm7, %v1381_v52, %v6130_v1  ;;  %v923_v32 = vadd.f32 %v6131_v56, %v903_v44  ;;  %v5138_v52 = vmul.f32 %v4591_v38, %v5128_v31  ;;  %v1985_v7 = vrot.slane %v1978_v23, 5  ;;  %v5147_v56 = vld [vmem:[#allocation4] sm:$0xff] }
 0x269   : > { %v2217_v35 = vsel %vm2182_vm9, %v2215_v60, %v6132_v16  ;;  %v1966_v34 = vsel %vm1909_vm8, %v6134_v18, %v1965_v63  ;;  %v1998_v59 = vmul.f32 %v4706_v50, %v4771_v4  ;;  %v1388_v1 = vadd.f32 %v1383_v58, %v1372_v3 }
 0x26a   : > { %6133 = vst [vmem:[#allocation32_spill] sm:$0xff] %v5138_v52  ;;  %v943_v44 = vadd.f32 %v939_v20, %v923_v32  ;;  %2220 = vrot.lane.b32.xlu0 %v2217_v35, %s5979_s27  ;;  %v2235_v60 = vrot.slane %v2229_v41, 6  ;;  %v2249_v16 = vmul.f32 %v5147_v56, %v5128_v31  ;;  %v6135_v32 = vld [vmem:[#allocation53_spill] sm:$0xff]  ;;  %v1483_v35 = vpop.permute.xlu0 %1482  ;;  %v5153_v42 = vstv %s5096_s5 }
 0x26b   : > { %1969 = vrot.lane.b32.xlu1 %v1966_v34, %s5979_s27  ;;  %6136 = vst [vmem:[#allocation33_spill] sm:$0xff] %v5153_v42  ;;  %v5156_v12 = vstv %s5098_s21  ;;  %v1408_v4 = vadd.f32 %v1403_v9, %v1388_v1  ;;  %v979_v63 = vpop.permute.xlu1 %978  ;;  %v5166_v58 = vmul.f32 %v4428_v26, %v5153_v42  ;;  %v2005_v9 = vrot.slane %v1998_v59, 5  ;;  %v6138_v1 = vld [vmem:[#allocation50_spill] sm:$0xff]  ;;  %s3142_s21 = smov [#allocation10]  }
 0x26c   : > { %v963_v20 = vadd.f32 %v6135_v32, %v943_v44  ;;  %v2237_v41 = vsel %vm2182_vm9, %v2235_v60, %v5932_v8  ;;  %v6137_v44 = vrot.slane %v4755_v5, 5  ;;  %v2018_v34 = vmul.f32 %v5047_v54, %v4802_v17  ;;  %v5176_v8 = vld [vmem:[#allocation4 + $0x18] sm:$0xff] }
 0x26d   : > { %v1428_v60 = vadd.f32 %v6138_v1, %v1408_v4  ;;  %v2255_v32 = vrot.slane %v2249_v16, 6  ;;  %v5188_v17 = vmul.f32 %v5147_v56, %v5156_v12  ;;  %v5191_v59 = vstv %s5130_s24 }
 0x26e   : > { %v983_v3 = vadd.f32 %v979_v63, %v963_v20  ;;  %2240 = vrot.lane.b32.xlu0 %v2237_v41, %s5979_s27  ;;  %v1986_v18 = vsel %vm1909_vm8, %v6137_v44, %v1985_v7  ;;  %v2269_v20 = vmul.f32 %v5176_v8, %v5153_v42  ;;  %v5181_v63 = vstv %s5118_s17  ;;  %v6139_v41 = vld [vmem:[#allocation56_spill] sm:$0xff]  ;;  %v1523_v23 = vpop.permute.xlu0 %1522  ;;  %s3032_s17 = sshll.u32 %s3142_s21, 4  ;;  %s3033_s17 = int_to_ptr.vmem [resolvable:$false] %s3032_s17 }
 0x26f   : > { %1989 = vrot.lane.b32.xlu1 %v1986_v18, %s5980_s12  ;;  %v1087_v7 = vmul.f32 %v5047_v54, %v4799_v46  ;;  %v1448_v16 = vadd.f32 %v1443_v45, %v1428_v60  ;;  %v1019_v4 = vpop.permute.xlu1 %1018  ;;  %v6140_v44 = vrot.slane %v5138_v52, 6  ;;  %v5201_v46 = vmul.f32 %v4591_v38, %v5191_v59  ;;  %v6142_v52 = vld [vmem:[#allocation52_spill] sm:$0xff]  ;;  %s3034_s24 = scalar_lea.vmem %s3033_s17, 64 }
 0x270   : > { %v1003_v5 = vadd.f32 %v6139_v41, %v983_v3  ;;  %v6141_v41 = vrot.slane %v4783_v14, 5  ;;  %v2025_v45 = vrot.slane %v2018_v34, 5  ;;  %v2038_v60 = vmul.f32 %v4706_v50, %v4835_v57 }
 0x271   : > { %v2257_v18 = vsel %vm2182_vm9, %v2255_v32, %v6140_v44  ;;  %v1468_v32 = vadd.f32 %v6142_v52, %v1448_v16  ;;  %v1104_v44 = vmul.f32 %v4706_v50, %v4823_v51  ;;  %v2275_v3 = vrot.slane %v2269_v20, 6 }
 0x272   : > { %v1023_v1 = vadd.f32 %v1019_v4, %v1003_v5  ;;  %2260 = vrot.lane.b32.xlu0 %v2257_v18, %s5980_s12  ;;  %v2006_v42 = vsel %vm1909_vm8, %v6141_v41, %v2005_v9  ;;  %v2289_v5 = vmul.f32 %v5147_v56, %v5191_v59  ;;  %v6143_v4 = vld [vmem:[#allocation58_spill] sm:$0xff]  ;;  %v1563_v14 = vpop.permute.xlu0 %1562  ;;  %v1095_v36 = vrot.slane %v1087_v7, 2 }
 0x273   : > { %2009 = vrot.lane.b32.xlu1 %v2006_v42, %s5980_s12  ;;  %v5218_v9 = vmul.f32 %v5176_v8, %v5181_v63  ;;  %v5221_v57 = vstv %s5158_s16  ;;  %v1488_v42 = vadd.f32 %v1483_v35, %v1468_v32  ;;  %v1059_v52 = vpop.permute.xlu1 %1058  ;;  %v6144_v51 = vrot.slane %v5166_v58, 6 }
 0x274   : > { %v1043_v18 = vadd.f32 %v6143_v4, %v1023_v1  ;;  %v5231_v7 = vmul.f32 %v4428_v26, %v5221_v57  ;;  %v6145_v1 = vrot.slane %v4812_v21, 5  ;;  %v2045_v35 = vrot.slane %v2038_v60, 5  ;;  %v6146_v4 = vld [vmem:[#allocation55_spill] sm:$0xff] }
 0x275   : > { %v2277_v34 = vsel %vm2182_vm9, %v2275_v3, %v6144_v51  ;;  %v2058_v32 = vmul.f32 %v5047_v54, %v4864_v39  ;;  %v1508_v3 = vadd.f32 %v6146_v4, %v1488_v42  ;;  %v1111_v51 = vrot.slane %v1104_v44, 2 }
 0x276   : > { %v1063_v16 = vadd.f32 %v1059_v52, %v1043_v18  ;;  %2280 = vrot.lane.b32.xlu0 %v2277_v34, %s5980_s12  ;;  %v2026_v41 = vsel %vm1909_vm8, %v6145_v1, %v2025_v45  ;;  %v2295_v20 = vrot.slane %v2289_v5, 6  ;;  %v2309_v26 = vmul.f32 %v5176_v8, %v5221_v57  ;;  %v1603_v60 = vpop.permute.xlu0 %1602 }
 0x277   : > { %2029 = vrot.lane.b32.xlu1 %v2026_v41, %s5981_s13  ;;  %v6147_v18 = vrot.slane %v4832_v22, 2  ;;  %v1637_v45 = vrot.slane %v5188_v17, 4  ;;  %v5249_v34 = vstv %s5193_s18  ;;  %v1528_v39 = vadd.f32 %v1523_v23, %v1508_v3  ;;  %v1132_v44 = vpop.permute.xlu1 %1131  ;;  %v6150_v41 = vld [vmem:[#allocation57_spill] sm:$0xff] }
 0x278   : > { %v1083_v21 = vadd.f32 %v4666_v25, %v1063_v16  ;;  %v6148_v5 = vrot.slane %v5201_v46, 6  ;;  %v2316_v1 = vrot.slane %v5231_v7, 6  ;;  %v5259_v22 = vmul.f32 %v4591_v38, %v5249_v34 }
 0x279   : > { %v1096_v52 = vsel %vm1091_vm6, %v6147_v18, %v1095_v36  ;;  %v6149_v36 = vrot.slane %v4847_v40, 5  ;;  %v2065_v23 = vrot.slane %v2058_v32, 5  ;;  %v2078_v16 = vmul.f32 %v4706_v50, %v4900_v2 }
 0x27a   : > { %v2297_v42 = vsel %vm2182_vm9, %v2295_v20, %v6148_v5  ;;  %v1100_v25 = vadd.f32 %v1096_v52, %v1083_v21  ;;  %v1548_v20 = vadd.f32 %v6150_v41, %v1528_v39  ;;  %v6151_v4 = vrot.slane %v4855_v24, 2  ;;  %v1675_v24 = vpop.permute.xlu0 %1674 }
 0x27b   : > { %2300 = vrot.lane.b32.xlu0 %v2297_v42, %s5981_s13  ;;  %v2046_v17 = vsel %vm1909_vm8, %v6149_v36, %v2045_v35  ;;  %v2315_v18 = vrot.slane %v2309_v26, 6  ;;  %v2329_v52 = vmul.f32 %v5147_v56, %v5249_v34  ;;  %v5276_v40 = vmul.f32 %v4591_v38, %v5156_v12  ;;  %v5278_v35 = vld [vmem:[#allocation4 + $0x20] sm:$0xff]  ;;  %v1172_v26 = vpop.permute.xlu1 %1171 }
 0x27c   : > { %v1112_v3 = vsel %vm1091_vm6, %v6151_v4, %v1111_v51  ;;  %2049 = vrot.lane.b32.xlu1 %v2046_v17, %s5981_s13  ;;  %v5282_v2 = vmul.f32 %v5278_v35, %v5181_v63  ;;  %v5285_v32 = vstv %s5223_s30  ;;  %v1568_v51 = vadd.f32 %v1563_v14, %v1548_v20 }
 0x27d   : > { %v1116_v21 = vadd.f32 %v1112_v3, %v1100_v25  ;;  %v2317_v39 = vsel %vm2182_vm9, %v2315_v18, %v2316_v1  ;;  %v5936_v5 = vrot.slane %v5259_v22, 6  ;;  %v5295_v42 = vmul.f32 %v5278_v35, %v5285_v32 }
 0x27e   : > { %v6152_v36 = vrot.slane %v4880_v43, 5  ;;  %v2085_v14 = vrot.slane %v2078_v16, 5  ;;  %v2098_v41 = vmul.f32 %v5047_v54, %v4928_v29  ;;  %v1588_v20 = vadd.f32 %v4661_v61, %v1568_v51  ;;  %v1695_v16 = vpop.permute.xlu0 %1694 }
 0x27f   : > { %v1136_v25 = vadd.f32 %v1132_v44, %v1116_v21  ;;  %2320 = vrot.lane.b32.xlu0 %v2317_v39, %s5981_s13  ;;  %v1653_v4 = vrot.slane %v5218_v9, 4  ;;  %v2335_v3 = vrot.slane %v2329_v52, 6  ;;  %v2349_v44 = vmul.f32 %v5176_v8, %v5285_v32  ;;  %v1212_v29 = vpop.permute.xlu1 %1211 }
 0x280   : > { %v2066_v17 = vsel %vm1909_vm8, %v6152_v36, %v2065_v23  ;;  %v1638_v18 = vrot.slane %v5276_v40, 4  ;;  %v5937_v43 = vrot.slane %v5282_v2, 4  ;;  %v5312_v21 = vstv %s5251_s22 }
 0x281   : > { %2069 = vrot.lane.b32.xlu1 %v2066_v17, %s5976_s7  ;;  %v1156_v23 = vadd.f32 %v4692_v0, %v1136_v25  ;;  %v1608_v61 = vadd.f32 %v1603_v60, %v1588_v20  ;;  %v2337_v9 = vsel %vm2182_vm9, %v2335_v3, %v5936_v5  ;;  %v2356_v52 = vrot.slane %v5295_v42, 6  ;;  %v6154_v17 = vld [vmem:[#allocation59_spill] sm:$0xff] }
 0x282   : > { %v5322_v51 = vmul.f32 %v4591_v38, %v5312_v21  ;;  %v6153_v0 = vrot.slane %v4912_v55, 5  ;;  %v2105_v60 = vrot.slane %v2098_v41, 5  ;;  %v2118_v36 = vmul.f32 %v4706_v50, %v4951_v37 }
 0x283   : > { %v1176_v39 = vadd.f32 %v1172_v26, %v1156_v23  ;;  %2340 = vrot.lane.b32.xlu0 %v2337_v9, %s5976_s7  ;;  %v1628_v20 = vadd.f32 %v6154_v17, %v1608_v61  ;;  %v2355_v3 = vrot.slane %v2349_v44, 6  ;;  %v2369_v5 = vmul.f32 %v5147_v56, %v5312_v21  ;;  %v1715_v23 = vpop.permute.xlu0 %1714  ;;  %v1252_v44 = vpop.permute.xlu1 %1251 }
 0x284   : > { %v2086_v25 = vsel %vm1909_vm8, %v6153_v0, %v2085_v14  ;;  %v1639_v26 = vsel %vm204_vm0, %v1637_v45, %v1638_v18  ;;  %v1655_v55 = vsel %vm204_vm0, %v1653_v4, %v5937_v43  ;;  %v6155_v14 = vld [vmem:[#allocation60_spill] sm:$0xff]  ;;  %v5342_v37 = vstv %s5287_s23 }
 0x285   : > { %2089 = vrot.lane.b32.xlu1 %v2086_v25, %s5976_s7  ;;  %v1196_v41 = vadd.f32 %v6155_v14, %v1176_v39  ;;  %v1644_v61 = vadd.f32 %v1639_v26, %v1628_v20  ;;  %v2357_v9 = vsel %vm2182_vm9, %v2355_v3, %v2356_v52  ;;  %v2376_v45 = vrot.slane %v5322_v51, 6 }
 0x286   : > { %v5352_v0 = vmul.f32 %v5278_v35, %v5342_v37  ;;  %v6156_v39 = vrot.slane %v4942_v48, 5  ;;  %v2125_v17 = vrot.slane %v2118_v36, 5  ;;  %v2138_v20 = vmul.f32 %v5047_v54, %v4996_v19 }
 0x287   : > { %v1216_v4 = vadd.f32 %v1212_v29, %v1196_v41  ;;  %2360 = vrot.lane.b32.xlu0 %v2357_v9, %s5976_s7  ;;  %v1660_v26 = vadd.f32 %v1655_v55, %v1644_v61  ;;  %v2375_v3 = vrot.slane %v2369_v5, 6  ;;  %v2389_v14 = vmul.f32 %v5176_v8, %v5342_v37  ;;  %v1735_v29 = vpop.permute.xlu0 %1734  ;;  %v1292_v48 = vpop.permute.xlu1 %1291 }
 0x288   : > { %v2106_v25 = vsel %vm1909_vm8, %v6156_v39, %v2105_v60  ;;  %v5365_v41 = vstv %s5314_s29  ;;  %v2396_v19 = vrot.slane %v5352_v0, 6  ;;  %v2158_v61 = vmul.f32 %v4706_v50, %v5028_v13 }
 0x289   : > { %2109 = vrot.lane.b32.xlu1 %v2106_v25, %s5977_s15  ;;  %v1236_v43 = vadd.f32 %v4747_v11, %v1216_v4  ;;  %v1680_v9 = vadd.f32 %v1675_v24, %v1660_v26  ;;  %v2377_v60 = vsel %vm2182_vm9, %v2375_v3, %v2376_v45  ;;  %v5373_v5 = vmul.f32 %v4591_v38, %v5365_v41 }
 0x28a   : > { %v6157_v11 = vrot.slane %v4973_v10, 5  ;;  %v2145_v24 = vrot.slane %v2138_v20, 5  ;;  %v2395_v39 = vrot.slane %v2389_v14, 6  ;;  %v2409_v25 = vmul.f32 %v5147_v56, %v5365_v41 }
 0x28b   : > { %v1256_v36 = vadd.f32 %v1252_v44, %v1236_v43  ;;  %2380 = vrot.lane.b32.xlu0 %v2377_v60, %s5977_s15  ;;  %v1700_v4 = vadd.f32 %v1695_v16, %v1680_v9  ;;  %v1755_v43 = vpop.permute.xlu0 %1754  ;;  %v5386_v44 = vstv %s5344_s6  ;;  %v1360_v10 = vmul.f32 %v5047_v54, %v4961_v27 }
 0x28c   : > { %v2126_v55 = vsel %vm1909_vm8, %v6157_v11, %v2125_v17  ;;  %v1332_v17 = vpop.permute.xlu1 %1331  ;;  %v2397_v13 = vsel %vm2182_vm9, %v2395_v39, %v2396_v19  ;;  %v2416_v16 = vrot.slane %v5373_v5, 6  ;;  %v5396_v20 = vmul.f32 %v5278_v35, %v5386_v44 }
 0x28d   : > { %2129 = vrot.lane.b32.xlu1 %v2126_v55, %s5977_s15  ;;  %v1276_v38 = vadd.f32 %v4775_v49, %v1256_v36  ;;  %v6158_v49 = vrot.slane %v5008_v6, 5  ;;  %v2165_v3 = vrot.slane %v2158_v61, 5  ;;  %v2211_v27 = vmul.f32 %v5047_v54, %v5067_v15 }
 0x28e   : > { %v1720_v14 = vadd.f32 %v1715_v23, %v1700_v4  ;;  %v1377_v9 = vmul.f32 %v4706_v50, %v4993_v47  ;;  %v2415_v60 = vrot.slane %v2409_v25, 6  ;;  %v2429_v35 = vmul.f32 %v5176_v8, %v5386_v44 }
 0x28f   : > { %v1296_v56 = vadd.f32 %v1292_v48, %v1276_v38  ;;  %2400 = vrot.lane.b32.xlu0 %v2397_v13, %s5977_s15  ;;  %v2146_v26 = vsel %vm1909_vm8, %v6158_v49, %v2145_v24  ;;  %v6159_v48 = vld [vmem:[#allocation61_spill] sm:$0xff]  ;;  %v1775_v11 = vpop.permute.xlu0 %1774  ;;  %v1368_v6 = vrot.slane %v1360_v10, 3  ;;  %v2436_v15 = vrot.slane %v5396_v20, 6  ;;  %v6161_v10 = vld [vmem:[#allocation62_spill] sm:$0xff] }
 0x290   : > { %v1405_v55 = vpop.permute.xlu1 %1404  ;;  %v2417_v24 = vsel %vm2182_vm9, %v2415_v60, %v2416_v16  ;;  %v6160_v47 = vrot.slane %v5040_v30, 5  ;;  %v2218_v4 = vrot.slane %v2211_v27, 6  ;;  %v2231_v8 = vmul.f32 %v4706_v50, %v5094_v62 }
 0x291   : > { %2149 = vrot.lane.b32.xlu1 %v2146_v26, %s5978_s0  ;;  %v1316_v36 = vadd.f32 %v6159_v48, %v1296_v56  ;;  %v1740_v39 = vadd.f32 %v1735_v29, %v1720_v14  ;;  %v1384_v25 = vrot.slane %v1377_v9, 3  ;;  %v2435_v38 = vrot.slane %v2429_v35, 6 }
 0x292   : > { %v2166_v61 = vsel %vm1909_vm8, %v6160_v47, %v2165_v3  ;;  %v6163_v62 = vrot.slane %v5077_v53, 6  ;;  %v2238_v27 = vrot.slane %v2231_v8, 6  ;;  %v2251_v14 = vmul.f32 %v5047_v54, %v5128_v31 }
 0x293   : > { %v1336_v23 = vadd.f32 %v1332_v17, %v1316_v36  ;;  %2420 = vrot.lane.b32.xlu0 %v2417_v24, %s5978_s0  ;;  %v1795_v56 = vpop.permute.xlu0 %1794  ;;  %v6162_v17 = vrot.slane %v5060_v28, 3  ;;  %v2437_v30 = vsel %vm2182_vm9, %v2435_v38, %v2436_v15  ;;  %v1760_v9 = vadd.f32 %v1755_v43, %v1740_v39  ;;  %v6165_v24 = vld [vmem:[#allocation30_spill] sm:$0xff]  ;;  %v6169_v38 = vld [vmem:[#allocation32_spill] sm:$0xff] }
 0x294   : > { %v1445_v26 = vpop.permute.xlu1 %1444  ;;  %v2219_v29 = vsel %vm2182_vm9, %v6163_v62, %v2218_v4  ;;  %v6164_v28 = vrot.slane %v5064_v33, 3  ;;  %v2258_v47 = vrot.slane %v2251_v14, 6  ;;  %v6168_v33 = vld [vmem:[#allocation63_spill] sm:$0xff] }
 0x295   : > { %2169 = vrot.lane.b32.xlu1 %v2166_v61, %s5978_s0  ;;  %v1356_v13 = vadd.f32 %v6161_v10, %v1336_v23  ;;  %v1369_v49 = vsel %vm1364_vm7, %v6162_v17, %v1368_v6  ;;  %v6166_v23 = vrot.slane %v6165_v24, 6  ;;  %v6167_v61 = vld [vmem:[#allocation33_spill] sm:$0xff]  ;;  %v1780_v31 = vadd.f32 %v1775_v11, %v1760_v9  ;;  %v5455_v9 = vld [vmem:[#allocation4 + $0x28] sm:$0x3f] }
 0x296   : > { %v1385_v60 = vsel %vm1364_vm7, %v6164_v28, %v1384_v25  ;;  %v2271_v4 = vmul.f32 %v4706_v50, %v6167_v61  ;;  %v6170_v10 = vrot.slane %v6169_v38, 6  ;;  %v2291_v17 = vmul.f32 %v5047_v54, %v5191_v59  ;;  %v6171_v50 = vld [vmem:[#allocation64_spill] sm:$0xff]  ;;  %v6176_v38 = vld [vmem:[#allocation43_spill] sm:$0xff] }
 0x297   : > { %v1373_v3 = vadd.f32 %v1369_v49, %v1356_v13  ;;  %2440 = vrot.lane.b32.xlu0 %v2437_v30, %s5978_s0  ;;  %v1815_v48 = vpop.permute.xlu0 %1814  ;;  %v2239_v53 = vsel %vm2182_vm9, %v6166_v23, %v2238_v27  ;;  %v1800_v49 = vadd.f32 %v1795_v56, %v1780_v31  ;;  %v6172_v27 = vrot.slane %v5166_v58, 6  ;;  %v6173_v56 = vld [vmem:[#allocation65_spill] sm:$0xff] }
 0x298   : > { %v1485_v36 = vpop.permute.xlu1 %1484  ;;  %v2278_v13 = vrot.slane %v2271_v4, 6  ;;  %v2298_v14 = vrot.slane %v2291_v17, 6  ;;  %v2311_v28 = vmul.f32 %v5455_v9, %v5221_v57  ;;  %v6175_v57 = vld [vmem:[#allocation27_spill] sm:$0xff]  ;;  %v1633_v31 = vmul.f32 %v5047_v54, %v5156_v12 }
 0x299   : > { %2222 = vrot.lane.b32.xlu1 %v2219_v29, %s5979_s27  ;;  %v1389_v35 = vadd.f32 %v1385_v60, %v1373_v3  ;;  %v1820_v3 = vadd.f32 %v1815_v48, %v1800_v49  ;;  %v6178_v49 = vld [vmem:[#allocation44_spill] sm:$0xff] }
 0x29a   : > { %v2318_v23 = vrot.slane %v2311_v28, 6  ;;  %v1640_v17 = vrot.slane %v1633_v31, 4 }
 0x29b   : > { %v1409_v6 = vadd.f32 %v1405_v55, %v1389_v35  ;;  %v1835_v8 = vpop.permute.xlu0 %1834  ;;  %v2259_v55 = vsel %vm2182_vm9, %v6170_v10, %v2258_v47 }
 0x29c   : > { %v1525_v39 = vpop.permute.xlu1 %1524  ;;  %v1840_v59 = vadd.f32 %v1835_v8, %v1820_v3 }
 0x29d   : > { %2242 = vrot.lane.b32.xlu1 %v2239_v53, %s5979_s27  ;;  %v1429_v43 = vadd.f32 %v6168_v33, %v1409_v6  ;;  %v2331_v53 = vmul.f32 %v5047_v54, %v5249_v34  ;;  %v2351_v34 = vmul.f32 %v5455_v9, %v5285_v32  ;;  %s6202_s27 = smov 32  }
 0x29f   : > { %v1449_v25 = vadd.f32 %v1445_v26, %v1429_v43  ;;  %v1855_v30 = vpop.permute.xlu0 %1854  ;;  %v2279_v26 = vsel %vm2182_vm9, %v6172_v27, %v2278_v13  ;;  %v2358_v32 = vrot.slane %v2351_v34, 6 }
 0x2a0   : > { %v1565_v62 = vpop.permute.xlu1 %1564  ;;  %v1860_v6 = vadd.f32 %v1855_v30, %v1840_v59 }
 0x2a1   : > { %2262 = vrot.lane.b32.xlu1 %v2259_v55, %s5980_s12  ;;  %v1469_v11 = vadd.f32 %v6171_v50, %v1449_v25  ;;  %v1649_v25 = vmul.f32 %v5455_v9, %v5181_v63  ;;  %v6177_v55 = vld [vmem:[#allocation54_spill] sm:$0xff]  ;;  %v2371_v63 = vmul.f32 %v5047_v54, %v5312_v21  ;;  %v2391_v21 = vmul.f32 %v5455_v9, %v5342_v37 }
 0x2a3   : > { %v1489_v29 = vadd.f32 %v1485_v36, %v1469_v11  ;;  %v1875_v35 = vpop.permute.xlu0 %1874  ;;  %v6174_v36 = vrot.slane %v5201_v46, 6  ;;  %v2319_v46 = vsel %vm2182_vm9, %v2316_v1, %v2318_v23  ;;  %v6179_v1 = vrot.slane %v5259_v22, 6 }
 0x2a4   : > { %v1605_v48 = vpop.permute.xlu1 %1604  ;;  %v1880_v47 = vadd.f32 %v1875_v35, %v1860_v6  ;;  %v1656_v3 = vrot.slane %v1649_v25, 4  ;;  %v2359_v22 = vsel %vm2182_vm9, %v2356_v52, %v2358_v32  ;;  %v2378_v59 = vrot.slane %v2371_v63, 6 }
 0x2a5   : > { %2282 = vrot.lane.b32.xlu1 %v2279_v26, %s5980_s12  ;;  %v1509_v60 = vadd.f32 %v6173_v56, %v1489_v29  ;;  %v2299_v58 = vsel %vm2182_vm9, %v6174_v36, %v2298_v14  ;;  %v1641_v26 = vsel %vm204_vm0, %v1638_v18, %v1640_v17  ;;  %v6181_v56 = vrot.slane %v5282_v2, 4 }
 0x2a6   : > { %v2379_v42 = vsel %vm2182_vm9, %v2376_v45, %v2378_v59  ;;  %v2411_v52 = vmul.f32 %v5047_v54, %v5365_v41  ;;  %v2431_v23 = vmul.f32 %v5455_v9, %v5386_v44 }
 0x2a7   : > { %v1529_v24 = vadd.f32 %v1525_v39, %v1509_v60  ;;  %v1895_v4 = vpop.permute.xlu0 %1894  ;;  %v2338_v39 = vrot.slane %v2331_v53, 6  ;;  %v1657_v60 = vsel %vm204_vm0, %v6181_v56, %v1656_v3 }
 0x2a8   : > { %v1900_v33 = vadd.f32 %v1895_v4, %v1880_v47  ;;  %v1677_v43 = vpop.permute.xlu1 %1676  ;;  %v2438_v47 = vrot.slane %v2431_v23, 6 }
 0x2a9   : > { %2302 = vrot.lane.b32.xlu1 %v2299_v58, %s5981_s13  ;;  %v1549_v61 = vadd.f32 %v6175_v57, %v1529_v24  ;;  %v2339_v30 = vsel %vm2182_vm9, %v6179_v1, %v2338_v39  ;;  %v2418_v58 = vrot.slane %v2411_v52, 6  ;;  %v6188_v52 = vld [vmem:[#allocation31_spill] sm:$0xff] }
 0x2aa   : > { %v1917_v10 = vadd.f32 %v6176_v38, %v1900_v33  ;;  %v2439_v44 = vsel %vm2182_vm9, %v2436_v15, %v2438_v47 }
 0x2ab   : > { %v1569_v8 = vadd.f32 %v1565_v62, %v1549_v61  ;;  %v1948_v13 = vpop.permute.xlu0 %1947  ;;  %v6180_v62 = vld [vmem:[#allocation29_spill] sm:$0xff]  ;;  %v2419_v41 = vsel %vm2182_vm9, %v2416_v16, %v2418_v58 }
 0x2ac   : > { %v1933_v50 = vadd.f32 %v6178_v49, %v1917_v10  ;;  %v1697_v7 = vpop.permute.xlu1 %1696 }
 0x2ad   : > { %2322 = vrot.lane.b32.xlu1 %v2319_v46, %s5981_s13  ;;  %v1589_v12 = vadd.f32 %v6177_v55, %v1569_v8  ;;  %s6203_s13 = smov 64  }
 0x2ae   : > { %v1953_v61 = vadd.f32 %v1948_v13, %v1933_v50  ;;  %v6182_v13 = vld [vmem:[#allocation37_spill] sm:$0xff] }
 0x2af   : > { %v1609_v11 = vadd.f32 %v1605_v48, %v1589_v12  ;;  %v1968_v27 = vpop.permute.xlu0 %1967  ;;  %v2398_v48 = vrot.slane %v2391_v21, 6  ;;  %v1905_v15 = vmul.f32 %v5047_v54, %v6182_v13 }
 0x2b0   : > { %v1717_v14 = vpop.permute.xlu1 %1716  ;;  %v1973_v33 = vadd.f32 %v1968_v27, %v1953_v61 }
 0x2b1   : > { %2342 = vrot.lane.b32.xlu1 %v2339_v30, %s5976_s7  ;;  %v1629_v29 = vadd.f32 %v6180_v62, %v1609_v11  ;;  %v2399_v36 = vsel %vm2182_vm9, %v2396_v19, %v2398_v48  ;;  %v6183_v11 = vld [vmem:[#allocation38_spill] sm:$0xff]  ;;  %v1913_v63 = vrot.slane %v1905_v15, 5 }
 0x2b2   : > { %v1922_v1 = vmul.f32 %v5455_v9, %v6183_v11 }
 0x2b3   : > { %v1645_v28 = vadd.f32 %v1641_v26, %v1629_v29  ;;  %v1988_v40 = vpop.permute.xlu0 %1987 }
 0x2b4   : > { %v1737_v6 = vpop.permute.xlu1 %1736  ;;  %v1993_v5 = vadd.f32 %v1988_v40, %v1973_v33  ;;  %v1929_v26 = vrot.slane %v1922_v1, 5  ;;  %v6186_v40 = vld [vmem:[#allocation41_spill] sm:$0xff] }
 0x2b5   : > { %2362 = vrot.lane.b32.xlu1 %v2359_v22, %s5976_s7  ;;  %v1661_v35 = vadd.f32 %v1657_v60, %v1645_v28  ;;  %v6184_v22 = vld [vmem:[#allocation40_spill] sm:$0xff] }
 0x2b6   : > { %v6185_v59 = vrot.slane %v6184_v22, 5 }
 0x2b7   : > { %v1681_v18 = vadd.f32 %v1677_v43, %v1661_v35  ;;  %v2008_v2 = vpop.permute.xlu0 %2007 }
 0x2b8   : > { %v1757_v24 = vpop.permute.xlu1 %1756  ;;  %v2013_v46 = vadd.f32 %v2008_v2, %v1993_v5  ;;  %v1914_v21 = vsel %vm1909_vm8, %v6185_v59, %v1913_v63  ;;  %v6191_v63 = vld [vmem:[#allocation42_spill] sm:$0xff] }
 0x2b9   : > { %2382 = vrot.lane.b32.xlu1 %v2379_v42, %s5977_s15  ;;  %v1701_v37 = vadd.f32 %v1697_v7, %v1681_v18 }
 0x2bb   : > { %v1721_v51 = vadd.f32 %v1717_v14, %v1701_v37  ;;  %v2028_v45 = vpop.permute.xlu0 %2027 }
 0x2bc   : > { %v1777_v53 = vpop.permute.xlu1 %1776  ;;  %v2033_v34 = vadd.f32 %v2028_v45, %v2013_v46 }
 0x2bd   : > { %2402 = vrot.lane.b32.xlu1 %v2399_v36, %s5977_s15  ;;  %v1741_v57 = vadd.f32 %v1737_v6, %v1721_v51  ;;  %v6187_v6 = vrot.slane %v6186_v40, 5  ;;  %s6201_s15 = smov 16  }
 0x2bf   : > { %v2048_v0 = vpop.permute.xlu0 %2047  ;;  %v1761_v4 = vadd.f32 %v1757_v24, %v1741_v57  ;;  %v1930_v18 = vsel %vm1909_vm8, %v6187_v6, %v1929_v26  ;;  %v6189_v24 = vld [vmem:[#allocation28_spill] sm:$0xff] }
 0x2c0   : > { %v1797_v19 = vpop.permute.xlu1 %1796  ;;  %v2053_v10 = vadd.f32 %v2048_v0, %v2033_v34 }
 0x2c1   : > { %2422 = vrot.lane.b32.xlu1 %v2419_v41, %s5978_s0  ;;  %v1781_v8 = vadd.f32 %v1777_v53, %v1761_v4 }
 0x2c3   : > { %v2068_v31 = vpop.permute.xlu0 %2067  ;;  %v1801_v25 = vadd.f32 %v1797_v19, %v1781_v8 }
 0x2c4   : > { %v1817_v43 = vpop.permute.xlu1 %1816  ;;  %v2073_v20 = vadd.f32 %v2068_v31, %v2053_v10 }
 0x2c5   : > { %2442 = vrot.lane.b32.xlu1 %v2439_v44, %s5978_s0  ;;  %v1821_v12 = vadd.f32 %v1817_v43, %v1801_v25  ;;  %s6194_s0 = sld [smem:[#allocation24_spill]] }
 0x2c7   : > { %v2088_v16 = vpop.permute.xlu0 %2087 }
 0x2c8   : > { %v1837_v39 = vpop.permute.xlu1 %1836  ;;  %v2093_v50 = vadd.f32 %v2088_v16, %v2073_v20 }
 0x2c9   : > { %v1841_v17 = vadd.f32 %v1837_v39, %v1821_v12 }
 0x2cb   : > { %v2108_v38 = vpop.permute.xlu0 %2107  ;;  %s2760_s12 = sshll.u32 %s6194_s0, 1  ;;  %s2642_s3 = scalar_lea.sflag [#allocation7], %s6194_s0 }
 0x2cc   : > { %v1857_v55 = vpop.permute.xlu1 %1856  ;;  %v2113_v32 = vadd.f32 %v2108_v38, %v2093_v50  ;;  %v6190_v50 = vld [vmem:[#allocation39_spill] sm:$0xff]  ;;  %s5549_s7 = scalar_lea.vmem [#allocation10], %s2760_s12 }
 0x2cd   : > { %v1861_v30 = vadd.f32 %v1857_v55, %v1841_v17  ;;  %s2656_s2 = sshll.u32 %s5549_s7, 4  ;;  %s5765_s2 = int_to_ptr.vmem [resolvable:$true] %s2656_s2 }
 0x2ce   : > { %s3028_s5 = scalar_lea.vmem %s5765_s2, 32  ;;  %p3035_p4 = scmp.lt.s32.totalorder %s5765_s2, %s3033_s17 }
 0x2cf   : > { %v2128_v49 = vpop.permute.xlu0 %2127  ;;  %p3029_p8 = scmp.ne.s32.totalorder %s5765_s2, %s3028_s5  ;;  %p3036_p9 = scmp.lt.s32.totalorder %s3034_s24, %s3028_s5 }
 0x2d0   : > { %v1877_v7 = vpop.permute.xlu1 %1876  ;;  %v2133_v29 = vadd.f32 %v2128_v49, %v2113_v32 }
 0x2d1   : > { %v1881_v3 = vadd.f32 %v1877_v7, %v1861_v30  ;;  %v2178_v7 = vmul.f32 %v5047_v54, %v6190_v50  ;;  %p3030_p12 = pnand %p3029_p8, %p6248_p2  ;;  %p3037_p13 = por %p3036_p9, %p3035_p4 }
 0x2d3   : > { %v2148_v62 = vpop.permute.xlu0 %2147  ;;  %p3031_p5 = pneg %p3030_p12 }
 0x2d4   : > { %v2153_v28 = vadd.f32 %v2148_v62, %v2133_v29 }
 0x2d5   : > { %v1897_v27 = vpop.permute.xlu1 %1896  ;;  %p3038_p11 = pnand %p3037_p13, %p3031_p5 }
 0x2d6   : > { %v1901_v14 = vadd.f32 %v1897_v27, %v1881_v3  ;;  %v2195_v3 = vmul.f32 %v5455_v9, %v6191_v63  ;;  %v2186_v27 = vrot.slane %v2178_v7, 6 }
 0x2d7   : > { %v2168_v60 = vpop.permute.xlu0 %2167 }
 0x2d8   : > { %v1918_v56 = vadd.f32 %v1914_v21, %v1901_v14  ;;  %v2173_v35 = vadd.f32 %v2168_v60, %v2153_v28  ;;  %v2202_v59 = vrot.slane %v2195_v3, 6  ;;  %v6192_v60 = vld [vmem:[#allocation45_spill] sm:$0xff] }
 0x2d9   : > { %v1950_v42 = vpop.permute.xlu1 %1949 }
 0x2da   : > { %v1934_v48 = vadd.f32 %v1930_v18, %v1918_v56  ;;  %v2190_v37 = vadd.f32 %v6188_v52, %v2173_v35  ;;  %v6193_v35 = vrot.slane %v6192_v60, 6 }
 0x2dc   : > { %v2221_v2 = vpop.permute.xlu0 %2220  ;;  %v2206_v36 = vadd.f32 %v6189_v24, %v2190_v37  ;;  %v1954_v61 = vadd.f32 %v1950_v42, %v1934_v48  ;;  %v2187_v54 = vsel %vm2182_vm9, %v6193_v35, %v2186_v27  ;;  %v6195_v42 = vld [vmem:[#allocation46_spill] sm:$0xff] }
 0x2dd   : > { %v1970_v58 = vpop.permute.xlu1 %1969  ;;  %v6196_v9 = vrot.slane %v6195_v42, 6 }
 0x2de   : > { %v2226_v44 = vadd.f32 %v2221_v2, %v2206_v36  ;;  %v1974_v31 = vadd.f32 %v1970_v58, %v1954_v61  ;;  %v6230_v61 = vmov 0 }
 0x2df   : > { %v2203_v48 = vsel %vm2182_vm9, %v6196_v9, %v2202_v59 }
 0x2e0   : > { %v2241_v23 = vpop.permute.xlu0 %2240 }
 0x2e1   : > { %v1990_v51 = vpop.permute.xlu1 %1989  ;;  %v2246_v5 = vadd.f32 %v2241_v23, %v2226_v44 }
 0x2e2   : > { %v1994_v33 = vadd.f32 %v1990_v51, %v1974_v31  ;;  %v6200_v31 = vld [vmem:[#allocation25_spill] sm:$0xff] }
 0x2e4   : > { %v2261_v45 = vpop.permute.xlu0 %2260 }
 0x2e5   : > { %v2010_v53 = vpop.permute.xlu1 %2009  ;;  %v2266_v46 = vadd.f32 %v2261_v45, %v2246_v5 }
 0x2e6   : > { %v2014_v16 = vadd.f32 %v2010_v53, %v1994_v33 }
 0x2e8   : > { %v2281_v41 = vpop.permute.xlu0 %2280 }
 0x2e9   : > { %v2030_v47 = vpop.permute.xlu1 %2029  ;;  %v2286_v25 = vadd.f32 %v2281_v41, %v2266_v46 }
 0x2ea   : > { %v2034_v39 = vadd.f32 %v2030_v47, %v2014_v16 }
 0x2ed   : > { %v2301_v57 = vpop.permute.xlu0 %2300 }
 0x2ee   : > { %v2050_v0 = vpop.permute.xlu1 %2049  ;;  %v2306_v55 = vadd.f32 %v2301_v57, %v2286_v25 }
 0x2ef   : > { %v2054_v10 = vadd.f32 %v2050_v0, %v2034_v39  ;;  %v6197_v0 = vlaneseq }
 0x2f1   : > { %v2321_v19 = vpop.permute.xlu0 %2320  ;;  %vm5544_vm10 = vcmp.lt.s32.totalorder %v6197_v0, 16  ;;  %vm5583_vm11 = vcmp.ge.s32.totalorder %v6197_v0, 16  ;;  %vm5588_vm12 = vcmp.lt.s32.totalorder %v6197_v0, 32  ;;  %vm5597_vm14 = vcmp.ge.s32.totalorder %v6197_v0, 32 }
 0x2f2   : > { %v2326_v13 = vadd.f32 %v2321_v19, %v2306_v55  ;;  %vm5941_vm13 = vmand %vm5583_vm11, %vm5588_vm12  ;;  %vm5602_vm15 = vcmp.lt.s32.totalorder %v6197_v0, 48  ;;  %vm5623_vm1 = vcmp.ge.s32.totalorder %v6197_v0, 48  ;;  %vm5628_vm2 = vcmp.lt.s32.totalorder %v6197_v0, 64 }
 0x2f3   : > { %v2070_v4 = vpop.permute.xlu1 %2069  ;;  %vm5940_vm0 = vmand %vm5597_vm14, %vm5602_vm15  ;;  %vm5633_vm3 = vcmp.ge.s32.totalorder %v6197_v0, 64  ;;  %vm5638_vm4 = vcmp.lt.s32.totalorder %v6197_v0, 80  ;;  %vm5651_vm7 = vcmp.ge.s32.totalorder %v6197_v0, 80  ;;  %vm5656_vm8 = vcmp.lt.s32.totalorder %v6197_v0, 96 }
 0x2f4   : > { %v2074_v12 = vadd.f32 %v2070_v4, %v2054_v10  ;;  %vm5938_vm5 = vmand %vm5623_vm1, %vm5628_vm2 }
 0x2f5   : > { %v2341_v43 = vpop.permute.xlu0 %2340  ;;  %vm5939_vm6 = vmand %vm5633_vm3, %vm5638_vm4 }
 0x2f6   : > { %v2346_v49 = vadd.f32 %v2341_v43, %v2326_v13  ;;  %vm5942_vm9 = vmand %vm5651_vm7, %vm5656_vm8 }
 0x2f7   : > { %v2090_v8 = vpop.permute.xlu1 %2089 }
 0x2f8   : > { %v2094_v17 = vadd.f32 %v2090_v8, %v2074_v12 }
 0x2f9   : > { %v2361_v34 = vpop.permute.xlu0 %2360 }
 0x2fa   : > { %v2366_v30 = vadd.f32 %v2361_v34, %v2346_v49 }
 0x2fb   : > { %v2110_v38 = vpop.permute.xlu1 %2109 }
 0x2fc   : > { %v2114_v11 = vadd.f32 %v2110_v38, %v2094_v17 }
 0x2fd   : > { %v2381_v20 = vpop.permute.xlu0 %2380 }
 0x2fe   : > { %v2386_v29 = vadd.f32 %v2381_v20, %v2366_v30 }
 0x2ff   : > { %v2130_v15 = vpop.permute.xlu1 %2129 }
 0x300   : > { %v2134_v62 = vadd.f32 %v2130_v15, %v2114_v11 }
 0x301   : > { %v2401_v1 = vpop.permute.xlu0 %2400 }
 0x302   : > { %v2406_v28 = vadd.f32 %v2401_v1, %v2386_v29 }
 0x303   : > { %v2150_v32 = vpop.permute.xlu1 %2149 }
 0x304   : > { %v2154_v26 = vadd.f32 %v2150_v32, %v2134_v62 }
 0x305   : > { %v2421_v14 = vpop.permute.xlu0 %2420 }
 0x306   : > { %v2426_v56 = vadd.f32 %v2421_v14, %v2406_v28 }
 0x307   : > { %v2170_v22 = vpop.permute.xlu1 %2169 }
 0x308   : > { %v2174_v21 = vadd.f32 %v2170_v22, %v2154_v26 }
 0x309   : > { %v2441_v6 = vpop.permute.xlu0 %2440 }
 0x30a   : > { %v2191_v40 = vadd.f32 %v2187_v54, %v2174_v21  ;;  %v2446_v18 = vadd.f32 %v2441_v6, %v2426_v56 }
 0x30b   : > { %v2223_v52 = vpop.permute.xlu1 %2222 }
 0x30c   : > { %v2207_v37 = vadd.f32 %v2203_v48, %v2191_v40  ;;  %v2858_v2 = vmul.f32 -1.442695, %v2446_v18 }
 0x30e   : > { %2965 = vpow2.f32 %v2858_v2  ;;  %v2227_v41 = vadd.f32 %v2223_v52, %v2207_v37 }
 0x30f   : > { %v2243_v24 = vpop.permute.xlu1 %2242 }
 0x310   : > { %v2247_v57 = vadd.f32 %v2243_v24, %v2227_v41 }
 0x313   : > { %v2263_v36 = vpop.permute.xlu1 %2262 }
 0x314   : > { %v2267_v44 = vadd.f32 %v2263_v36, %v2247_v57 }
 0x317   : > { %v2283_v58 = vpop.permute.xlu1 %2282 }
 0x318   : > { %v2966_v23 = vpop.eup %2965  ;;  %v2287_v43 = vadd.f32 %v2283_v58, %v2267_v44 }
 0x319   : > { %v2454_v51 = vadd.f32 1.0, %v2966_v23 }
 0x31b   : > { %v2303_v45 = vpop.permute.xlu1 %2302  ;;  %2967 = vrcp.f32 %v2454_v51 }
 0x31c   : > { %v2307_v8 = vadd.f32 %v2303_v45, %v2287_v43 }
 0x31f   : > { %v2323_v53 = vpop.permute.xlu1 %2322 }
 0x320   : > { %v2327_v25 = vadd.f32 %v2323_v53, %v2307_v8 }
 0x323   : > { %v2343_v47 = vpop.permute.xlu1 %2342 }
 0x324   : > { %v2347_v38 = vadd.f32 %v2343_v47, %v2327_v25 }
 0x325   : > { %v2968_v19 = vpop.eup %2967 }
 0x326   : > { %v2470_v33 = vrot.slane %v2968_v19, %v6200_v31  ;;  %2462 = vst.msk [vmem:[%s5549_s7] sm:$0x1] %vm5544_vm10, %v2968_v19  ;;  %v2509_v34 = vcombine.high %v2968_v19, %v2968_v19 }
 0x327   : > { %v2363_v4 = vpop.permute.xlu1 %2362 }
 0x328   : > { %v2471_v5 = vcombine.high %v2470_v33, %v2470_v33  ;;  %v2478_v39 = vrot.slane %v2470_v33, %v6200_v31  ;;  %v2516_v12 = vrot.slane %v2509_v34, %v6200_v31  ;;  %v2367_v20 = vadd.f32 %v2363_v4, %v2347_v38 }
 0x32a   : > { %v2485_v46 = vrot.slane %v2471_v5, %v6200_v31  ;;  %v2493_v55 = vcombine.high %v2478_v39, %v2478_v39  ;;  %v2523_v17 = vrot.slane %v2516_v12, %v6200_v31  ;;  %v2531_v1 = vcombine.high %v2516_v12, %v2516_v12 }
 0x32b   : > { %v2383_v16 = vpop.permute.xlu1 %2382 }
 0x32c   : > { %2486 = vrot.lane.b32.xlu0 %v2485_v46, %s6201_s15  ;;  %v2387_v13 = vadd.f32 %v2383_v16, %v2367_v20  ;;  %v2501_v11 = vcombine.high %v2485_v46, %v2485_v46  ;;  %v2538_v63 = vrot.slane %v2531_v1, %v6200_v31  ;;  %v2546_v3 = vcombine.high %v2523_v17, %v2523_v17 }
 0x32e   : > { %v2554_v62 = vcombine.high %v2538_v63, %v2538_v63 }
 0x32f   : > { %v2403_v10 = vpop.permute.xlu1 %2402 }
 0x330   : > { %2494 = vrot.lane.b32.xlu0 %v2493_v55, %s6202_s27  ;;  %v2407_v49 = vadd.f32 %v2403_v10, %v2387_v13 }
 0x333   : > { %v2423_v15 = vpop.permute.xlu1 %2422 }
 0x334   : > { %2524 = vrot.lane.b32.xlu0 %v2523_v17, %s6203_s13  ;;  %v2427_v50 = vadd.f32 %v2423_v15, %v2407_v49 }
 0x337   : > { %v2443_v7 = vpop.permute.xlu1 %2442 }
 0x338   : > { %v2447_v30 = vadd.f32 %v2443_v7, %v2427_v50  ;;  %2502 = vrot.lane.b32.xlu0 %v2501_v11, %s6204_s4 }
 0x33a   : > { %v2859_v32 = vmul.f32 -1.442695, %v2447_v30 }
 0x33c   : > { %2969 = vpow2.f32 %v2859_v32  ;;  %2539 = vrot.lane.b32.xlu0 %v2538_v63, %s6205_s8 }
 0x340   : > { %2547 = vrot.lane.b32.xlu0 %v2546_v3, %s6206_s25 }
 0x344   : > { %2555 = vrot.lane.b32.xlu0 %v2554_v62, %s6207_s19 }
 0x346   : > { %v2970_v29 = vpop.eup %2969 }
 0x347   : > { %v2455_v27 = vadd.f32 1.0, %v2970_v29 }
 0x349   : > { %2971 = vrcp.f32 %v2455_v27 }
 0x353   : > { %v2972_v26 = vpop.eup %2971 }
 0x354   : > { %v2570_v14 = vrot.slane %v2972_v26, %v6200_v31  ;;  %2562 = vst.msk [vmem:[%s5549_s7 + $0x1] sm:$0x1] %vm5544_vm10, %v2972_v26  ;;  %v2600_v21 = vcombine.high %v2972_v26, %v2972_v26  ;;  %vm5677_vm10 = vcmp.ge.s32.totalorder %v6197_v0, 96 }
 0x356   : > { %v2571_v28 = vcombine.high %v2570_v14, %v2570_v14  ;;  %v2578_v59 = vrot.slane %v2570_v14, %v6200_v31  ;;  %v2607_v60 = vrot.slane %v2600_v21, %v6200_v31 }
 0x358   : > { %v2585_v22 = vrot.slane %v2571_v28, %v6200_v31  ;;  %v2590_v56 = vcombine.high %v2578_v59, %v2578_v59  ;;  %v2614_v35 = vrot.slane %v2607_v60, %v6200_v31  ;;  %v2619_v40 = vcombine.high %v2607_v60, %v2607_v60 }
 0x35a   : > { %2586 = vrot.lane.b32.xlu1 %v2585_v22, %s6201_s15  ;;  %v2595_v54 = vcombine.high %v2585_v22, %v2585_v22  ;;  %v2626_v6 = vrot.slane %v2619_v40, %v6200_v31  ;;  %v2631_v18 = vcombine.high %v2614_v35, %v2614_v35 }
 0x35c   : > { %v2636_v42 = vcombine.high %v2626_v6, %v2626_v6 }
 0x35e   : > { %2591 = vrot.lane.b32.xlu1 %v2590_v56, %s6202_s27 }
 0x362   : > { %2615 = vrot.lane.b32.xlu1 %v2614_v35, %s6203_s13 }
 0x366   : > { %2596 = vrot.lane.b32.xlu1 %v2595_v54, %s6204_s4 }
 0x36a   : > { %2627 = vrot.lane.b32.xlu1 %v2626_v6, %s6205_s8 }
 0x36e   : > { %2632 = vrot.lane.b32.xlu1 %v2631_v18, %s6206_s25 }
 0x372   : > { %2637 = vrot.lane.b32.xlu1 %v2636_v42, %s6207_s19 }
 0x39e   : > { %v2487_v2 = vpop.permute.xlu0 %2486 }
 0x39f   : > { %2492 = vst.msk [vmem:[%s5549_s7] sm:$0x1] %vm5941_vm13, %v2487_v2  ;;  %vm5702_vm13 = vcmp.lt.s32.totalorder %v6197_v0, 128 }
 0x3a2   : > { %v2495_v24 = vpop.permute.xlu0 %2494 }
 0x3a3   : > { %2500 = vst.msk [vmem:[%s5549_s7] sm:$0x1] %vm5940_vm0, %v2495_v24  ;;  %vm5697_vm0 = vcmp.ge.s32.totalorder %v6197_v0, 112 }
 0x3a6   : > { %v2525_v23 = vpop.permute.xlu0 %2524 }
 0x3aa   : > { %v2503_v47 = vpop.permute.xlu0 %2502 }
 0x3ab   : > { %2508 = vst.msk [vmem:[%s5549_s7] sm:$0x1] %vm5938_vm5, %v2503_v47  ;;  %vm5682_vm5 = vcmp.lt.s32.totalorder %v6197_v0, 112 }
 0x3ac   : > { %2530 = vst.msk [vmem:[%s5549_s7] sm:$0x1] %vm5939_vm6, %v2525_v23  ;;  %v6231_v61 = vsel %vm5682_vm5, 4294967295, %v6230_v61  ;;  %vm5943_vm6 = vmand %vm5677_vm10, %vm5682_vm5 }
 0x3ad   : > { %vm6238_vm5 = vmand %vm5597_vm14, %vm5602_vm15  ;;  %vm6243_vm14 = vnez %v6231_v61 }
 0x3ae   : > { %v2540_v19 = vpop.permute.xlu0 %2539  ;;  %vm6244_vm15 = vmand %vm5677_vm10, %vm6243_vm14 }
 0x3af   : > { %2545 = vst.msk [vmem:[%s5549_s7] sm:$0x1] %vm5942_vm9, %v2540_v19  ;;  %vm5945_vm9 = vmand %vm5697_vm0, %vm5702_vm13 }
 0x3b2   : > { %v2548_v31 = vpop.permute.xlu0 %2547 }
 0x3b3   : > { %2553 = vst.msk [vmem:[%s5549_s7] sm:$0x1] %vm5943_vm6, %v2548_v31  ;;  %vm6237_vm6 = vmand %vm5583_vm11, %vm5588_vm12 }
 0x3b4   : > { %vm6241_vm11 = vmand %vm5633_vm3, %vm5638_vm4 }
 0x3b5   : > { %vm6242_vm12 = vmand %vm5651_vm7, %vm5656_vm8 }
 0x3b6   : > { %v2556_v33 = vpop.permute.xlu0 %2555 }
 0x3b7   : > { %2561 = vst.msk [vmem:[%s5549_s7] sm:$0x1] %vm5945_vm9, %v2556_v33  ;;  %vm6239_vm9 = vmand %vm5623_vm1, %vm5628_vm2 }
 0x3b8   : > { %vm6247_vm1 = vmand %vm5697_vm0, %vm5702_vm13 }
 0x3cc   : > { %v2587_v0 = vpop.permute.xlu1 %2586 }
 0x3cd   : > { %2589 = vst.msk [vmem:[%s5549_s7 + $0x1] sm:$0x1] %vm6237_vm6, %v2587_v0 }
 0x3d0   : > { %v2592_v43 = vpop.permute.xlu1 %2591 }
 0x3d1   : > { %2594 = vst.msk [vmem:[%s5549_s7 + $0x1] sm:$0x1] %vm6238_vm5, %v2592_v43 }
 0x3d4   : > { %v2616_v5 = vpop.permute.xlu1 %2615 }
 0x3d8   : > { %v2597_v8 = vpop.permute.xlu1 %2596 }
 0x3d9   : > { %2599 = vst.msk [vmem:[%s5549_s7 + $0x1] sm:$0x1] %vm6239_vm9, %v2597_v8 }
 0x3da   : > { %2618 = vst.msk [vmem:[%s5549_s7 + $0x1] sm:$0x1] %vm6241_vm11, %v2616_v5 }
 0x3dc   : > { %v2628_v16 = vpop.permute.xlu1 %2627 }
 0x3dd   : > { %2630 = vst.msk [vmem:[%s5549_s7 + $0x1] sm:$0x1] %vm6242_vm12, %v2628_v16 }
 0x3e0   : > { %v2633_v46 = vpop.permute.xlu1 %2632 }
 0x3e1   : > { %2635 = vst.msk [vmem:[%s5549_s7 + $0x1] sm:$0x1] %vm6244_vm15, %v2633_v46 }
 0x3e4   : > { %v2638_v39 = vpop.permute.xlu1 %2637 }
 0x3e5   : > { %2640 = vst.msk [vmem:[%s5549_s7 + $0x1] sm:$0x1] %vm6247_vm1, %v2638_v39 }
 0x3e6   : > { %3041 = shalt.err (!%p3038_p11)
}
 0x3e7   : > { %s3042_s16 = scalar_lea.hbm %s5763_s14, 32  ;;  %s3046_s22 = scalar_lea.hbm %s6246_s20, 64 }
 0x3e8   : > { %p3043_p3 = scmp.ne.s32.totalorder %s5763_s14, %s3042_s16  ;;  %p3047_p6 = scmp.lt.u32.totalorder %s5763_s14, %s6246_s20 }
 0x3e9   : > { %p3048_p1 = scmp.lt.u32.totalorder %s3046_s22, %s3042_s16  ;;  %p3050_p8 = scmp.lt.u32.totalorder %s3042_s16, %s5763_s14 }
 0x3ea   : > { %p3044_p7 = pnand %p3043_p3, %p6248_p2 }
 0x3eb   : > { %p3049_p0 = por %p3048_p1, %p3047_p6 }
 0x3ec   : > { %p3045_p10 = pneg %p3044_p7 }
 0x3ed   : > { %p3051_p12 = por %p3050_p8, %p3049_p0 }
 0x3ef   : > { %p3052_p5 = pnand %p3051_p12, %p3045_p10 }
 0x3f1   : > { %3055 = shalt.err (!%p3052_p5)
}
 0x3f2   : > { %2873 = dma.vmem_to_hbm [thread:$0]  (%p6248_p2), %s5765_s2, 32, %s5763_s14, %s2642_s3  }
 0x3f3 PF: > { %s6249_s6 = sld [smem:[#allocation14_spill]]  ;;  %s6250_s0 = sld [smem:[#allocation20_spill]] }
 0x3f4   : > { %s6251_s12 = sld [smem:[#allocation19_spill]] }
 0x3f9   : > { %s2668_s7 = sand.u32 1, %s6249_s6   ;;  %p6252_p4 = scmp.ne.s32.totalorder %s6250_s0, 0 }
 0x3fa   : > { %p6253_p9 = scmp.ge.s32.totalorder %s6251_s12, 2  ;;  %s2669_s15 = scalar_lea.sflag [#allocation7], %s2668_s7 }
 0x3fc   : > { %p2884_p13 = pnand %p6253_p9, %p6252_p4 }
 0x3fe   : > { %3089 = dma.done.wait (!%p2884_p13), %s2669_s15, 32  }
 0x3ff   : > { %3091 = vsyncadd (!%p2884_p13), %s2669_s15, 4294967264  ;;  %s19_s14 = sadd.s32 1, %s6251_s12   ;;  %s6254_s9 = sld [smem:[#allocation15_spill]] }
 0x400   : > { %p16_p11 = scmp.ge.s32.totalorder %s19_s14, 4   ;;  %s6255_s10 = sld [smem:[#allocation16_spill]] }
 0x401   : > { %s6256_s11 = sld [smem:[#allocation23_spill]]  ;;  %s6257_s12 = sld [smem:[#allocation18_spill]] }
 0x402   : > { %s6258_s13 = sld [smem:[#allocation21_spill]]  ;;  %18 = sbr.rel (!%p16_p11) target bundleno = 11 (0xb), region = 87 }
 0x409   :  { %2674 = vsyncpa [#allocation6], 1 }
 0x40a   :  { %2676 = vsyncpa [#allocation6 + $0x1], 1 }
 0x40b   :  { %2677 = vsyncpa [#allocation7], 1 }
 0x40c   :  { %2679 = vsyncpa [#allocation7 + $0x1], 1 }
 0x40d   :  { %2680 = vsyncpa [#allocation8], 1 }
 0x40e   :  { %2682 = vsyncpa [#allocation8 + $0x1], 1 }

</bundles_post_ra>
